<compile_context>
chip_gen: v5e
topology: v5e:2x2
jax: 0.10.0
libtpu: 0.0.40
codegen_flags: <defaults>
</compile_context>

<pallas_src>
import functools

import jax
import jax.numpy as jnp
from jax.experimental import pallas as pl
from jax.experimental.pallas import tpu as pltpu

_BN_EPS = 1e-5
_LANES = 128          # accumulator / output lane width: exactly one dense lane tile


# ----------------------------------------------------------------------------
# Fused Pallas kernel: conv_kernel + conv_search + depthwise xcorr + head
# ----------------------------------------------------------------------------
def _depthcorr_fused_kernel(tcol_ref, scol_ref, wk_ref, bk_ref, ws_ref, bs_ref,
                            wh1_ref, bh1_ref, wh2_ref, bh2_ref, o_ref,
                            *, Hz, Wz, Wx):
    """One batch element; channels on sublanes, spatial positions on lanes."""
    f32 = jnp.float32
    bf16 = jnp.bfloat16

    # template branch: folded conv3x3+BN+ReLU as ONE MXU matmul, stays in vregs
    zf = jnp.maximum(jnp.dot(wk_ref[...], tcol_ref[0],
                             preferred_element_type=f32) + bk_ref[...], 0.0)  # (hid, Pz)

    # search branch: folded conv3x3+BN+ReLU as ONE MXU matmul, stays in vregs
    xf = jnp.maximum(jnp.dot(ws_ref[...], scol_ref[0],
                             preferred_element_type=f32) + bs_ref[...], 0.0)  # (hid, Px_pad)

    # depthwise cross-correlation: 36 static lane-shifted taps, pure register FMAs.
    # acc[c, y*Wx + x] = sum_{u,v} xf[c, (y+u)*Wx + (x+v)] * zf[c, u*Wz + v]
    # (only lanes with x < Wo are meaningful; the wrapper crops them out).
    hidden = xf.shape[0]
    acc = jnp.zeros((hidden, _LANES), f32)
    for u in range(Hz):
        for v in range(Wz):
            tap = u * Wz + v
            shift = u * Wx + v
            acc = acc + xf[:, shift:shift + _LANES] * zf[:, tap:tap + 1]

    # head: (1x1 conv + BN + ReLU) then 1x1 conv, spatial stays lane-dense
    h = jnp.maximum(jnp.dot(wh1_ref[...], acc.astype(bf16),
                            preferred_element_type=f32) + bh1_ref[...], 0.0)
    o_ref[0] = jnp.dot(wh2_ref[...], h.astype(bf16),
                       preferred_element_type=f32) + bh2_ref[...]


# ----------------------------------------------------------------------------
# Wrapper: NCHW -> (B, K, P) patches (no transposes) + pallas_call + crop
# ----------------------------------------------------------------------------
def _im2col_nchw(x, k):
    """(B, C, H, W) -> (B, C*k*k, Ho*Wo) valid-conv patches, k-index = c*k*k + dy*k + dx
    (matches an OIHW conv weight reshaped to (O, C*k*k)); avoids NCHW->NHWC transposes."""
    B, C, H, W = x.shape
    Ho, Wo = H - k + 1, W - k + 1
    taps = [x[:, :, dy:dy + Ho, dx:dx + Wo] for dy in range(k) for dx in range(k)]
    return jnp.stack(taps, axis=2).reshape(B, C * k * k, Ho * Wo)


def depthcorr_forward(params, kernel_nchw, search_nchw, *, ksize=3):
    """DepthCorr.forward (eval mode).  Inputs/outputs are NCHW like the PyTorch module."""
    B, Cin, Hk, Wk = kernel_nchw.shape
    _, _, Hs, Ws = search_nchw.shape
    hidden, K = params['wk_t'].shape
    Cout = params['wh2_t'].shape[0]
    assert K == ksize * ksize * Cin

    Hz, Wz = Hk - ksize + 1, Wk - ksize + 1        # template feature spatial
    Hx, Wx = Hs - ksize + 1, Ws - ksize + 1        # search feature spatial
    Ho, Wo = Hx - Hz + 1, Wx - Wz + 1              # correlation / output spatial
    Pz, Px = Hz * Wz, Hx * Wx
    if Ho * Wx > _LANES:
        raise NotImplementedError("correlation map does not fit in one lane tile")

    # Pad the search-patch lane dim so every shifted tap slice [s, s+_LANES) is in range.
    s_max = (Hz - 1) * Wx + (Wz - 1)
    Px_pad = ((max(Px, s_max + _LANES) + _LANES - 1) // _LANES) * _LANES

    bf16 = jnp.bfloat16
    tcol = _im2col_nchw(kernel_nchw, ksize).astype(bf16)            # (B, K, Pz)
    scol = _im2col_nchw(search_nchw, ksize).astype(bf16)            # (B, K, Px)
    scol = jnp.pad(scol, ((0, 0), (0, 0), (0, Px_pad - Px)))        # (B, K, Px_pad)

    kern = functools.partial(_depthcorr_fused_kernel, Hz=Hz, Wz=Wz, Wx=Wx)

    flops = 2 * B * (hidden * K * (Pz + Px_pad)
                     + Hz * Wz * hidden * _LANES
                     + hidden * (hidden + Cout) * _LANES)
    bytes_accessed = (2 * (tcol.size + scol.size)
                      + 2 * (2 * hidden * K + hidden * hidden + Cout * hidden)
                      + 4 * (3 * hidden + Cout)
                      + 4 * B * Cout * _LANES)

    out_wide = pl.pallas_call(
        kern,
        out_shape=jax.ShapeDtypeStruct((B, Cout, _LANES), jnp.float32),
        grid=(B,),
        in_specs=[
            pl.BlockSpec((1, K, Pz), lambda i: (i, 0, 0)),       # template patches (bf16)
            pl.BlockSpec((1, K, Px_pad), lambda i: (i, 0, 0)),   # search patches (bf16)
            pl.BlockSpec((hidden, K), lambda i: (0, 0)),         # conv_kernel W (BN folded)
            pl.BlockSpec((hidden, 1), lambda i: (0, 0)),         # conv_kernel bias (BN)
            pl.BlockSpec((hidden, K), lambda i: (0, 0)),         # conv_search W (BN folded)
            pl.BlockSpec((hidden, 1), lambda i: (0, 0)),         # conv_search bias (BN)
            pl.BlockSpec((hidden, hidden), lambda i: (0, 0)),    # head conv1 W (BN folded)
            pl.BlockSpec((hidden, 1), lambda i: (0, 0)),         # head conv1 bias (BN)
            pl.BlockSpec((Cout, hidden), lambda i: (0, 0)),      # head conv2 W
            pl.BlockSpec((Cout, 1), lambda i: (0, 0)),           # head conv2 bias
        ],
        out_specs=pl.BlockSpec((1, Cout, _LANES), lambda i: (i, 0, 0)),
        compiler_params=pltpu.CompilerParams(dimension_semantics=("parallel",)),
        cost_estimate=pl.CostEstimate(flops=int(flops), transcendentals=0,
                                      bytes_accessed=int(bytes_accessed)),
    )(tcol, scol, params['wk_t'], params['bk'], params['ws_t'], params['bs'],
      params['wh1_t'], params['bh1'], params['wh2_t'], params['bh2'])

    # Output is already channels-first; just crop the wide correlation lanes to (Ho, Wo).
    return out_wide[:, :, :Ho * Wx].reshape(B, Cout, Ho, Wx)[:, :, :, :Wo]


# ----------------------------------------------------------------------------
# Parameters (random, deterministic) + eval-mode BN folding (bf16 weights)
# ----------------------------------------------------------------------------
def init_params(key, in_channels=16, hidden=32, out_channels=20, ksize=3):
    ks = jax.random.split(key, 8)

    def rnd(k, shape, s=0.1):
        return s * jax.random.normal(k, shape, jnp.float32)

    def bn_params(k, n):
        k1, k2, k3, k4 = jax.random.split(k, 4)
        gamma = 1.0 + 0.1 * jax.random.normal(k1, (n,), jnp.float32)
        beta = 0.1 * jax.random.normal(k2, (n,), jnp.float32)
        mean = 0.1 * jax.random.normal(k3, (n,), jnp.float32)
        var = 0.5 + jnp.abs(jax.random.normal(k4, (n,), jnp.float32))
        return gamma, beta, mean, var

    raw = dict(
        wk=rnd(ks[0], (hidden, in_channels, ksize, ksize)),    # OIHW, conv_kernel
        bn_k=bn_params(ks[1], hidden),
        ws=rnd(ks[2], (hidden, in_channels, ksize, ksize)),    # OIHW, conv_search
        bn_s=bn_params(ks[3], hidden),
        wh1=rnd(ks[4], (hidden, hidden)),                      # head 1x1 conv (out, in)
        bn_h=bn_params(ks[5], hidden),
        wh2=rnd(ks[6], (out_channels, hidden)),                # head 1x1 conv (out, in)
        bh2=rnd(ks[7], (out_channels,)),
    )

    def fold(bn):  # eval-mode BN -> per-channel affine to fold into the bias-free conv
        gamma, beta, mean, var = bn
        scale = gamma * jax.lax.rsqrt(var + _BN_EPS)
        return scale, beta - mean * scale

    sk, bk = fold(raw['bn_k'])
    ss, bs = fold(raw['bn_s'])
    sh, bh1 = fold(raw['bn_h'])
    K = ksize * ksize * in_channels
    bf16 = jnp.bfloat16
    fused = dict(
        wk_t=(raw['wk'] * sk[:, None, None, None]).reshape(hidden, K).astype(bf16),
        bk=bk[:, None],
        ws_t=(raw['ws'] * ss[:, None, None, None]).reshape(hidden, K).astype(bf16),
        bs=bs[:, None],
        wh1_t=(raw['wh1'] * sh[:, None]).astype(bf16),
        bh1=bh1[:, None],
        wh2_t=raw['wh2'].astype(bf16),
        bh2=raw['bh2'][:, None],
    )
    return raw, fused


# ----------------------------------------------------------------------------
# Pure-XLA reference (mirrors the PyTorch DepthCorr in eval mode, NCHW, f32)
# ----------------------------------------------------------------------------
def ref_forward(raw, kernel_nchw, search_nchw):
    def bn_affine(bn):
        gamma, beta, mean, var = bn
        scale = gamma * jax.lax.rsqrt(var + _BN_EPS)
        return scale, beta - mean * scale

    def conv_bn_relu(x, w_oihw, bn):
        y = jax.lax.conv_general_dilated(
            x, w_oihw, window_strides=(1, 1), padding='VALID',
            dimension_numbers=('NCHW', 'OIHW', 'NCHW'))
        scale, shift = bn_affine(bn)
        return jnp.maximum(y * scale[None, :, None, None]
                           + shift[None, :, None, None], 0.0)

    zf = conv_bn_relu(kernel_nchw, raw['wk'], raw['bn_k'])
    xf = conv_bn_relu(search_nchw, raw['ws'], raw['bn_s'])

    B, C, Hz, Wz = zf.shape
    Hx, Wx = xf.shape[2], xf.shape[3]
    Ho, Wo = Hx - Hz + 1, Wx - Wz + 1
    corr = jnp.zeros((B, C, Ho, Wo), jnp.float32)
    for u in range(Hz):
        for v in range(Wz):
            corr = corr + xf[:, :, u:u + Ho, v:v + Wo] * zf[:, :, u:u + 1, v:v + 1]

    scale, shift = bn_affine(raw['bn_h'])
    h = jnp.einsum('bchw,dc->bdhw', corr, raw['wh1'])
    h = jnp.maximum(h * scale[None, :, None, None] + shift[None, :, None, None], 0.0)
    out = jnp.einsum('bchw,dc->bdhw', h, raw['wh2'])
    return out + raw['bh2'][None, :, None, None]


# ----------------------------------------------------------------------------
if __name__ == "__main__":
    key = jax.random.PRNGKey(0)
    k_p, k_t, k_s = jax.random.split(key, 3)

    in_channels, hidden, out_channels, ksize = 16, 32, 20, 3
    raw, fused = init_params(k_p, in_channels, hidden, out_channels, ksize)

    # NCHW inputs like the PyTorch module: template ("kernel") and search crops.
    template = jax.random.normal(k_t, (2, in_channels, 8, 8), jnp.float32)
    search = jax.random.normal(k_s, (2, in_channels, 16, 16), jnp.float32)

    fwd = jax.jit(lambda p, t, s: depthcorr_forward(p, t, s, ksize=ksize))
    out = jax.block_until_ready(fwd(fused, template, search))

    assert out.shape == (2, out_channels, 9, 9), out.shape
    assert bool(jnp.all(jnp.isfinite(out)))

    ref = ref_forward(raw, template, search)
    max_err = float(jnp.max(jnp.abs(out - ref)))
    # bf16 patches/weights (per perf review) with f32 accumulation: ~1e-2-level error.
    assert bool(jnp.allclose(out, ref, rtol=5e-2, atol=5e-2)), f"max|diff|={max_err}"

    print("KERNEL_OK")
</pallas_src>

<mosaic_0001>
module attributes {stable_mosaic.version = 11 : i64} {
  func.func @_depthcorr_fused_kernel(%arg0: i32, %arg1: memref<1x144x36xbf16, #tpu.memory_space<vmem>>, %arg2: memref<1x144x256xbf16, #tpu.memory_space<vmem>>, %arg3: memref<32x144xbf16, #tpu.memory_space<vmem>>, %arg4: memref<32x1xf32, #tpu.memory_space<vmem>>, %arg5: memref<32x144xbf16, #tpu.memory_space<vmem>>, %arg6: memref<32x1xf32, #tpu.memory_space<vmem>>, %arg7: memref<32x32xbf16, #tpu.memory_space<vmem>>, %arg8: memref<32x1xf32, #tpu.memory_space<vmem>>, %arg9: memref<20x32xbf16, #tpu.memory_space<vmem>>, %arg10: memref<20x1xf32, #tpu.memory_space<vmem>>, %arg11: memref<1x20x128xf32, #tpu.memory_space<vmem>>) attributes {dimension_semantics = [#tpu.dimension_semantics<parallel>], iteration_bounds = array<i64: 2>, scalar_prefetch = 0 : i64, scratch_operands = 0 : i64, tpu.core_type = #tpu.core_type<tc>, window_params = [{transform_indices = @transform_0, window_bounds = array<i64: 1, 144, 36>}, {transform_indices = @transform_1, window_bounds = array<i64: 1, 144, 256>}, {pipeline_mode = #tpu.pipeline_mode<synchronous>, transform_indices = @transform_2, window_bounds = array<i64: 32, 144>}, {pipeline_mode = #tpu.pipeline_mode<synchronous>, transform_indices = @transform_3, window_bounds = array<i64: 32, 1>}, {pipeline_mode = #tpu.pipeline_mode<synchronous>, transform_indices = @transform_4, window_bounds = array<i64: 32, 144>}, {pipeline_mode = #tpu.pipeline_mode<synchronous>, transform_indices = @transform_5, window_bounds = array<i64: 32, 1>}, {pipeline_mode = #tpu.pipeline_mode<synchronous>, transform_indices = @transform_6, window_bounds = array<i64: 32, 32>}, {pipeline_mode = #tpu.pipeline_mode<synchronous>, transform_indices = @transform_7, window_bounds = array<i64: 32, 1>}, {pipeline_mode = #tpu.pipeline_mode<synchronous>, transform_indices = @transform_8, window_bounds = array<i64: 20, 32>}, {pipeline_mode = #tpu.pipeline_mode<synchronous>, transform_indices = @transform_9, window_bounds = array<i64: 20, 1>}, {transform_indices = @transform_10, window_bounds = array<i64: 1, 20, 128>}]} {
    %c0 = arith.constant 0 : index
    %c0_0 = arith.constant 0 : index
    %0 = vector.load %arg3[%c0, %c0_0] : memref<32x144xbf16, #tpu.memory_space<vmem>>, vector<32x144xbf16>
    %c0_1 = arith.constant 0 : index
    %c0_2 = arith.constant 0 : index
    %c0_3 = arith.constant 0 : index
    %1 = vector.load %arg1[%c0_1, %c0_2, %c0_3] : memref<1x144x36xbf16, #tpu.memory_space<vmem>>, vector<1x144x36xbf16>
    %2 = vector.shape_cast %1 : vector<1x144x36xbf16> to vector<144x36xbf16>
    %cst = arith.constant dense<0.000000e+00> : vector<32x36xf32>
    %3 = tpu.matmul %0, %2, %cst {dimension_numbers = #tpu.dot_dimension_numbers<[1], [0], [0], [1], [0, 0, 1, 1], [], []>} : vector<32x144xbf16>, vector<144x36xbf16>, vector<32x36xf32> -> vector<32x36xf32>
    %c0_4 = arith.constant 0 : index
    %c0_5 = arith.constant 0 : index
    %4 = vector.load %arg4[%c0_4, %c0_5] : memref<32x1xf32, #tpu.memory_space<vmem>>, vector<32x1xf32>
    %5 = vector.broadcast %4 : vector<32x1xf32> to vector<32x36xf32>
    %6 = arith.addf %3, %5 : vector<32x36xf32>
    %cst_6 = arith.constant 0.000000e+00 : f32
    %7 = vector.broadcast %cst_6 : f32 to vector<32x36xf32>
    %8 = arith.maximumf %6, %7 : vector<32x36xf32>
    %c0_7 = arith.constant 0 : index
    %c0_8 = arith.constant 0 : index
    %9 = vector.load %arg5[%c0_7, %c0_8] : memref<32x144xbf16, #tpu.memory_space<vmem>>, vector<32x144xbf16>
    %c0_9 = arith.constant 0 : index
    %c0_10 = arith.constant 0 : index
    %c0_11 = arith.constant 0 : index
    %10 = vector.load %arg2[%c0_9, %c0_10, %c0_11] : memref<1x144x256xbf16, #tpu.memory_space<vmem>>, vector<1x144x256xbf16>
    %11 = vector.shape_cast %10 : vector<1x144x256xbf16> to vector<144x256xbf16>
    %cst_12 = arith.constant dense<0.000000e+00> : vector<32x256xf32>
    %12 = tpu.matmul %9, %11, %cst_12 {dimension_numbers = #tpu.dot_dimension_numbers<[1], [0], [0], [1], [0, 0, 1, 1], [], []>} : vector<32x144xbf16>, vector<144x256xbf16>, vector<32x256xf32> -> vector<32x256xf32>
    %c0_13 = arith.constant 0 : index
    %c0_14 = arith.constant 0 : index
    %13 = vector.load %arg6[%c0_13, %c0_14] : memref<32x1xf32, #tpu.memory_space<vmem>>, vector<32x1xf32>
    %14 = vector.broadcast %13 : vector<32x1xf32> to vector<32x256xf32>
    %15 = arith.addf %12, %14 : vector<32x256xf32>
    %cst_15 = arith.constant 0.000000e+00 : f32
    %16 = vector.broadcast %cst_15 : f32 to vector<32x256xf32>
    %17 = arith.maximumf %15, %16 : vector<32x256xf32>
    %cst_16 = arith.constant 0.000000e+00 : f32
    %18 = vector.broadcast %cst_16 : f32 to vector<32x128xf32>
    %19 = vector.extract_strided_slice %17 {offsets = [0, 0], sizes = [32, 128], strides = [1, 1]} : vector<32x256xf32> to vector<32x128xf32>
    %20 = vector.extract_strided_slice %8 {offsets = [0, 0], sizes = [32, 1], strides = [1, 1]} : vector<32x36xf32> to vector<32x1xf32>
    %21 = vector.broadcast %20 : vector<32x1xf32> to vector<32x128xf32>
    %22 = arith.mulf %19, %21 : vector<32x128xf32>
    %23 = arith.addf %18, %22 : vector<32x128xf32>
    %24 = vector.extract_strided_slice %17 {offsets = [0, 1], sizes = [32, 128], strides = [1, 1]} : vector<32x256xf32> to vector<32x128xf32>
    %25 = vector.extract_strided_slice %8 {offsets = [0, 1], sizes = [32, 1], strides = [1, 1]} : vector<32x36xf32> to vector<32x1xf32>
    %26 = vector.broadcast %25 : vector<32x1xf32> to vector<32x128xf32>
    %27 = arith.mulf %24, %26 : vector<32x128xf32>
    %28 = arith.addf %23, %27 : vector<32x128xf32>
    %29 = vector.extract_strided_slice %17 {offsets = [0, 2], sizes = [32, 128], strides = [1, 1]} : vector<32x256xf32> to vector<32x128xf32>
    %30 = vector.extract_strided_slice %8 {offsets = [0, 2], sizes = [32, 1], strides = [1, 1]} : vector<32x36xf32> to vector<32x1xf32>
    %31 = vector.broadcast %30 : vector<32x1xf32> to vector<32x128xf32>
    %32 = arith.mulf %29, %31 : vector<32x128xf32>
    %33 = arith.addf %28, %32 : vector<32x128xf32>
    %34 = vector.extract_strided_slice %17 {offsets = [0, 3], sizes = [32, 128], strides = [1, 1]} : vector<32x256xf32> to vector<32x128xf32>
    %35 = vector.extract_strided_slice %8 {offsets = [0, 3], sizes = [32, 1], strides = [1, 1]} : vector<32x36xf32> to vector<32x1xf32>
    %36 = vector.broadcast %35 : vector<32x1xf32> to vector<32x128xf32>
    %37 = arith.mulf %34, %36 : vector<32x128xf32>
    %38 = arith.addf %33, %37 : vector<32x128xf32>
    %39 = vector.extract_strided_slice %17 {offsets = [0, 4], sizes = [32, 128], strides = [1, 1]} : vector<32x256xf32> to vector<32x128xf32>
    %40 = vector.extract_strided_slice %8 {offsets = [0, 4], sizes = [32, 1], strides = [1, 1]} : vector<32x36xf32> to vector<32x1xf32>
    %41 = vector.broadcast %40 : vector<32x1xf32> to vector<32x128xf32>
    %42 = arith.mulf %39, %41 : vector<32x128xf32>
    %43 = arith.addf %38, %42 : vector<32x128xf32>
    %44 = vector.extract_strided_slice %17 {offsets = [0, 5], sizes = [32, 128], strides = [1, 1]} : vector<32x256xf32> to vector<32x128xf32>
    %45 = vector.extract_strided_slice %8 {offsets = [0, 5], sizes = [32, 1], strides = [1, 1]} : vector<32x36xf32> to vector<32x1xf32>
    %46 = vector.broadcast %45 : vector<32x1xf32> to vector<32x128xf32>
    %47 = arith.mulf %44, %46 : vector<32x128xf32>
    %48 = arith.addf %43, %47 : vector<32x128xf32>
    %49 = vector.extract_strided_slice %17 {offsets = [0, 14], sizes = [32, 128], strides = [1, 1]} : vector<32x256xf32> to vector<32x128xf32>
    %50 = vector.extract_strided_slice %8 {offsets = [0, 6], sizes = [32, 1], strides = [1, 1]} : vector<32x36xf32> to vector<32x1xf32>
    %51 = vector.broadcast %50 : vector<32x1xf32> to vector<32x128xf32>
    %52 = arith.mulf %49, %51 : vector<32x128xf32>
    %53 = arith.addf %48, %52 : vector<32x128xf32>
    %54 = vector.extract_strided_slice %17 {offsets = [0, 15], sizes = [32, 128], strides = [1, 1]} : vector<32x256xf32> to vector<32x128xf32>
    %55 = vector.extract_strided_slice %8 {offsets = [0, 7], sizes = [32, 1], strides = [1, 1]} : vector<32x36xf32> to vector<32x1xf32>
    %56 = vector.broadcast %55 : vector<32x1xf32> to vector<32x128xf32>
    %57 = arith.mulf %54, %56 : vector<32x128xf32>
    %58 = arith.addf %53, %57 : vector<32x128xf32>
    %59 = vector.extract_strided_slice %17 {offsets = [0, 16], sizes = [32, 128], strides = [1, 1]} : vector<32x256xf32> to vector<32x128xf32>
    %60 = vector.extract_strided_slice %8 {offsets = [0, 8], sizes = [32, 1], strides = [1, 1]} : vector<32x36xf32> to vector<32x1xf32>
    %61 = vector.broadcast %60 : vector<32x1xf32> to vector<32x128xf32>
    %62 = arith.mulf %59, %61 : vector<32x128xf32>
    %63 = arith.addf %58, %62 : vector<32x128xf32>
    %64 = vector.extract_strided_slice %17 {offsets = [0, 17], sizes = [32, 128], strides = [1, 1]} : vector<32x256xf32> to vector<32x128xf32>
    %65 = vector.extract_strided_slice %8 {offsets = [0, 9], sizes = [32, 1], strides = [1, 1]} : vector<32x36xf32> to vector<32x1xf32>
    %66 = vector.broadcast %65 : vector<32x1xf32> to vector<32x128xf32>
    %67 = arith.mulf %64, %66 : vector<32x128xf32>
    %68 = arith.addf %63, %67 : vector<32x128xf32>
    %69 = vector.extract_strided_slice %17 {offsets = [0, 18], sizes = [32, 128], strides = [1, 1]} : vector<32x256xf32> to vector<32x128xf32>
    %70 = vector.extract_strided_slice %8 {offsets = [0, 10], sizes = [32, 1], strides = [1, 1]} : vector<32x36xf32> to vector<32x1xf32>
    %71 = vector.broadcast %70 : vector<32x1xf32> to vector<32x128xf32>
    %72 = arith.mulf %69, %71 : vector<32x128xf32>
    %73 = arith.addf %68, %72 : vector<32x128xf32>
    %74 = vector.extract_strided_slice %17 {offsets = [0, 19], sizes = [32, 128], strides = [1, 1]} : vector<32x256xf32> to vector<32x128xf32>
    %75 = vector.extract_strided_slice %8 {offsets = [0, 11], sizes = [32, 1], strides = [1, 1]} : vector<32x36xf32> to vector<32x1xf32>
    %76 = vector.broadcast %75 : vector<32x1xf32> to vector<32x128xf32>
    %77 = arith.mulf %74, %76 : vector<32x128xf32>
    %78 = arith.addf %73, %77 : vector<32x128xf32>
    %79 = vector.extract_strided_slice %17 {offsets = [0, 28], sizes = [32, 128], strides = [1, 1]} : vector<32x256xf32> to vector<32x128xf32>
    %80 = vector.extract_strided_slice %8 {offsets = [0, 12], sizes = [32, 1], strides = [1, 1]} : vector<32x36xf32> to vector<32x1xf32>
    %81 = vector.broadcast %80 : vector<32x1xf32> to vector<32x128xf32>
    %82 = arith.mulf %79, %81 : vector<32x128xf32>
    %83 = arith.addf %78, %82 : vector<32x128xf32>
    %84 = vector.extract_strided_slice %17 {offsets = [0, 29], sizes = [32, 128], strides = [1, 1]} : vector<32x256xf32> to vector<32x128xf32>
    %85 = vector.extract_strided_slice %8 {offsets = [0, 13], sizes = [32, 1], strides = [1, 1]} : vector<32x36xf32> to vector<32x1xf32>
    %86 = vector.broadcast %85 : vector<32x1xf32> to vector<32x128xf32>
    %87 = arith.mulf %84, %86 : vector<32x128xf32>
    %88 = arith.addf %83, %87 : vector<32x128xf32>
    %89 = vector.extract_strided_slice %17 {offsets = [0, 30], sizes = [32, 128], strides = [1, 1]} : vector<32x256xf32> to vector<32x128xf32>
    %90 = vector.extract_strided_slice %8 {offsets = [0, 14], sizes = [32, 1], strides = [1, 1]} : vector<32x36xf32> to vector<32x1xf32>
    %91 = vector.broadcast %90 : vector<32x1xf32> to vector<32x128xf32>
    %92 = arith.mulf %89, %91 : vector<32x128xf32>
    %93 = arith.addf %88, %92 : vector<32x128xf32>
    %94 = vector.extract_strided_slice %17 {offsets = [0, 31], sizes = [32, 128], strides = [1, 1]} : vector<32x256xf32> to vector<32x128xf32>
    %95 = vector.extract_strided_slice %8 {offsets = [0, 15], sizes = [32, 1], strides = [1, 1]} : vector<32x36xf32> to vector<32x1xf32>
    %96 = vector.broadcast %95 : vector<32x1xf32> to vector<32x128xf32>
    %97 = arith.mulf %94, %96 : vector<32x128xf32>
    %98 = arith.addf %93, %97 : vector<32x128xf32>
    %99 = vector.extract_strided_slice %17 {offsets = [0, 32], sizes = [32, 128], strides = [1, 1]} : vector<32x256xf32> to vector<32x128xf32>
    %100 = vector.extract_strided_slice %8 {offsets = [0, 16], sizes = [32, 1], strides = [1, 1]} : vector<32x36xf32> to vector<32x1xf32>
    %101 = vector.broadcast %100 : vector<32x1xf32> to vector<32x128xf32>
    %102 = arith.mulf %99, %101 : vector<32x128xf32>
    %103 = arith.addf %98, %102 : vector<32x128xf32>
    %104 = vector.extract_strided_slice %17 {offsets = [0, 33], sizes = [32, 128], strides = [1, 1]} : vector<32x256xf32> to vector<32x128xf32>
    %105 = vector.extract_strided_slice %8 {offsets = [0, 17], sizes = [32, 1], strides = [1, 1]} : vector<32x36xf32> to vector<32x1xf32>
    %106 = vector.broadcast %105 : vector<32x1xf32> to vector<32x128xf32>
    %107 = arith.mulf %104, %106 : vector<32x128xf32>
    %108 = arith.addf %103, %107 : vector<32x128xf32>
    %109 = vector.extract_strided_slice %17 {offsets = [0, 42], sizes = [32, 128], strides = [1, 1]} : vector<32x256xf32> to vector<32x128xf32>
    %110 = vector.extract_strided_slice %8 {offsets = [0, 18], sizes = [32, 1], strides = [1, 1]} : vector<32x36xf32> to vector<32x1xf32>
    %111 = vector.broadcast %110 : vector<32x1xf32> to vector<32x128xf32>
    %112 = arith.mulf %109, %111 : vector<32x128xf32>
    %113 = arith.addf %108, %112 : vector<32x128xf32>
    %114 = vector.extract_strided_slice %17 {offsets = [0, 43], sizes = [32, 128], strides = [1, 1]} : vector<32x256xf32> to vector<32x128xf32>
    %115 = vector.extract_strided_slice %8 {offsets = [0, 19], sizes = [32, 1], strides = [1, 1]} : vector<32x36xf32> to vector<32x1xf32>
    %116 = vector.broadcast %115 : vector<32x1xf32> to vector<32x128xf32>
    %117 = arith.mulf %114, %116 : vector<32x128xf32>
    %118 = arith.addf %113, %117 : vector<32x128xf32>
    %119 = vector.extract_strided_slice %17 {offsets = [0, 44], sizes = [32, 128], strides = [1, 1]} : vector<32x256xf32> to vector<32x128xf32>
    %120 = vector.extract_strided_slice %8 {offsets = [0, 20], sizes = [32, 1], strides = [1, 1]} : vector<32x36xf32> to vector<32x1xf32>
    %121 = vector.broadcast %120 : vector<32x1xf32> to vector<32x128xf32>
    %122 = arith.mulf %119, %121 : vector<32x128xf32>
    %123 = arith.addf %118, %122 : vector<32x128xf32>
    %124 = vector.extract_strided_slice %17 {offsets = [0, 45], sizes = [32, 128], strides = [1, 1]} : vector<32x256xf32> to vector<32x128xf32>
    %125 = vector.extract_strided_slice %8 {offsets = [0, 21], sizes = [32, 1], strides = [1, 1]} : vector<32x36xf32> to vector<32x1xf32>
    %126 = vector.broadcast %125 : vector<32x1xf32> to vector<32x128xf32>
    %127 = arith.mulf %124, %126 : vector<32x128xf32>
    %128 = arith.addf %123, %127 : vector<32x128xf32>
    %129 = vector.extract_strided_slice %17 {offsets = [0, 46], sizes = [32, 128], strides = [1, 1]} : vector<32x256xf32> to vector<32x128xf32>
    %130 = vector.extract_strided_slice %8 {offsets = [0, 22], sizes = [32, 1], strides = [1, 1]} : vector<32x36xf32> to vector<32x1xf32>
    %131 = vector.broadcast %130 : vector<32x1xf32> to vector<32x128xf32>
    %132 = arith.mulf %129, %131 : vector<32x128xf32>
    %133 = arith.addf %128, %132 : vector<32x128xf32>
    %134 = vector.extract_strided_slice %17 {offsets = [0, 47], sizes = [32, 128], strides = [1, 1]} : vector<32x256xf32> to vector<32x128xf32>
    %135 = vector.extract_strided_slice %8 {offsets = [0, 23], sizes = [32, 1], strides = [1, 1]} : vector<32x36xf32> to vector<32x1xf32>
    %136 = vector.broadcast %135 : vector<32x1xf32> to vector<32x128xf32>
    %137 = arith.mulf %134, %136 : vector<32x128xf32>
    %138 = arith.addf %133, %137 : vector<32x128xf32>
    %139 = vector.extract_strided_slice %17 {offsets = [0, 56], sizes = [32, 128], strides = [1, 1]} : vector<32x256xf32> to vector<32x128xf32>
    %140 = vector.extract_strided_slice %8 {offsets = [0, 24], sizes = [32, 1], strides = [1, 1]} : vector<32x36xf32> to vector<32x1xf32>
    %141 = vector.broadcast %140 : vector<32x1xf32> to vector<32x128xf32>
    %142 = arith.mulf %139, %141 : vector<32x128xf32>
    %143 = arith.addf %138, %142 : vector<32x128xf32>
    %144 = vector.extract_strided_slice %17 {offsets = [0, 57], sizes = [32, 128], strides = [1, 1]} : vector<32x256xf32> to vector<32x128xf32>
    %145 = vector.extract_strided_slice %8 {offsets = [0, 25], sizes = [32, 1], strides = [1, 1]} : vector<32x36xf32> to vector<32x1xf32>
    %146 = vector.broadcast %145 : vector<32x1xf32> to vector<32x128xf32>
    %147 = arith.mulf %144, %146 : vector<32x128xf32>
    %148 = arith.addf %143, %147 : vector<32x128xf32>
    %149 = vector.extract_strided_slice %17 {offsets = [0, 58], sizes = [32, 128], strides = [1, 1]} : vector<32x256xf32> to vector<32x128xf32>
    %150 = vector.extract_strided_slice %8 {offsets = [0, 26], sizes = [32, 1], strides = [1, 1]} : vector<32x36xf32> to vector<32x1xf32>
    %151 = vector.broadcast %150 : vector<32x1xf32> to vector<32x128xf32>
    %152 = arith.mulf %149, %151 : vector<32x128xf32>
    %153 = arith.addf %148, %152 : vector<32x128xf32>
    %154 = vector.extract_strided_slice %17 {offsets = [0, 59], sizes = [32, 128], strides = [1, 1]} : vector<32x256xf32> to vector<32x128xf32>
    %155 = vector.extract_strided_slice %8 {offsets = [0, 27], sizes = [32, 1], strides = [1, 1]} : vector<32x36xf32> to vector<32x1xf32>
    %156 = vector.broadcast %155 : vector<32x1xf32> to vector<32x128xf32>
    %157 = arith.mulf %154, %156 : vector<32x128xf32>
    %158 = arith.addf %153, %157 : vector<32x128xf32>
    %159 = vector.extract_strided_slice %17 {offsets = [0, 60], sizes = [32, 128], strides = [1, 1]} : vector<32x256xf32> to vector<32x128xf32>
    %160 = vector.extract_strided_slice %8 {offsets = [0, 28], sizes = [32, 1], strides = [1, 1]} : vector<32x36xf32> to vector<32x1xf32>
    %161 = vector.broadcast %160 : vector<32x1xf32> to vector<32x128xf32>
    %162 = arith.mulf %159, %161 : vector<32x128xf32>
    %163 = arith.addf %158, %162 : vector<32x128xf32>
    %164 = vector.extract_strided_slice %17 {offsets = [0, 61], sizes = [32, 128], strides = [1, 1]} : vector<32x256xf32> to vector<32x128xf32>
    %165 = vector.extract_strided_slice %8 {offsets = [0, 29], sizes = [32, 1], strides = [1, 1]} : vector<32x36xf32> to vector<32x1xf32>
    %166 = vector.broadcast %165 : vector<32x1xf32> to vector<32x128xf32>
    %167 = arith.mulf %164, %166 : vector<32x128xf32>
    %168 = arith.addf %163, %167 : vector<32x128xf32>
    %169 = vector.extract_strided_slice %17 {offsets = [0, 70], sizes = [32, 128], strides = [1, 1]} : vector<32x256xf32> to vector<32x128xf32>
    %170 = vector.extract_strided_slice %8 {offsets = [0, 30], sizes = [32, 1], strides = [1, 1]} : vector<32x36xf32> to vector<32x1xf32>
    %171 = vector.broadcast %170 : vector<32x1xf32> to vector<32x128xf32>
    %172 = arith.mulf %169, %171 : vector<32x128xf32>
    %173 = arith.addf %168, %172 : vector<32x128xf32>
    %174 = vector.extract_strided_slice %17 {offsets = [0, 71], sizes = [32, 128], strides = [1, 1]} : vector<32x256xf32> to vector<32x128xf32>
    %175 = vector.extract_strided_slice %8 {offsets = [0, 31], sizes = [32, 1], strides = [1, 1]} : vector<32x36xf32> to vector<32x1xf32>
    %176 = vector.broadcast %175 : vector<32x1xf32> to vector<32x128xf32>
    %177 = arith.mulf %174, %176 : vector<32x128xf32>
    %178 = arith.addf %173, %177 : vector<32x128xf32>
    %179 = vector.extract_strided_slice %17 {offsets = [0, 72], sizes = [32, 128], strides = [1, 1]} : vector<32x256xf32> to vector<32x128xf32>
    %180 = vector.extract_strided_slice %8 {offsets = [0, 32], sizes = [32, 1], strides = [1, 1]} : vector<32x36xf32> to vector<32x1xf32>
    %181 = vector.broadcast %180 : vector<32x1xf32> to vector<32x128xf32>
    %182 = arith.mulf %179, %181 : vector<32x128xf32>
    %183 = arith.addf %178, %182 : vector<32x128xf32>
    %184 = vector.extract_strided_slice %17 {offsets = [0, 73], sizes = [32, 128], strides = [1, 1]} : vector<32x256xf32> to vector<32x128xf32>
    %185 = vector.extract_strided_slice %8 {offsets = [0, 33], sizes = [32, 1], strides = [1, 1]} : vector<32x36xf32> to vector<32x1xf32>
    %186 = vector.broadcast %185 : vector<32x1xf32> to vector<32x128xf32>
    %187 = arith.mulf %184, %186 : vector<32x128xf32>
    %188 = arith.addf %183, %187 : vector<32x128xf32>
    %189 = vector.extract_strided_slice %17 {offsets = [0, 74], sizes = [32, 128], strides = [1, 1]} : vector<32x256xf32> to vector<32x128xf32>
    %190 = vector.extract_strided_slice %8 {offsets = [0, 34], sizes = [32, 1], strides = [1, 1]} : vector<32x36xf32> to vector<32x1xf32>
    %191 = vector.broadcast %190 : vector<32x1xf32> to vector<32x128xf32>
    %192 = arith.mulf %189, %191 : vector<32x128xf32>
    %193 = arith.addf %188, %192 : vector<32x128xf32>
    %194 = vector.extract_strided_slice %17 {offsets = [0, 75], sizes = [32, 128], strides = [1, 1]} : vector<32x256xf32> to vector<32x128xf32>
    %195 = vector.extract_strided_slice %8 {offsets = [0, 35], sizes = [32, 1], strides = [1, 1]} : vector<32x36xf32> to vector<32x1xf32>
    %196 = vector.broadcast %195 : vector<32x1xf32> to vector<32x128xf32>
    %197 = arith.mulf %194, %196 : vector<32x128xf32>
    %198 = arith.addf %193, %197 : vector<32x128xf32>
    %c0_17 = arith.constant 0 : index
    %c0_18 = arith.constant 0 : index
    %199 = vector.load %arg7[%c0_17, %c0_18] : memref<32x32xbf16, #tpu.memory_space<vmem>>, vector<32x32xbf16>
    %200 = arith.truncf %198 : vector<32x128xf32> to vector<32x128xbf16>
    %cst_19 = arith.constant dense<0.000000e+00> : vector<32x128xf32>
    %201 = tpu.matmul %199, %200, %cst_19 {dimension_numbers = #tpu.dot_dimension_numbers<[1], [0], [0], [1], [0, 0, 1, 1], [], []>} : vector<32x32xbf16>, vector<32x128xbf16>, vector<32x128xf32> -> vector<32x128xf32>
    %c0_20 = arith.constant 0 : index
    %c0_21 = arith.constant 0 : index
    %202 = vector.load %arg8[%c0_20, %c0_21] : memref<32x1xf32, #tpu.memory_space<vmem>>, vector<32x1xf32>
    %203 = vector.broadcast %202 : vector<32x1xf32> to vector<32x128xf32>
    %204 = arith.addf %201, %203 : vector<32x128xf32>
    %cst_22 = arith.constant 0.000000e+00 : f32
    %205 = vector.broadcast %cst_22 : f32 to vector<32x128xf32>
    %206 = arith.maximumf %204, %205 : vector<32x128xf32>
    %c0_23 = arith.constant 0 : index
    %c0_24 = arith.constant 0 : index
    %207 = vector.load %arg9[%c0_23, %c0_24] : memref<20x32xbf16, #tpu.memory_space<vmem>>, vector<20x32xbf16>
    %208 = arith.truncf %206 : vector<32x128xf32> to vector<32x128xbf16>
    %cst_25 = arith.constant dense<0.000000e+00> : vector<20x128xf32>
    %209 = tpu.matmul %207, %208, %cst_25 {dimension_numbers = #tpu.dot_dimension_numbers<[1], [0], [0], [1], [0, 0, 1, 1], [], []>} : vector<20x32xbf16>, vector<32x128xbf16>, vector<20x128xf32> -> vector<20x128xf32>
    %c0_26 = arith.constant 0 : index
    %c0_27 = arith.constant 0 : index
    %210 = vector.load %arg10[%c0_26, %c0_27] : memref<20x1xf32, #tpu.memory_space<vmem>>, vector<20x1xf32>
    %211 = vector.broadcast %210 : vector<20x1xf32> to vector<20x128xf32>
    %212 = arith.addf %209, %211 : vector<20x128xf32>
    %c0_28 = arith.constant 0 : index
    %c0_29 = arith.constant 0 : index
    %c0_30 = arith.constant 0 : index
    %213 = vector.load %arg11[%c0_28, %c0_29, %c0_30] : memref<1x20x128xf32, #tpu.memory_space<vmem>>, vector<1x20x128xf32>
    %214 = vector.shape_cast %213 : vector<1x20x128xf32> to vector<20x128xf32>
    %215 = vector.shape_cast %212 : vector<20x128xf32> to vector<1x20x128xf32>
    tpu.vector_store %arg11[%c0_28, %c0_29, %c0_30], %215 {strides = array<i32>} : memref<1x20x128xf32, #tpu.memory_space<vmem>>, vector<1x20x128xf32>,
    return
  }
  func.func @transform_0(%arg0: i32) -> (i32, i32, i32) {
    %c0_i32 = arith.constant 0 : i32
    %c0_i32_0 = arith.constant 0 : i32
    %c0_i32_1 = arith.constant 0 : i32
    return %arg0, %c0_i32, %c0_i32_0 : i32, i32, i32
  }
  func.func @transform_1(%arg0: i32) -> (i32, i32, i32) {
    %c0_i32 = arith.constant 0 : i32
    %c0_i32_0 = arith.constant 0 : i32
    %c0_i32_1 = arith.constant 0 : i32
    return %arg0, %c0_i32, %c0_i32_0 : i32, i32, i32
  }
  func.func @transform_2(%arg0: i32) -> (i32, i32) {
    %c0_i32 = arith.constant 0 : i32
    %c0_i32_0 = arith.constant 0 : i32
    %c0_i32_1 = arith.constant 0 : i32
    return %c0_i32, %c0_i32_0 : i32, i32
  }
  func.func @transform_3(%arg0: i32) -> (i32, i32) {
    %c0_i32 = arith.constant 0 : i32
    %c0_i32_0 = arith.constant 0 : i32
    %c0_i32_1 = arith.constant 0 : i32
    return %c0_i32, %c0_i32_0 : i32, i32
  }
  func.func @transform_4(%arg0: i32) -> (i32, i32) {
    %c0_i32 = arith.constant 0 : i32
    %c0_i32_0 = arith.constant 0 : i32
    %c0_i32_1 = arith.constant 0 : i32
    return %c0_i32, %c0_i32_0 : i32, i32
  }
  func.func @transform_5(%arg0: i32) -> (i32, i32) {
    %c0_i32 = arith.constant 0 : i32
    %c0_i32_0 = arith.constant 0 : i32
    %c0_i32_1 = arith.constant 0 : i32
    return %c0_i32, %c0_i32_0 : i32, i32
  }
  func.func @transform_6(%arg0: i32) -> (i32, i32) {
    %c0_i32 = arith.constant 0 : i32
    %c0_i32_0 = arith.constant 0 : i32
    %c0_i32_1 = arith.constant 0 : i32
    return %c0_i32, %c0_i32_0 : i32, i32
  }
  func.func @transform_7(%arg0: i32) -> (i32, i32) {
    %c0_i32 = arith.constant 0 : i32
    %c0_i32_0 = arith.constant 0 : i32
    %c0_i32_1 = arith.constant 0 : i32
    return %c0_i32, %c0_i32_0 : i32, i32
  }
  func.func @transform_8(%arg0: i32) -> (i32, i32) {
    %c0_i32 = arith.constant 0 : i32
    %c0_i32_0 = arith.constant 0 : i32
    %c0_i32_1 = arith.constant 0 : i32
    return %c0_i32, %c0_i32_0 : i32, i32
  }
  func.func @transform_9(%arg0: i32) -> (i32, i32) {
    %c0_i32 = arith.constant 0 : i32
    %c0_i32_0 = arith.constant 0 : i32
    %c0_i32_1 = arith.constant 0 : i32
    return %c0_i32, %c0_i32_0 : i32, i32
  }
  func.func @transform_10(%arg0: i32) -> (i32, i32, i32) {
    %c0_i32 = arith.constant 0 : i32
    %c0_i32_0 = arith.constant 0 : i32
    %c0_i32_1 = arith.constant 0 : i32
    return %arg0, %c0_i32, %c0_i32_0 : i32, i32, i32
  }
}

</mosaic_0001>

<bundles_post_ra>
// kernel: _lambda_.1
= control target key start
LH: loop header
LB: loop body
LE: loop exit
PB: predicated region body
PF: predicated region fallthrough
CT: control target
= control target key end

     0   :  { %s3706_s13 = smov 0   ;;  %s5458_s0 = inlined_call_operand.vmem [shape: bf16[2,144,36], index: 0, kind: input, shape index: {}]   ;;  %s5459_s1 = inlined_call_operand.vmem [shape: bf16[2,144,256], index: 1, kind: input, shape index: {}]   ;;  %s5460_s2 = inlined_call_operand.vmem [shape: bf16[32,144], index: 2, kind: input, shape index: {}]   ;;  %s5461_s3 = inlined_call_operand.vmem [shape: f32[32,1], index: 3, kind: input, shape index: {}]   ;;  %s5462_s4 = inlined_call_operand.vmem [shape: bf16[32,144], index: 4, kind: input, shape index: {}]   ;;  %s5463_s5 = inlined_call_operand.vmem [shape: f32[32,1], index: 5, kind: input, shape index: {}]   ;;  %s5464_s6 = inlined_call_operand.vmem [shape: bf16[32,32], index: 6, kind: input, shape index: {}]   ;;  %s5465_s7 = inlined_call_operand.vmem [shape: f32[32,1], index: 7, kind: input, shape index: {}]   ;;  %s5466_s8 = inlined_call_operand.vmem [shape: bf16[20,32], index: 8, kind: input, shape index: {}]   ;;  %s5467_s9 = inlined_call_operand.vmem [shape: f32[20,1], index: 9, kind: input, shape index: {}]   ;;  %s5468_s10 = inlined_call_operand.vmem [shape: f32[2,20,128], index: 10, kind: output, shape index: {}]  }
   0x1 LB: > { %s3150_s14 = sadd.s32 4294967295, %s3578_s13   ;;  %p3154_p0 = scmp.ge.s32.totalorder %s3578_s13, 1  ;;  %s3578_s13 = sphi %s3706_s13, %s20_s13  }
   0x2   : > { %p322_p1 = scmp.lt.s32.totalorder %s3578_s13, 3 }
   0x4   : > { %p323_p2 = pnand %p3154_p0, %p322_p1 }
   0x6   : > { %326 = sbr.rel (%p323_p2) target bundleno = 3710 (0xe7e), region = 60 }
   0xb   : > { %p365_p3 = scmp.lt.s32.totalorder %s3150_s14, 1  ;;  %v403_v0 = vld [vmem:[%s5461_s3] sm:$0xff]  ;;  %v5469_v1 = vmov 0   ;;  %v3162_v3 = vld [vmem:[%s5460_s2 + $0x8] sm:$0xf0]  ;;  %vm499_vm0 = vcmask 130048  }
   0xc   : > { %3446 = vset.pattern.permute.xlu0 %v5469_v1  ;;  %3447 = vset.pattern.permute.xlu1 %v5469_v1  ;;  %v3322_v2 = vld [vmem:[%s5460_s2 + $0x4] sm:$0xf]  ;;  %v3216_v5 = vld [vmem:[%s5462_s4 + $0x8] sm:$0xf0]  ;;  %v3324_v43 = vld [vmem:[%s5460_s2 + $0x14] sm:$0xf] }
   0xd   : > { %s5795_s14 = smov (!%p365_p3, %s3150_s14), 1  ;;  %409 = vperm.xlu0 %3446, %v403_v0   ;;  %3448 = vset.pattern.permute.xlu2 %v5469_v1  ;;  %v3335_v4 = vld [vmem:[%s5462_s4 + $0x4] sm:$0xf]  ;;  %v3165_v12 = vor.u32 %v3322_v2, %v3162_v3  ;;  %v3170_v44 = vld [vmem:[%s5460_s2 + $0x18] sm:$0xf0]  ;;  %v404_v51 = vld [vmem:[%s5461_s3 + $0x8] sm:$0xff] }
   0xe   : > { %s3364_s17 = smul.u32 72, %s5795_s14  ;;  %v3757_v20 = vor.u32 %v3335_v4, %v3216_v5  ;;  %v3337_v49 = vld [vmem:[%s5462_s4 + $0x14] sm:$0xf]  ;;  %v3173_v52 = vor.u32 %v3324_v43, %v3170_v44  ;;  %v3224_v53 = vld [vmem:[%s5462_s4 + $0x18] sm:$0xf0]  ;;  %v3585_v43 = vmov 3  }
   0xf   : > { %s3365_s18 = smul.u32 144, %s5795_s14  ;;  %v3227_v61 = vor.u32 %v3337_v49, %v3224_v53  ;;  %v572_v4 = vld [vmem:[%s5463_s5 + $0x10] sm:$0xff]  ;;  %v3588_v49 = vmov 6   ;;  %v3589_v53 = vmov 9   ;;  %s3590_s19 = smov 127   ;;  %vm868_vm1 = vcmask 1039360  }
  0x10   : > { %s3733_s25 = scalar_lea.vmem %s5458_s0, %s3364_s17  ;;  %s3591_s20 = smov 124   ;;  %vm929_vm2 = vcmask 1031168   ;;  %vm990_vm3 = vcmask 1022976   ;;  %vm1051_vm4 = vcmask 1014784   ;;  %vm1112_vm5 = vcmask 1006592  }
  0x11   : > { %s3744_s12 = scalar_lea.vmem %s5459_s1, %s3365_s18  ;;  %v3333_v6 = vld [vmem:[%s3733_s25 + $0x38] sm:$0xff]  ;;  %v3334_v7 = vld [vmem:[%s3733_s25 + $0x40] sm:$0xff]  ;;  %v3332_v8 = vld [vmem:[%s3733_s25 + $0x30] sm:$0xff]  ;;  %s3593_s21 = smov 126   ;;  %vm5484_vm6 = vcmask 932864   ;;  %vm1234_vm7 = vcmask 924672  }
  0x12   : > { %v3286_v9 = vld [vmem:[%s3744_s12 + $0x70] sm:$0xf]  ;;  %v3354_v10 = vld [vmem:[%s3744_s12 + $0x74] sm:$0xf0]  ;;  %v3294_v11 = vld [vmem:[%s3744_s12 + $0x80] sm:$0xf]  ;;  %506 = vmatpush.bf16.msra.mxu0 %v3333_v6  ;;  %532 = vmatpush.bf16.msra.mxu1 %v3334_v7 }
  0x13   : > { %v3287_v13 = vor.u32 %v3354_v10, %v3286_v9  ;;  %v3356_v14 = vld [vmem:[%s3744_s12 + $0x84] sm:$0xf0]  ;;  %v3278_v15 = vld [vmem:[%s3744_s12 + $0x60] sm:$0xf]  ;;  %v3353_v18 = vld [vmem:[%s3744_s12 + $0x74] sm:$0xf] }
  0x14   : > { %v3352_v16 = vld [vmem:[%s3744_s12 + $0x64] sm:$0xf0]  ;;  %v3295_v17 = vor.u32 %v3356_v14, %v3294_v11  ;;  %v3288_v19 = vld [vmem:[%s3744_s12 + $0x78] sm:$0xf0]  ;;  %v3351_v23 = vld [vmem:[%s3744_s12 + $0x64] sm:$0xf] }
  0x15   : > { %708 = vmatpush.bf16.msra.mxu2 %v3287_v13  ;;  %v3279_v21 = vor.u32 %v3352_v16, %v3278_v15  ;;  %v3291_v22 = vor.u32 %v3353_v18, %v3288_v19  ;;  %3210 = vmatmul.msk.bf16.vlgmr.msra.gmra.mxu1 %vm499_vm0, %v3165_v12  ;;  %v3270_v24 = vld [vmem:[%s3744_s12 + $0x50] sm:$0xf]  ;;  %v3350_v25 = vld [vmem:[%s3744_s12 + $0x54] sm:$0xf0]  ;;  %v3280_v26 = vld [vmem:[%s3744_s12 + $0x68] sm:$0xf0] }
  0x16   : > { %734 = vmatpush.bf16.msra.mxu3 %v3295_v17  ;;  %507 = vmatpush.bf16.msra.mxu0 %v3332_v8  ;;  %v3331_v27 = vld [vmem:[%s3733_s25 + $0x28] sm:$0xff]  ;;  %v3283_v28 = vor.u32 %v3351_v23, %v3280_v26  ;;  %v3349_v29 = vld [vmem:[%s3744_s12 + $0x54] sm:$0xf]  ;;  %v3272_v30 = vld [vmem:[%s3744_s12 + $0x58] sm:$0xf0]  ;;  %v3271_v31 = vor.u32 %v3350_v25, %v3270_v24  ;;  %s3595_s22 = smov 123  }
  0x17   : > { %746 = vmatpush.bf16.msrb.mxu1 %v3291_v22  ;;  %v3262_v32 = vld [vmem:[%s3744_s12 + $0x40] sm:$0xf]  ;;  %v3348_v33 = vld [vmem:[%s3744_s12 + $0x44] sm:$0xf0]  ;;  %v3275_v35 = vor.u32 %v3349_v29, %v3272_v30  ;;  %v3347_v36 = vld [vmem:[%s3744_s12 + $0x44] sm:$0xf]  ;;  %414 = vperm.xlu0 %3446, %v404_v51  }
  0x18   : > { %v3330_v34 = vld [vmem:[%s3733_s25 + $0x20] sm:$0xff]  ;;  %v3264_v37 = vld [vmem:[%s3744_s12 + $0x48] sm:$0xf0]  ;;  %v3263_v38 = vor.u32 %v3348_v33, %v3262_v32  ;;  %v3254_v39 = vld [vmem:[%s3744_s12 + $0x30] sm:$0xf]  ;;  %v3581_v33 = vmov 2  }
  0x19   : > { %3300 = vmatmul.msk.bf16.vlgmr.msra.gmra.mxu3 %vm499_vm0, %v3757_v20  ;;  %709 = vmatpush.bf16.msra.mxu2 %v3279_v21  ;;  %v3346_v40 = vld [vmem:[%s3744_s12 + $0x34] sm:$0xf0]  ;;  %v3267_v42 = vor.u32 %v3347_v36, %v3264_v37  ;;  %v3345_v45 = vld [vmem:[%s3744_s12 + $0x34] sm:$0xf]  ;;  %v3256_v46 = vld [vmem:[%s3744_s12 + $0x38] sm:$0xf0] }
  0x1a   : > { %508 = vmatpush.bf16.msra.mxu0 %v3331_v27  ;;  %v3329_v41 = vld [vmem:[%s3733_s25 + $0x18] sm:$0xff]  ;;  %v3355_v47 = vld [vmem:[%s3744_s12 + $0x84] sm:$0xf]  ;;  %v3255_v48 = vor.u32 %v3346_v40, %v3254_v39  ;;  %v3296_v50 = vld [vmem:[%s3744_s12 + $0x88] sm:$0xf0]  ;;  %v3259_v58 = vor.u32 %v3345_v45, %v3256_v46  ;;  %v3586_v46 = vmov 8  }
  0x1b   : > { %747 = vmatpush.bf16.msrb.mxu1 %v3283_v28  ;;  %v3246_v54 = vld [vmem:[%s3744_s12 + $0x20] sm:$0xf]  ;;  %v3344_v55 = vld [vmem:[%s3744_s12 + $0x24] sm:$0xf0]  ;;  %v3299_v56 = vor.u32 %v3355_v47, %v3296_v50  ;;  %v3328_v57 = vld [vmem:[%s3733_s25 + $0x10] sm:$0xff]  ;;  %s3596_s23 = smov 114  }
  0x1c   : > { %v3343_v59 = vld [vmem:[%s3744_s12 + $0x24] sm:$0xf]  ;;  %v3248_v60 = vld [vmem:[%s3744_s12 + $0x28] sm:$0xf0]  ;;  %v3247_v62 = vor.u32 %v3344_v55, %v3246_v54  ;;  %v3238_v63 = vld [vmem:[%s3744_s12 + $0x10] sm:$0xf] }
  0x1d   : > { %710 = vmatpush.bf16.msra.mxu2 %v3271_v31  ;;  %772 = vmatpush.bf16.msrb.mxu3 %v3299_v56  ;;  %v3342_v0 = vld [vmem:[%s3744_s12 + $0x14] sm:$0xf0]  ;;  %v3327_v2 = vld [vmem:[%s3733_s25 + $0x8] sm:$0xff]  ;;  %v3251_v3 = vor.u32 %v3343_v59, %v3248_v60  ;;  %v3341_v5 = vld [vmem:[%s3744_s12 + $0x14] sm:$0xf]  ;;  %s3597_s24 = smov 112  }
  0x1e   : > { %509 = vmatpush.bf16.msra.mxu0 %v3330_v34  ;;  %v3240_v6 = vld [vmem:[%s3744_s12 + $0x18] sm:$0xf0]  ;;  %v3239_v7 = vor.u32 %v3342_v0, %v3238_v63  ;;  %v405_v8 = vld [vmem:[%s5461_s3 + $0x10] sm:$0xff]  ;;  %v3230_v9 = vld [vmem:[%s3744_s12] sm:$0xf]  ;;  %v3582_v34 = vmov 1  }
  0x1f   : > { %748 = vmatpush.bf16.msrb.mxu1 %v3275_v35  ;;  %v3340_v10 = vld [vmem:[%s3744_s12 + $0x4] sm:$0xf0]  ;;  %586 = vperm.xlu0 %3446, %v572_v4   ;;  %v3326_v11 = vld [vmem:[%s3733_s25] sm:$0xff]  ;;  %v3243_v12 = vor.u32 %v3341_v5, %v3240_v6  ;;  %v3232_v16 = vld [vmem:[%s3744_s12 + $0x8] sm:$0xf0]  ;;  %s3592_s25 = smov 113  }
  0x20   : > { %419 = vperm.xlu1 %3447, %v405_v8   ;;  %v3160_v13 = vld [vmem:[%s5460_s2] sm:$0xf]  ;;  %v3323_v14 = vld [vmem:[%s5460_s2 + $0x4] sm:$0xf0]  ;;  %v3339_v15 = vld [vmem:[%s3744_s12 + $0x4] sm:$0xf]  ;;  %v3231_v17 = vor.u32 %v3340_v10, %v3230_v9 }
  0x21   : > { %711 = vmatpush.bf16.msra.mxu2 %v3263_v38  ;;  %v3214_v18 = vld [vmem:[%s5462_s4] sm:$0xf]  ;;  %v3336_v19 = vld [vmem:[%s5462_s4 + $0x4] sm:$0xf0]  ;;  %v3161_v21 = vor.u32 %v3323_v14, %v3160_v13  ;;  %v3235_v22 = vor.u32 %v3339_v15, %v3232_v16  ;;  %v406_v23 = vld [vmem:[%s5461_s3 + $0x18] sm:$0xff]  ;;  %s3594_s12 = smov 125  }
  0x22   : > { %510 = vmatpush.bf16.msra.mxu0 %v3329_v41  ;;  %v3215_v24 = vor.u32 %v3336_v19, %v3214_v18  ;;  %v573_v25 = vld [vmem:[%s5463_s5 + $0x18] sm:$0xff]  ;;  %v3168_v26 = vld [vmem:[%s5460_s2 + $0x10] sm:$0xf]  ;;  %v571_v32 = vld [vmem:[%s5463_s5 + $0x8] sm:$0xff]  ;;  %v3583_v41 = vmov 5   ;;  %s3599_s26 = smov 111  }
  0x23   : > { %749 = vmatpush.bf16.msrb.mxu1 %v3267_v42  ;;  %v3325_v27 = vld [vmem:[%s5460_s2 + $0x14] sm:$0xf0]  ;;  %v3222_v28 = vld [vmem:[%s5462_s4 + $0x10] sm:$0xf]  ;;  %v3584_v42 = vmov 4   ;;  %s3600_s27 = smov 110  }
  0x24   : > { %v3338_v29 = vld [vmem:[%s5462_s4 + $0x14] sm:$0xf0]  ;;  %v3169_v30 = vor.u32 %v3325_v27, %v3168_v26  ;;  %s3602_s28 = smov 109   ;;  %s3605_s29 = smov 100   ;;  %vm5480_vm8 = vcmask 916480   ;;  %vm5481_vm9 = vcmask 908288  }
  0x25   : > { %712 = vmatpush.bf16.msra.mxu2 %v3255_v48  ;;  %3211 = vmatmul.msk.bf16.gmra.mxu1 %vm499_vm0, %v3173_v52  ;;  %v3223_v31 = vor.u32 %v3338_v29, %v3222_v28  ;;  %v3587_v48 = vmov 7   ;;  %s3607_s30 = smov 99   ;;  %s3609_s11 = smov 98   ;;  %vm5482_vm10 = vcmask 900096   ;;  %vm5483_vm11 = vcmask 891904  }
  0x26   : > { %511 = vmatpush.bf16.msra.mxu0 %v3328_v57  ;;  %s3611_s15 = smov 97   ;;  %s3613_s16 = smov 96   ;;  %vm5485_vm12 = vcmask 818176   ;;  %vm5476_vm13 = vcmask 809984   ;;  %vm5473_vm14 = vcmask 801792   ;;  %vm5474_vm15 = vcmask 793600  }
  0x27   : > { %750 = vmatpush.bf16.msrb.mxu1 %v3259_v58  ;;  %3449 = vset.pattern.permute.xlu0 %v3582_v34  ;;  %s3615_s17 = smov 95   ;;  %s3617_s18 = smov 86  }
  0x28   : > { %424 = vperm.xlu1 %3447, %v406_v23  }
  0x29   : > { %3301 = vmatmul.msk.bf16.gmra.mxu3 %vm499_vm0, %v3227_v61  ;;  %713 = vmatpush.bf16.msra.mxu2 %v3247_v62 }
  0x2a   : > { %512 = vmatpush.bf16.msra.mxu0 %v3327_v2 }
  0x2b   : > { %751 = vmatpush.bf16.msrb.mxu1 %v3251_v3 }
  0x2d   : > { %714 = vmatpush.bf16.msra.mxu2 %v3239_v7 }
  0x2e   : > { %513 = vmatpush.bf16.msra.mxu0 %v3326_v11 }
  0x2f   : > { %752 = vmatpush.bf16.msrb.mxu1 %v3243_v12 }
  0x30   : > { %591 = vperm.xlu1 %3447, %v573_v25  }
  0x31   : > { %715 = vmatpush.bf16.msra.mxu2 %v3231_v17  ;;  %514 = vmatmul.bf16.vlgmr.msra.gmra.mxu0 %v3161_v21 }
  0x33   : > { %753 = vmatpush.bf16.msrb.mxu1 %v3235_v22 }
  0x34   : > { %716 = vmatmul.bf16.vlgmr.msra.gmra.mxu2 %v3215_v24 }
  0x36   : > { %754 = vmatmul.bf16.vlgmr.msrb.gmra.mxu1 %v3215_v24 }
  0x38   : > { %3450 = vset.pattern.permute.xlu1 %v3581_v33 }
  0x39   : > { %3302 = vmatmul.msk.bf16.vlgmr.msrb.gmra.mxu3 %vm499_vm0, %v3757_v20  ;;  %v570_v20 = vld [vmem:[%s5463_s5] sm:$0xff] }
  0x3a   : > { %576 = vperm.xlu2 %3448, %v570_v20  }
  0x41   : > { %519 = vmatmul.bf16.gmra.mxu0 %v3169_v30 }
  0x42   : > { %581 = vperm.xlu2 %3448, %v571_v32  }
  0x44   : > { %721 = vmatmul.bf16.gmra.mxu2 %v3223_v31 }
  0x46   : > { %759 = vmatmul.bf16.gmra.mxu1 %v3223_v31 }
  0x49   : > { %3303 = vmatmul.msk.bf16.gmra.mxu3 %vm499_vm0, %v3227_v61  ;;  %vm5475_vm0 = vcmask 785408  }
  0x7f   : > { %v410_v35 = vpop.permute.xlu0 %409 }
  0x89   : > { %v415_v45 = vpop.permute.xlu0 %414 }
  0x91   : > { %v3943_v13 = vpop.permute.xlu0 %586 }
  0x92   : > { %v534_v38 = vpop.f32.mrf.mxu1  ;;  %v420_v54 = vpop.permute.xlu1 %419 }
  0x94   : > { %v577_v61 = vpop.permute.xlu2 %576 }
  0x9a   : > { %v536_v50 = vpop.f32.mrf.mxu1  ;;  %v425_v2 = vpop.permute.xlu1 %424 }
  0x9c   : > { %v736_v60 = vpop.f32.mrf.mxu3  ;;  %v3919_v0 = vpop.permute.xlu2 %581 }
  0xa2   : > { %v539_v57 = vpop.f32.mrf.mxu1  ;;  %v3945_v14 = vpop.permute.xlu1 %591 }
  0xa4   : > { %v3917_v62 = vpop.f32.mrf.mxu3 }
  0xaa   : > { %v541_v4 = vpop.f32.mrf.mxu1 }
  0xac   : > { %v3925_v5 = vpop.f32.mrf.mxu3 }
  0xae   : > { %v515_v36 = vpop.f32.mrf.mxu0 }
  0xaf   : > { %v516_v37 = vadd.f32 %v515_v36, %v410_v35 }
  0xb1   : > { %v535_v39 = vadd.f32 %v534_v38, %v516_v37 }
  0xb3   : > { %v3860_v40 = vmax.f32 %v535_v39, 0.0  ;;  %v755_v11 = vpop.f32.mrf.mxu1 }
  0xb4   : > { %v3935_v9 = vpop.f32.mrf.mxu3  ;;  %v756_v12 = vadd.f32 %v755_v11, %v577_v61 }
  0xb5   : > { %882 = vperm.xlu1 %3450, %v3860_v40   ;;  %821 = vperm.xlu0 %3449, %v3860_v40  }
  0xb6   : > { %794 = vperm.xlu2 %3448, %v3860_v40   ;;  %v517_v44 = vpop.f32.mrf.mxu0 }
  0xb7   : > { %v518_v47 = vadd.f32 %v517_v44, %v415_v45  ;;  %v717_v23 = vpop.f32.mrf.mxu2 }
  0xb8   : > { %v718_v24 = vadd.f32 %v717_v23, %v577_v61 }
  0xb9   : > { %v537_v51 = vadd.f32 %v536_v50, %v518_v47 }
  0xba   : > { %v737_v26 = vadd.f32 %v736_v60, %v718_v24 }
  0xbb   : > { %v3877_v52 = vmax.f32 %v537_v51, 0.0  ;;  %v757_v32 = vpop.f32.mrf.mxu1 }
  0xbc   : > { %v774_v15 = vpop.f32.mrf.mxu3  ;;  %v3964_v30 = vmax.f32 %v737_v26, 0.0 }
  0xbd   : > { %3453 = vset.pattern.permute.xlu1 %v3583_v41  ;;  %3452 = vset.pattern.permute.xlu0 %v3584_v42  ;;  %v775_v16 = vadd.f32 %v774_v15, %v756_v12 }
  0xbe   : > { %3451 = vset.pattern.permute.xlu2 %v3585_v43  ;;  %1065 = vperm.xlu1 %3453, %v3860_v40   ;;  %v520_v55 = vpop.f32.mrf.mxu0 }
  0xbf   : > { %1004 = vperm.xlu0 %3452, %v3860_v40   ;;  %943 = vperm.xlu2 %3451, %v3860_v40   ;;  %v521_v56 = vadd.f32 %v520_v55, %v420_v54  ;;  %v3952_v18 = vmax.f32 %v775_v16, 0.0 }
  0xc1   : > { %v540_v58 = vadd.f32 %v539_v57, %v521_v56 }
  0xc3   : > { %v3897_v59 = vmax.f32 %v540_v58, 0.0 }
  0xc4   : > { %v776_v37 = vpop.f32.mrf.mxu3 }
  0xc6   : > { %3456 = vset.pattern.permute.xlu1 %v3586_v46  ;;  %v522_v63 = vpop.f32.mrf.mxu0 }
  0xc7   : > { %3455 = vset.pattern.permute.xlu0 %v3587_v48  ;;  %3454 = vset.pattern.permute.xlu2 %v3588_v49  ;;  %v523_v3 = vadd.f32 %v522_v63, %v425_v2 }
  0xc8   : > { %1248 = vperm.xlu1 %3456, %v3860_v40   ;;  %1187 = vperm.xlu0 %3455, %v3860_v40  }
  0xc9   : > { %1126 = vperm.xlu2 %3454, %v3860_v40   ;;  %v542_v6 = vadd.f32 %v541_v4, %v523_v3 }
  0xcb   : > { %v3929_v8 = vmax.f32 %v542_v6, 0.0 }
  0xd0   : > { %3458 = vset.pattern.permute.xlu1 %v3582_v34  ;;  %3460 = vset.pattern.permute.xlu0 %v3585_v43 }
  0xd1   : > { %3457 = vset.pattern.permute.xlu2 %v3589_v53  ;;  %825 = vperm.xlu1 %3458, %v3877_v52  }
  0xd2   : > { %947 = vperm.xlu0 %3460, %v3877_v52   ;;  %1309 = vperm.xlu2 %3457, %v3860_v40  }
  0xd9   : > { %3461 = vset.pattern.permute.xlu1 %v3584_v42 }
  0xda   : > { %3463 = vset.pattern.permute.xlu0 %v3588_v49  ;;  %3459 = vset.pattern.permute.xlu2 %v3581_v33 }
  0xdb   : > { %1008 = vperm.xlu1 %3461, %v3877_v52   ;;  %1130 = vperm.xlu0 %3463, %v3877_v52  }
  0xdc   : > { %886 = vperm.xlu2 %3459, %v3877_v52  }
  0xe3   : > { %3464 = vset.pattern.permute.xlu1 %v3587_v48  ;;  %3466 = vset.pattern.permute.xlu0 %v3589_v53 }
  0xe4   : > { %3462 = vset.pattern.permute.xlu2 %v3583_v41  ;;  %1191 = vperm.xlu1 %3464, %v3877_v52  }
  0xe5   : > { %1313 = vperm.xlu0 %3466, %v3877_v52   ;;  %1069 = vperm.xlu2 %3462, %v3877_v52  }
  0xec   : > { %3467 = vset.pattern.permute.xlu1 %v5469_v1 }
  0xed   : > { %3469 = vset.pattern.permute.xlu0 %v3581_v33  ;;  %3465 = vset.pattern.permute.xlu2 %v3586_v46 }
  0xee   : > { %804 = vperm.xlu1 %3467, %v3897_v59   ;;  %890 = vperm.xlu0 %3469, %v3897_v59  }
  0xef   : > { %1252 = vperm.xlu2 %3465, %v3877_v52  }
  0xf6   : > { %3470 = vset.pattern.permute.xlu1 %v3585_v43  ;;  %3472 = vset.pattern.permute.xlu0 %v3583_v41 }
  0xf7   : > { %3468 = vset.pattern.permute.xlu2 %v3582_v34  ;;  %951 = vperm.xlu1 %3470, %v3897_v59  }
  0xf8   : > { %1073 = vperm.xlu0 %3472, %v3897_v59   ;;  %829 = vperm.xlu2 %3468, %v3897_v59  }
  0xff   : > { %3473 = vset.pattern.permute.xlu1 %v3588_v49 }
 0x100   : > { %3475 = vset.pattern.permute.xlu0 %v3586_v46  ;;  %3471 = vset.pattern.permute.xlu2 %v3584_v42 }
 0x101   : > { %1134 = vperm.xlu1 %3473, %v3897_v59   ;;  %1256 = vperm.xlu0 %3475, %v3897_v59  }
 0x102   : > { %1012 = vperm.xlu2 %3471, %v3897_v59  }
 0x109   : > { %3476 = vset.pattern.permute.xlu1 %v3589_v53 }
 0x10a   : > { %3474 = vset.pattern.permute.xlu2 %v3587_v48  ;;  %1317 = vperm.xlu1 %3476, %v3897_v59  }
 0x10b   : > { %1195 = vperm.xlu2 %3474, %v3897_v59  }
 0x110   : > { %v3927_v7 = vpop.permute.xlu2 %794 }
 0x111   : > { %5486 = vst [vmem:[#allocation2_spill] sm:$0xff] %v3927_v7 }
 0x112   : > { %3478 = vset.pattern.permute.xlu1 %v3582_v34 }
 0x113   : > { %3477 = vset.pattern.permute.xlu2 %v5469_v1  ;;  %833 = vperm.xlu1 %3478, %v3929_v8  }
 0x114   : > { %809 = vperm.xlu2 %3477, %v3929_v8  }
 0x119   : > { %v3937_v10 = vpop.permute.xlu2 %943 }
 0x11a   : > { %v958_v57 = vmul.f32 %v3937_v10, %v3964_v30 }
 0x11b   : > { %3479 = vset.pattern.permute.xlu1 %v3581_v33  ;;  %v758_v33 = vadd.f32 %v757_v32, %v3919_v0 }
 0x11c   : > { %3480 = vset.pattern.permute.xlu2 %v3585_v43  ;;  %894 = vperm.xlu1 %3479, %v3929_v8  }
 0x11d   : > { %955 = vperm.xlu2 %3480, %v3929_v8   ;;  %v777_v38 = vadd.f32 %v776_v37, %v758_v33 }
 0x11f   : > { %v3985_v44 = vmax.f32 %v777_v38, 0.0 }
 0x121   : > { %5487 = vst [vmem:[#allocation3_spill] sm:$0xff] %v3985_v44 }
 0x123   : > { %v3947_v17 = vpop.permute.xlu2 %1126 }
 0x124   : > { %3481 = vset.pattern.permute.xlu1 %v3584_v42  ;;  %v719_v42 = vpop.f32.mrf.mxu2  ;;  %v1142_v4 = vmul.f32 %v3947_v17, %v3952_v18 }
 0x125   : > { %3483 = vset.pattern.permute.xlu2 %v3588_v49  ;;  %1016 = vperm.xlu1 %3481, %v3929_v8   ;;  %v720_v43 = vadd.f32 %v719_v42, %v3919_v0  ;;  %v959_v49 = vmul.f32 %v3937_v10, %v3952_v18  ;;  %v1141_v10 = vmul.f32 %v3947_v17, %v3964_v30 }
 0x126   : > { %1138 = vperm.xlu2 %3483, %v3929_v8  }
 0x127   : > { %v883_v19 = vpop.permute.xlu1 %882  ;;  %v822_v21 = vpop.permute.xlu0 %821 }
 0x128   : > { %v837_v22 = vmul.f32 %v822_v21, %v3952_v18  ;;  %v836_v31 = vmul.f32 %v822_v21, %v3964_v30  ;;  %v897_v39 = vmul.f32 %v883_v19, %v3964_v30 }
 0x12a   : > { %854 = vrot.lane.b32.xlu0 %v837_v22, %s3590_s19  ;;  %v760_v22 = vpop.f32.mrf.mxu1 }
 0x12b   : > { %v761_v26 = vadd.f32 %v760_v22, %v3943_v13 }
 0x12c   : > { %v3957_v25 = vpop.permute.xlu2 %1309  ;;  %v722_v6 = vpop.f32.mrf.mxu2 }
 0x12d   : > { %3482 = vset.pattern.permute.xlu1 %v3583_v41  ;;  %v723_v12 = vadd.f32 %v722_v6, %v3943_v13 }
 0x12e   : > { %3486 = vset.pattern.permute.xlu2 %v3589_v53  ;;  %1077 = vperm.xlu1 %3482, %v3929_v8  }
 0x12f   : > { %1321 = vperm.xlu2 %3486, %v3929_v8   ;;  %v742_v16 = vadd.f32 %v3925_v5, %v723_v12  ;;  %v779_v5 = vpop.f32.mrf.mxu3 }
 0x130   : > { %v1066_v27 = vpop.permute.xlu1 %1065 }
 0x131   : > { %v1005_v28 = vpop.permute.xlu0 %1004  ;;  %v1080_v61 = vmul.f32 %v1066_v27, %v3964_v30  ;;  %v4046_v23 = vmax.f32 %v742_v16, 0.0 }
 0x132   : > { %v1020_v29 = vmul.f32 %v1005_v28, %v3952_v18  ;;  %v1019_v55 = vmul.f32 %v1005_v28, %v3964_v30  ;;  %v780_v28 = vadd.f32 %v779_v5, %v761_v26 }
 0x134   : > { %1037 = vrot.lane.b32.xlu0 %v1020_v29, %s3591_s20  ;;  %v4062_v33 = vmax.f32 %v780_v28, 0.0 }
 0x136   : > { %3484 = vset.pattern.permute.xlu1 %v3587_v48  ;;  %v3969_v20 = vpop.permute.xlu2 %886  ;;  %v739_v48 = vadd.f32 %v3917_v62, %v720_v43  ;;  %v1081_v62 = vmul.f32 %v1066_v27, %v3952_v18 }
 0x137   : > { %852 = vrot.lane.b32.xlu2 %v836_v31, %s3590_s19  ;;  %1199 = vperm.xlu1 %3484, %v3929_v8   ;;  %v900_v45 = vmul.f32 %v3969_v20, %v3985_v44 }
 0x138   : > { %v3998_v51 = vmax.f32 %v739_v48, 0.0 }
 0x13a   : > { %v3974_v34 = vpop.permute.xlu1 %1248  ;;  %v1188_v35 = vpop.permute.xlu0 %1187  ;;  %v899_v43 = vmul.f32 %v3969_v20, %v3998_v51 }
 0x13b   : > { %v1203_v36 = vmul.f32 %v1188_v35, %v3952_v18  ;;  %v1264_v17 = vmul.f32 %v3974_v34, %v3952_v18  ;;  %v1263_v29 = vmul.f32 %v3974_v34, %v3964_v30  ;;  %v762_v20 = vpop.f32.mrf.mxu1 }
 0x13d   : > { %1220 = vrot.lane.b32.xlu0 %v1203_v36, %s3592_s25 }
 0x13f   : > { %913 = vrot.lane.b32.xlu2 %v897_v39, %s3593_s21  ;;  %3485 = vset.pattern.permute.xlu1 %v3586_v46  ;;  %v3981_v41 = vpop.permute.xlu2 %1069  ;;  %v898_v46 = vmul.f32 %v883_v19, %v3952_v18  ;;  %v1202_v19 = vmul.f32 %v1188_v35, %v3964_v30 }
 0x140   : > { %1260 = vperm.xlu1 %3485, %v3929_v8   ;;  %v1083_v60 = vmul.f32 %v3981_v41, %v3985_v44 }
 0x143   : > { %v3989_v47 = vpop.permute.xlu1 %825 }
 0x144   : > { %v948_v50 = vpop.permute.xlu0 %947  ;;  %v838_v31 = vmul.f32 %v3989_v47, %v3998_v51  ;;  %v839_v34 = vmul.f32 %v3989_v47, %v3985_v44 }
 0x145   : > { %919 = vrot.lane.b32.xlu0 %v900_v45, %s3593_s21  ;;  %v960_v54 = vmul.f32 %v948_v50, %v3998_v51  ;;  %v961_v36 = vmul.f32 %v948_v50, %v3985_v44 }
 0x147   : > { %976 = vrot.lane.b32.xlu2 %v959_v49, %s3594_s12 }
 0x148   : > { %915 = vrot.lane.b32.xlu1 %v898_v46, %s3593_s21 }
 0x149   : > { %v4000_v53 = vpop.permute.xlu2 %1252 }
 0x14a   : > { %v1266_v15 = vmul.f32 %v4000_v53, %v3985_v44 }
 0x14d   : > { %v4004_v56 = vpop.permute.xlu1 %1008  ;;  %978 = vrot.lane.b32.xlu0 %v960_v54, %s3594_s12  ;;  %v1131_v0 = vpop.permute.xlu0 %1130 }
 0x14e   : > { %v1143_v2 = vmul.f32 %v1131_v0, %v3998_v51  ;;  %v1021_v45 = vmul.f32 %v4004_v56, %v3998_v51  ;;  %v1022_v46 = vmul.f32 %v4004_v56, %v3985_v44  ;;  %v1144_v54 = vmul.f32 %v1131_v0, %v3985_v44  ;;  %v724_v0 = vpop.f32.mrf.mxu2 }
 0x14f   : > { %1035 = vrot.lane.b32.xlu2 %v1019_v55, %s3591_s20  ;;  %v763_v55 = vadd.f32 %v762_v20, %v3945_v14 }
 0x150   : > { %974 = vrot.lane.b32.xlu1 %v958_v57, %s3594_s12 }
 0x152   : > { %v4011_v58 = vpop.permute.xlu2 %829 }
 0x153   : > { %v840_v27 = vmul.f32 %v4011_v58, %v4046_v23  ;;  %v841_v22 = vmul.f32 %v4011_v58, %v4062_v33 }
 0x155   : > { %1102 = vrot.lane.b32.xlu0 %v1083_v60, %s3595_s22  ;;  %v781_v60 = vpop.f32.mrf.mxu3 }
 0x156   : > { %v4018_v63 = vpop.permute.xlu1 %1191 }
 0x157   : > { %1096 = vrot.lane.b32.xlu2 %v1080_v61, %s3595_s22  ;;  %v4072_v37 = vpop.permute.xlu0 %1313 }
 0x158   : > { %1098 = vrot.lane.b32.xlu1 %v1081_v62, %s3595_s22  ;;  %v782_v62 = vadd.f32 %v781_v60, %v763_v55  ;;  %v3598_v60 = vmov 10  }
 0x159   : > { %3487 = vset.pattern.permute.xlu0 %v3598_v60  ;;  %3488 = vset.pattern.permute.xlu1 %v3598_v60 }
 0x15a   : > { %v4116_v12 = vmax.f32 %v782_v62, 0.0  ;;  %3489 = vset.pattern.permute.xlu2 %v3598_v60 }
 0x15c   : > { %v4023_v3 = vpop.permute.xlu2 %1012 }
 0x15d   : > { %1161 = vrot.lane.b32.xlu0 %v1143_v2, %s3596_s23  ;;  %v1023_v39 = vmul.f32 %v4023_v3, %v4046_v23  ;;  %v1082_v2 = vmul.f32 %v3981_v41, %v3998_v51 }
 0x15f   : > { %1159 = vrot.lane.b32.xlu2 %v1142_v4, %s3596_s23  ;;  %v1204_v4 = vmul.f32 %v4018_v63, %v3998_v51 }
 0x160   : > { %1157 = vrot.lane.b32.xlu1 %v1141_v10, %s3596_s23  ;;  %v4032_v11 = vpop.permute.xlu1 %804  ;;  %v891_v47 = vpop.permute.xlu0 %890  ;;  %v725_v10 = vadd.f32 %v724_v0, %v3945_v14 }
 0x161   : > { %5488 = vst [vmem:[#allocation4_spill] sm:$0xff] %v4032_v11  ;;  %v901_v58 = vmul.f32 %v891_v47, %v4046_v23 }
 0x165   : > { %v4039_v21 = vpop.permute.xlu2 %1195  ;;  %1285 = vrot.lane.b32.xlu0 %v1266_v15, %s3597_s24 }
 0x166   : > { %v1206_v56 = vmul.f32 %v4039_v21, %v4046_v23 }
 0x167   : > { %1218 = vrot.lane.b32.xlu2 %v1202_v19, %s3592_s25  ;;  %v744_v19 = vadd.f32 %v3935_v9, %v725_v10 }
 0x168   : > { %1281 = vrot.lane.b32.xlu1 %v1264_v17, %s3597_s24  ;;  %v1205_v17 = vmul.f32 %v4018_v63, %v3985_v44  ;;  %v1265_v63 = vmul.f32 %v4000_v53, %v3998_v51  ;;  %v1024_v53 = vmul.f32 %v4023_v3, %v4062_v33 }
 0x169   : > { %v4048_v24 = vpop.permute.xlu1 %951  ;;  %v4132_v5 = vmax.f32 %v744_v19, 0.0 }
 0x16a   : > { %v963_v13 = vmul.f32 %v4048_v24, %v4062_v33  ;;  %v1074_v61 = vpop.permute.xlu0 %1073 }
 0x16b   : > { %v1084_v3 = vmul.f32 %v1074_v61, %v4046_v23 }
 0x16d   : > { %860 = vrot.lane.b32.xlu0 %v840_v27, %s3590_s19 }
 0x16e   : > { %v4058_v32 = vpop.permute.xlu2 %809 }
 0x16f   : > { %1279 = vrot.lane.b32.xlu2 %v1263_v29, %s3597_s24 }
 0x170   : > { %856 = vrot.lane.b32.xlu1 %v838_v31, %s3590_s19 }
 0x173   : > { %v4066_v35 = vpop.permute.xlu1 %1134  ;;  %v1257_v16 = vpop.permute.xlu0 %1256 }
 0x174   : > { %v1146_v49 = vmul.f32 %v4066_v35, %v4062_v33  ;;  %v1268_v19 = vmul.f32 %v1257_v16, %v4062_v33 }
 0x175   : > { %984 = vrot.lane.b32.xlu0 %v963_v13, %s3594_s12  ;;  %v902_v13 = vmul.f32 %v891_v47, %v4062_v33 }
 0x177   : > { %858 = vrot.lane.b32.xlu2 %v839_v34, %s3590_s19  ;;  %v4075_v38 = vpop.permute.xlu2 %955 }
 0x178   : > { %980 = vrot.lane.b32.xlu1 %v961_v36, %s3594_s12 }
 0x17c   : > { %v4080_v42 = vpop.permute.xlu1 %1317 }
 0x17d   : > { %1043 = vrot.lane.b32.xlu0 %v1023_v39, %s3591_s20 }
 0x17f   : > { %917 = vrot.lane.b32.xlu2 %v899_v43, %s3593_s21 }
 0x180   : > { %v4088_v48 = vpop.permute.xlu2 %1138  ;;  %1039 = vrot.lane.b32.xlu1 %v1021_v45, %s3591_s20  ;;  %v962_v45 = vmul.f32 %v4048_v24, %v4046_v23  ;;  %v1207_v24 = vmul.f32 %v4039_v21, %v4062_v33  ;;  %v1267_v21 = vmul.f32 %v1257_v16, %v4046_v23 }
 0x181   : > { %v1148_v60 = vmul.f32 %v4088_v48, %v4116_v12 }
 0x185   : > { %v4095_v50 = vpop.permute.xlu1 %833  ;;  %1167 = vrot.lane.b32.xlu0 %v1146_v49, %s3596_s23 }
 0x186   : > { %v843_v41 = vmul.f32 %v4095_v50, %v4116_v12  ;;  %v842_v16 = vmul.f32 %v4095_v50, %v4132_v5 }
 0x187   : > { %1041 = vrot.lane.b32.xlu2 %v1022_v46, %s3591_s20 }
 0x188   : > { %1163 = vrot.lane.b32.xlu1 %v1144_v54, %s3596_s23  ;;  %v1085_v54 = vmul.f32 %v1074_v61, %v4062_v33 }
 0x189   : > { %v4102_v57 = vpop.permute.xlu2 %1321 }
 0x18d   : > { %1226 = vrot.lane.b32.xlu0 %v1206_v56, %s3592_s25 }
 0x18e   : > { %v4111_v6 = vpop.permute.xlu1 %894 }
 0x18f   : > { %1100 = vrot.lane.b32.xlu2 %v1082_v2, %s3595_s22  ;;  %v903_v9 = vmul.f32 %v4111_v6, %v4132_v5  ;;  %v1145_v2 = vmul.f32 %v4066_v35, %v4046_v23  ;;  %v904_v35 = vmul.f32 %v4111_v6, %v4116_v12  ;;  %v964_v6 = vmul.f32 %v4075_v38, %v4132_v5 }
 0x190   : > { %1222 = vrot.lane.b32.xlu1 %v1204_v4, %s3592_s25 }
 0x191   : > { %v4118_v15 = vpop.permute.xlu2 %852 }
 0x192   : > { %5489 = vst [vmem:[#allocation5_spill] sm:$0xff] %v4118_v15 }
 0x195   : > { %866 = vrot.lane.b32.xlu0 %v843_v41, %s3590_s19  ;;  %v1326_v41 = vmul.f32 %v4072_v37, %v3998_v51 }
 0x197   : > { %1224 = vrot.lane.b32.xlu2 %v1205_v17, %s3592_s25  ;;  %v4129_v14 = vpop.permute.xlu1 %1016 }
 0x198   : > { %862 = vrot.lane.b32.xlu1 %v841_v22, %s3590_s19  ;;  %v1026_v31 = vmul.f32 %v4129_v14, %v4116_v12 }
 0x199   : > { %v4134_v26 = vpop.permute.xlu2 %913 }
 0x19a   : > { %5490 = vst [vmem:[#allocation6_spill] sm:$0xff] %v4134_v26 }
 0x19c   : > { %v4138_v27 = vpop.permute.xlu0 %854 }
 0x19d   : > { %5491 = vst [vmem:[#allocation7_spill] sm:$0xff] %v4138_v27  ;;  %925 = vrot.lane.b32.xlu0 %v903_v9, %s3593_s21 }
 0x19f   : > { %1283 = vrot.lane.b32.xlu2 %v1265_v63, %s3597_s24  ;;  %v1329_v63 = vmul.f32 %v4080_v42, %v4062_v33 }
 0x1a0   : > { %v4145_v28 = vpop.permute.xlu1 %1077  ;;  %921 = vrot.lane.b32.xlu1 %v901_v58, %s3593_s21 }
 0x1a1   : > { %v4148_v29 = vpop.permute.xlu2 %976  ;;  %v1086_v43 = vmul.f32 %v4145_v28, %v4132_v5  ;;  %v1087_v50 = vmul.f32 %v4145_v28, %v4116_v12 }
 0x1a2   : > { %5492 = vst [vmem:[#allocation8_spill] sm:$0xff] %v4148_v29 }
 0x1a5   : > { %1049 = vrot.lane.b32.xlu0 %v1026_v31, %s3591_s20 }
 0x1a6   : > { %v4156_v34 = vpop.permute.xlu0 %1037 }
 0x1a7   : > { %5493 = vst [vmem:[#allocation9_spill] sm:$0xff] %v4156_v34  ;;  %923 = vrot.lane.b32.xlu2 %v902_v13, %s3593_s21 }
 0x1a8   : > { %1045 = vrot.lane.b32.xlu1 %v1024_v53, %s3591_s20  ;;  %v965_v53 = vmul.f32 %v4075_v38, %v4116_v12  ;;  %v1147_v38 = vmul.f32 %v4088_v48, %v4132_v5 }
 0x1a9   : > { %v4160_v36 = vpop.permute.xlu2 %1035  ;;  %v4162_v39 = vpop.permute.xlu1 %1199 }
 0x1aa   : > { %5494 = vst [vmem:[#allocation10_spill] sm:$0xff] %v4160_v36  ;;  %v1209_v20 = vmul.f32 %v4162_v39, %v4116_v12 }
 0x1ad   : > { %1108 = vrot.lane.b32.xlu0 %v1086_v43, %s3595_s22 }
 0x1af   : > { %982 = vrot.lane.b32.xlu2 %v962_v45, %s3594_s12  ;;  %v4171_v47 = vpop.permute.xlu0 %1220 }
 0x1b0   : > { %5495 = vst [vmem:[#allocation11_spill] sm:$0xff] %v4171_v47  ;;  %1104 = vrot.lane.b32.xlu1 %v1084_v3, %s3595_s22 }
 0x1b1   : > { %v4174_v49 = vpop.permute.xlu2 %1096 }
 0x1b2   : > { %5496 = vst [vmem:[#allocation12_spill] sm:$0xff] %v4174_v49  ;;  %v1261_v46 = vpop.permute.xlu1 %1260 }
 0x1b3   : > { %v1269_v61 = vmul.f32 %v1261_v46, %v4132_v5 }
 0x1b5   : > { %1232 = vrot.lane.b32.xlu0 %v1209_v20, %s3592_s25  ;;  %v1025_v20 = vmul.f32 %v4129_v14, %v4132_v5 }
 0x1b7   : > { %1106 = vrot.lane.b32.xlu2 %v1085_v54, %s3595_s22  ;;  %v4183_v55 = vpop.permute.xlu0 %919 }
 0x1b8   : > { %5497 = vst [vmem:[#allocation13_spill] sm:$0xff] %v4183_v55  ;;  %1228 = vrot.lane.b32.xlu1 %v1207_v24, %s3592_s25 }
 0x1b9   : > { %v4186_v56 = vpop.permute.xlu2 %1159 }
 0x1ba   : > { %5498 = vst [vmem:[#allocation14_spill] sm:$0xff] %v4186_v56  ;;  %v4188_v62 = vpop.permute.xlu1 %915 }
 0x1bb   : > { %5499 = vst [vmem:[#allocation15_spill] sm:$0xff] %v4188_v62 }
 0x1bd   : > { %1291 = vrot.lane.b32.xlu0 %v1269_v61, %s3597_s24  ;;  %v1270_v61 = vmul.f32 %v1261_v46, %v4116_v12 }
 0x1bf   : > { %1165 = vrot.lane.b32.xlu2 %v1145_v2, %s3596_s23  ;;  %v4196_v0 = vpop.permute.xlu0 %978 }
 0x1c0   : > { %5500 = vst [vmem:[#allocation16_spill] sm:$0xff] %v4196_v0  ;;  %1287 = vrot.lane.b32.xlu1 %v1267_v21, %s3597_s24 }
 0x1c1   : > { %v4199_v4 = vpop.permute.xlu2 %1218 }
 0x1c2   : > { %5501 = vst [vmem:[#allocation17_spill] sm:$0xff] %v4199_v4  ;;  %v4201_v10 = vpop.permute.xlu1 %974 }
 0x1c3   : > { %5502 = vst [vmem:[#allocation18_spill] sm:$0xff] %v4201_v10 }
 0x1c5   : > { %1344 = vrot.lane.b32.xlu0 %v1326_v41, %s3599_s26  ;;  %v1208_v41 = vmul.f32 %v4162_v39, %v4132_v5 }
 0x1c7   : > { %1289 = vrot.lane.b32.xlu2 %v1268_v19, %s3597_s24  ;;  %v4210_v17 = vpop.permute.xlu0 %1102  ;;  %v1324_v19 = vmul.f32 %v3957_v25, %v3964_v30 }
 0x1c8   : > { %5503 = vst [vmem:[#allocation19_spill] sm:$0xff] %v4210_v17  ;;  %927 = vrot.lane.b32.xlu1 %v904_v35, %s3593_s21  ;;  %s3625_s21 = smov 82  }
 0x1c9   : > { %v4213_v22 = vpop.permute.xlu2 %1279 }
 0x1ca   : > { %5504 = vst [vmem:[#allocation20_spill] sm:$0xff] %v4213_v22  ;;  %v4215_v9 = vpop.permute.xlu1 %1098 }
 0x1cb   : > { %5505 = vst [vmem:[#allocation21_spill] sm:$0xff] %v4215_v9 }
 0x1cd   : > { %1350 = vrot.lane.b32.xlu0 %v1329_v63, %s3599_s26  ;;  %v1325_v63 = vmul.f32 %v3957_v25, %v3952_v18 }
 0x1cf   : > { %864 = vrot.lane.b32.xlu2 %v842_v16, %s3590_s19  ;;  %v4225_v58 = vpop.permute.xlu0 %1161  ;;  %v1327_v16 = vmul.f32 %v4072_v37, %v3985_v44  ;;  %s3619_s19 = smov 85  }
 0x1d0   : > { %5506 = vst [vmem:[#allocation22_spill] sm:$0xff] %v4225_v58  ;;  %986 = vrot.lane.b32.xlu1 %v964_v6, %s3594_s12 }
 0x1d1   : > { %v4228_v31 = vpop.permute.xlu2 %858 }
 0x1d2   : > { %5507 = vst [vmem:[#allocation23_spill] sm:$0xff] %v4228_v31  ;;  %v4230_v13 = vpop.permute.xlu1 %1157 }
 0x1d3   : > { %5508 = vst [vmem:[#allocation24_spill] sm:$0xff] %v4230_v13 }
 0x1d5   : > { %1370 = vperm.xlu0 %3487, %v3860_v40  }
 0x1d7   : > { %988 = vrot.lane.b32.xlu2 %v965_v53, %s3594_s12  ;;  %v4238_v43 = vpop.permute.xlu0 %1285  ;;  %s3627_s12 = smov 81  }
 0x1d8   : > { %5509 = vst [vmem:[#allocation25_spill] sm:$0xff] %v4238_v43  ;;  %1110 = vrot.lane.b32.xlu1 %v1087_v50, %s3595_s22  ;;  %v1328_v50 = vmul.f32 %v4080_v42, %v4046_v23  ;;  %s3629_s22 = smov 72  }
 0x1d9   : > { %v4241_v45 = vpop.permute.xlu2 %917 }
 0x1da   : > { %5510 = vst [vmem:[#allocation26_spill] sm:$0xff] %v4241_v45  ;;  %v4243_v3 = vpop.permute.xlu1 %1281 }
 0x1db   : > { %5511 = vst [vmem:[#allocation27_spill] sm:$0xff] %v4243_v3 }
 0x1df   : > { %1047 = vrot.lane.b32.xlu2 %v1025_v20, %s3591_s20  ;;  %v4250_v54 = vpop.permute.xlu0 %860  ;;  %v1330_v20 = vmul.f32 %v4102_v57, %v4132_v5  ;;  %s3621_s20 = smov 84  }
 0x1e0   : > { %5512 = vst [vmem:[#allocation28_spill] sm:$0xff] %v4250_v54  ;;  %1169 = vrot.lane.b32.xlu1 %v1147_v38, %s3596_s23 }
 0x1e1   : > { %v4253_v28 = vpop.permute.xlu2 %1041 }
 0x1e2   : > { %5513 = vst [vmem:[#allocation29_spill] sm:$0xff] %v4253_v28  ;;  %v4255_v24 = vpop.permute.xlu1 %856 }
 0x1e3   : > { %5514 = vst [vmem:[#allocation30_spill] sm:$0xff] %v4255_v24 }
 0x1e7   : > { %1171 = vrot.lane.b32.xlu2 %v1148_v60, %s3596_s23  ;;  %v4261_v14 = vpop.permute.xlu0 %984  ;;  %v1331_v60 = vmul.f32 %v4102_v57, %v4116_v12  ;;  %s3631_s23 = smov 71  }
 0x1e8   : > { %5515 = vst [vmem:[#allocation31_spill] sm:$0xff] %v4261_v14  ;;  %1293 = vrot.lane.b32.xlu1 %v1270_v61, %s3597_s24  ;;  %s3633_s24 = smov 70  }
 0x1e9   : > { %v4264_v2 = vpop.permute.xlu2 %1100 }
 0x1ea   : > { %5516 = vst [vmem:[#allocation32_spill] sm:$0xff] %v4264_v2  ;;  %v4266_v21 = vpop.permute.xlu1 %980 }
 0x1eb   : > { %5517 = vst [vmem:[#allocation33_spill] sm:$0xff] %v4266_v21 }
 0x1ef   : > { %1230 = vrot.lane.b32.xlu2 %v1208_v41, %s3592_s25  ;;  %v4273_v48 = vpop.permute.xlu0 %1043  ;;  %s3623_s25 = smov 83  }
 0x1f0   : > { %5518 = vst [vmem:[#allocation34_spill] sm:$0xff] %v4273_v48  ;;  %1340 = vrot.lane.b32.xlu1 %v1324_v19, %s3599_s26 }
 0x1f1   : > { %v4276_v46 = vpop.permute.xlu2 %1224 }
 0x1f2   : > { %5519 = vst [vmem:[#allocation35_spill] sm:$0xff] %v4276_v46  ;;  %v4278_v35 = vpop.permute.xlu1 %1039 }
 0x1f3   : > { %5520 = vst [vmem:[#allocation36_spill] sm:$0xff] %v4278_v35 }
 0x1f7   : > { %1342 = vrot.lane.b32.xlu2 %v1325_v63, %s3599_s26  ;;  %v4285_v39 = vpop.permute.xlu0 %1167 }
 0x1f8   : > { %5521 = vst [vmem:[#allocation37_spill] sm:$0xff] %v4285_v39  ;;  %1346 = vrot.lane.b32.xlu1 %v1327_v16, %s3599_s26 }
 0x1f9   : > { %v4288_v6 = vpop.permute.xlu2 %1283 }
 0x1fa   : > { %5522 = vst [vmem:[#allocation38_spill] sm:$0xff] %v4288_v6  ;;  %v4290_v53 = vpop.permute.xlu1 %1163 }
 0x1fb   : > { %5523 = vst [vmem:[#allocation39_spill] sm:$0xff] %v4290_v53 }
 0x1ff   : > { %1348 = vrot.lane.b32.xlu2 %v1328_v50, %s3599_s26  ;;  %v4297_v25 = vpop.permute.xlu0 %1226 }
 0x200   : > { %5524 = vst [vmem:[#allocation40_spill] sm:$0xff] %v4297_v25  ;;  %1352 = vrot.lane.b32.xlu1 %v1330_v20, %s3599_s26 }
 0x201   : > { %v4300_v37 = vpop.permute.xlu2 %923 }
 0x202   : > { %5525 = vst [vmem:[#allocation41_spill] sm:$0xff] %v4300_v37  ;;  %v4302_v38 = vpop.permute.xlu1 %1222 }
 0x203   : > { %5526 = vst [vmem:[#allocation42_spill] sm:$0xff] %v4302_v38 }
 0x207   : > { %1354 = vrot.lane.b32.xlu2 %v1331_v60, %s3599_s26  ;;  %v4307_v61 = vpop.permute.xlu0 %866  ;;  %s3635_s26 = smov 69  }
 0x208   : > { %1374 = vperm.xlu1 %3488, %v3877_v52  }
 0x209   : > { %v4310_v42 = vpop.permute.xlu2 %982 }
 0x20a   : > { %5527 = vst [vmem:[#allocation43_spill] sm:$0xff] %v4310_v42  ;;  %v4312_v41 = vpop.permute.xlu1 %862 }
 0x20b   : > { %5528 = vst [vmem:[#allocation44_spill] sm:$0xff] %v4312_v41 }
 0x20f   : > { %1378 = vperm.xlu2 %3489, %v3897_v59   ;;  %v4315_v19 = vpop.permute.xlu0 %925 }
 0x210   : > { %1382 = vperm.xlu1 %3488, %v3929_v8  }
 0x211   : > { %v4318_v63 = vpop.permute.xlu2 %1106 }
 0x212   : > { %5529 = vst [vmem:[#allocation45_spill] sm:$0xff] %v4318_v63  ;;  %v4320_v16 = vpop.permute.xlu1 %921 }
 0x213   : > { %5530 = vst [vmem:[#allocation46_spill] sm:$0xff] %v4320_v16 }
 0x217   : > { %v4322_v57 = vpop.permute.xlu0 %1049 }
 0x219   : > { %v4324_v50 = vpop.permute.xlu2 %1165 }
 0x21a   : > { %5531 = vst [vmem:[#allocation47_spill] sm:$0xff] %v4324_v50  ;;  %v4326_v20 = vpop.permute.xlu1 %1045 }
 0x21b   : > { %5532 = vst [vmem:[#allocation48_spill] sm:$0xff] %v4326_v20 }
 0x21f   : > { %v4328_v60 = vpop.permute.xlu0 %1108 }
 0x221   : > { %v4330_v1 = vpop.permute.xlu2 %1289 }
 0x222   : > { %5533 = vst [vmem:[#allocation49_spill] sm:$0xff] %v4330_v1  ;;  %v4332_v6 = vpop.permute.xlu1 %1104 }
 0x223   : > { %5534 = vst [vmem:[#allocation50_spill] sm:$0xff] %v4332_v6 }
 0x227   : > { %v4334_v43 = vpop.permute.xlu0 %1232 }
 0x229   : > { %v4336_v38 = vpop.permute.xlu2 %864 }
 0x22a   : > { %v4338_v46 = vpop.permute.xlu1 %1228 }
 0x22b   : > { %5535 = vst [vmem:[#allocation51_spill] sm:$0xff] %v4338_v46 }
 0x22f   : > { %v4340_v58 = vpop.permute.xlu0 %1291 }
 0x231   : > { %v4342_v53 = vpop.permute.xlu2 %988 }
 0x232   : > { %v4344_v2 = vpop.permute.xlu1 %1287 }
 0x233   : > { %5536 = vst [vmem:[#allocation52_spill] sm:$0xff] %v4344_v2 }
 0x237   : > { %v4346_v17 = vpop.permute.xlu0 %1344 }
 0x238   : > { %5537 = vst [vmem:[#allocation53_spill] sm:$0xff] %v4346_v17 }
 0x239   : > { %v4348_v35 = vpop.permute.xlu2 %1047 }
 0x23a   : > { %v4350_v28 = vpop.permute.xlu1 %927 }
 0x23f   : > { %v4352_v0 = vpop.permute.xlu0 %1350 }
 0x240   : > { %5538 = vst [vmem:[#allocation54_spill] sm:$0xff] %v4352_v0 }
 0x241   : > { %v4354_v21 = vpop.permute.xlu2 %1171 }
 0x242   : > { %v4356_v45 = vpop.permute.xlu1 %986 }
 0x247   : > { %v1371_v55 = vpop.permute.xlu0 %1370 }
 0x248   : > { %v1385_v24 = vmul.f32 %v1371_v55, %v3964_v30  ;;  %v1386_v31 = vmul.f32 %v1371_v55, %v3952_v18  ;;  %v3601_v55 = vmov 11  }
 0x249   : > { %v4360_v22 = vpop.permute.xlu2 %1230  ;;  %3492 = vset.pattern.permute.xlu0 %v3601_v55  ;;  %3491 = vset.pattern.permute.xlu2 %v3601_v55 }
 0x24a   : > { %v4362_v3 = vpop.permute.xlu1 %1110  ;;  %1403 = vrot.lane.b32.xlu0 %v1386_v31, %s3600_s27  ;;  %1401 = vrot.lane.b32.xlu2 %v1385_v24, %s3600_s27 }
 0x24b   : > { %3490 = vset.pattern.permute.xlu1 %v3601_v55 }
 0x251   : > { %v4364_v17 = vpop.permute.xlu2 %1342 }
 0x252   : > { %5539 = vst [vmem:[#allocation55_spill] sm:$0xff] %v4364_v17  ;;  %v4366_v4 = vpop.permute.xlu1 %1169 }
 0x259   : > { %v4368_v47 = vpop.permute.xlu2 %1348 }
 0x25a   : > { %5540 = vst [vmem:[#allocation56_spill] sm:$0xff] %v4368_v47  ;;  %v4370_v13 = vpop.permute.xlu1 %1293 }
 0x261   : > { %v4372_v56 = vpop.permute.xlu2 %1354 }
 0x262   : > { %v4374_v49 = vpop.permute.xlu1 %1340 }
 0x263   : > { %5541 = vst [vmem:[#allocation57_spill] sm:$0xff] %v4374_v49 }
 0x269   : > { %v1379_v9 = vpop.permute.xlu2 %1378 }
 0x26a   : > { %v1389_v31 = vmul.f32 %v1379_v9, %v4046_v23  ;;  %v4377_v24 = vpop.permute.xlu1 %1346  ;;  %v1390_v29 = vmul.f32 %v1379_v9, %v4062_v33 }
 0x26b   : > { %5542 = vst [vmem:[#allocation58_spill] sm:$0xff] %v4377_v24 }
 0x26c   : > { %1409 = vrot.lane.b32.xlu0 %v1389_v31, %s3600_s27 }
 0x272   : > { %v4379_v17 = vpop.permute.xlu1 %1352 }
 0x27a   : > { %v1375_v36 = vpop.permute.xlu1 %1374 }
 0x27b   : > { %v1387_v34 = vmul.f32 %v1375_v36, %v3998_v51  ;;  %v1388_v10 = vmul.f32 %v1375_v36, %v3985_v44 }
 0x27d   : > { %1407 = vrot.lane.b32.xlu2 %v1388_v10, %s3600_s27  ;;  %1405 = vrot.lane.b32.xlu1 %v1387_v34, %s3600_s27 }
 0x282   : > { %v1383_v49 = vpop.permute.xlu1 %1382 }
 0x283   : > { %v1391_v55 = vmul.f32 %v1383_v49, %v4132_v5  ;;  %v1392_v26 = vmul.f32 %v1383_v49, %v4116_v12 }
 0x285   : > { %1413 = vrot.lane.b32.xlu2 %v1391_v55, %s3600_s27  ;;  %1411 = vrot.lane.b32.xlu1 %v1390_v29, %s3600_s27  ;;  %v3603_v29 = vmov 12  }
 0x286   : > { %1415 = vrot.lane.b32.xlu0 %v1392_v26, %s3600_s27  ;;  %s3638_s27 = smov 68  }
 0x28d   : > { %1435 = vperm.xlu2 %3491, %v3877_v52   ;;  %1431 = vperm.xlu1 %3490, %v3860_v40  }
 0x28e   : > { %1439 = vperm.xlu0 %3492, %v3897_v59  }
 0x295   : > { %1443 = vperm.xlu1 %3490, %v3929_v8   ;;  %3493 = vset.pattern.permute.xlu2 %v3603_v29 }
 0x296   : > { %3494 = vset.pattern.permute.xlu0 %v3603_v29 }
 0x29d   : > { %3495 = vset.pattern.permute.xlu1 %v3603_v29 }
 0x2a4   : > { %v4390_v36 = vpop.permute.xlu2 %1401 }
 0x2a5   : > { %5543 = vst [vmem:[#allocation59_spill] sm:$0xff] %v4390_v36 }
 0x2bc   : > { %v4397_v26 = vpop.permute.xlu0 %1403 }
 0x2bd   : > { %5545 = vst [vmem:[#allocation61_spill] sm:$0xff] %v4397_v26 }
 0x2d7   : > { %v4392_v34 = vpop.permute.xlu2 %1407 }
 0x2d8   : > { %5544 = vst [vmem:[#allocation60_spill] sm:$0xff] %v4392_v34 }
 0x2de   : > { %v4401_v55 = vpop.permute.xlu0 %1409 }
 0x2df   : > { %v4394_v10 = vpop.permute.xlu2 %1413  ;;  %5547 = vst [vmem:[#allocation63_spill] sm:$0xff] %v4401_v55 }
 0x2e7   : > { %v1436_v9 = vpop.permute.xlu2 %1435 }
 0x2e8   : > { %v1449_v49 = vmul.f32 %v1436_v9, %v3985_v44 }
 0x2ea   : > { %1468 = vrot.lane.b32.xlu0 %v1449_v49, %s3602_s28 }
 0x2ef   : > { %v4399_v31 = vpop.permute.xlu1 %1405 }
 0x2f0   : > { %5546 = vst [vmem:[#allocation62_spill] sm:$0xff] %v4399_v31  ;;  %v1448_v31 = vmul.f32 %v1436_v9, %v3998_v51 }
 0x2f7   : > { %v4403_v24 = vpop.permute.xlu1 %1411 }
 0x2f8   : > { %5548 = vst [vmem:[#allocation64_spill] sm:$0xff] %v4403_v24  ;;  %v4405_v34 = vpop.permute.xlu0 %1415 }
 0x2ff   : > { %v1432_v36 = vpop.permute.xlu1 %1431 }
 0x300   : > { %v1446_v62 = vmul.f32 %v1432_v36, %v3964_v30  ;;  %v1447_v7 = vmul.f32 %v1432_v36, %v3952_v18  ;;  %v1440_v49 = vpop.permute.xlu0 %1439  ;;  %v3604_v36 = vmov 13  }
 0x301   : > { %v1450_v15 = vmul.f32 %v1440_v49, %v4046_v23  ;;  %v1451_v55 = vmul.f32 %v1440_v49, %v4062_v33 }
 0x302   : > { %1464 = vrot.lane.b32.xlu1 %v1447_v7, %s3602_s28  ;;  %1462 = vrot.lane.b32.xlu2 %v1446_v62, %s3602_s28 }
 0x307   : > { %v1444_v26 = vpop.permute.xlu1 %1443 }
 0x308   : > { %v1452_v29 = vmul.f32 %v1444_v26, %v4132_v5  ;;  %v1453_v27 = vmul.f32 %v1444_v26, %v4116_v12 }
 0x30a   : > { %1470 = vrot.lane.b32.xlu1 %v1450_v15, %s3602_s28  ;;  %1474 = vrot.lane.b32.xlu0 %v1452_v29, %s3602_s28 }
 0x30b   : > { %1466 = vrot.lane.b32.xlu2 %v1448_v31, %s3602_s28 }
 0x312   : > { %1476 = vrot.lane.b32.xlu1 %v1453_v27, %s3602_s28  ;;  %1496 = vperm.xlu0 %3494, %v3877_v52  }
 0x313   : > { %1472 = vrot.lane.b32.xlu2 %v1451_v55, %s3602_s28  ;;  %s3644_s28 = smov 67  }
 0x31a   : > { %1500 = vperm.xlu1 %3495, %v3897_v59   ;;  %3496 = vset.pattern.permute.xlu0 %v3604_v36 }
 0x31b   : > { %1492 = vperm.xlu2 %3493, %v3860_v40  }
 0x322   : > { %3497 = vset.pattern.permute.xlu1 %v3604_v36 }
 0x323   : > { %1504 = vperm.xlu2 %3493, %v3929_v8  }
 0x32b   : > { %3498 = vset.pattern.permute.xlu2 %v3604_v36 }
 0x35c   : > { %v4418_v7 = vpop.permute.xlu2 %1462  ;;  %v4424_v27 = vpop.permute.xlu0 %1468 }
 0x35d   : > { %5549 = vst [vmem:[#allocation65_spill] sm:$0xff] %v4418_v7 }
 0x35e   : > { %5552 = vst [vmem:[#allocation68_spill] sm:$0xff] %v4424_v27 }
 0x365   : > { %v4420_v62 = vpop.permute.xlu2 %1466 }
 0x366   : > { %5550 = vst [vmem:[#allocation66_spill] sm:$0xff] %v4420_v62 }
 0x36d   : > { %v4422_v15 = vpop.permute.xlu2 %1472 }
 0x36e   : > { %5551 = vst [vmem:[#allocation67_spill] sm:$0xff] %v4422_v15 }
 0x374   : > { %v4426_v9 = vpop.permute.xlu1 %1464 }
 0x375   : > { %5553 = vst [vmem:[#allocation69_spill] sm:$0xff] %v4426_v9  ;;  %v1493_v26 = vpop.permute.xlu2 %1492 }
 0x376   : > { %v1507_v31 = vmul.f32 %v1493_v26, %v3964_v30  ;;  %v1508_v55 = vmul.f32 %v1493_v26, %v3952_v18 }
 0x378   : > { %1525 = vrot.lane.b32.xlu2 %v1508_v55, %s3605_s29  ;;  %1523 = vrot.lane.b32.xlu1 %v1507_v31, %s3605_s29 }
 0x37c   : > { %v4430_v49 = vpop.permute.xlu1 %1470  ;;  %v4432_v29 = vpop.permute.xlu0 %1474 }
 0x37d   : > { %5554 = vst [vmem:[#allocation70_spill] sm:$0xff] %v4430_v49  ;;  %v1505_v9 = vpop.permute.xlu2 %1504 }
 0x37e   : > { %v1513_v31 = vmul.f32 %v1505_v9, %v4132_v5  ;;  %v1514_v49 = vmul.f32 %v1505_v9, %v4116_v12 }
 0x384   : > { %v4434_v62 = vpop.permute.xlu1 %1476  ;;  %v1497_v7 = vpop.permute.xlu0 %1496 }
 0x385   : > { %v1509_v36 = vmul.f32 %v1497_v7, %v3998_v51  ;;  %v1510_v27 = vmul.f32 %v1497_v7, %v3985_v44 }
 0x387   : > { %1527 = vrot.lane.b32.xlu0 %v1509_v36, %s3605_s29  ;;  %1529 = vrot.lane.b32.xlu1 %v1510_v27, %s3605_s29 }
 0x38c   : > { %v1501_v15 = vpop.permute.xlu1 %1500 }
 0x38d   : > { %v1511_v26 = vmul.f32 %v1501_v15, %v4046_v23  ;;  %v1512_v55 = vmul.f32 %v1501_v15, %v4062_v33  ;;  %v3606_v15 = vmov 14  }
 0x38f   : > { %1533 = vrot.lane.b32.xlu0 %v1512_v55, %s3605_s29  ;;  %1531 = vrot.lane.b32.xlu2 %v1511_v26, %s3605_s29 }
 0x390   : > { %1535 = vrot.lane.b32.xlu1 %v1513_v31, %s3605_s29 }
 0x397   : > { %1553 = vperm.xlu0 %3496, %v3860_v40   ;;  %1537 = vrot.lane.b32.xlu2 %v1514_v49, %s3605_s29  ;;  %s3645_s29 = smov 58  }
 0x398   : > { %1557 = vperm.xlu1 %3497, %v3877_v52  }
 0x39f   : > { %1561 = vperm.xlu2 %3498, %v3897_v59   ;;  %3501 = vset.pattern.permute.xlu0 %v3606_v15 }
 0x3a0   : > { %1565 = vperm.xlu1 %3497, %v3929_v8  }
 0x3a7   : > { %3500 = vset.pattern.permute.xlu2 %v3606_v15 }
 0x3a8   : > { %3499 = vset.pattern.permute.xlu1 %v3606_v15 }
 0x3d2   : > { %v4448_v27 = vpop.permute.xlu2 %1525 }
 0x3d3   : > { %5556 = vst [vmem:[#allocation72_spill] sm:$0xff] %v4448_v27 }
 0x3e9   : > { %v4454_v26 = vpop.permute.xlu2 %1531 }
 0x3ea   : > { %v4446_v7 = vpop.permute.xlu1 %1523  ;;  %5559 = vst [vmem:[#allocation75_spill] sm:$0xff] %v4454_v26 }
 0x3eb   : > { %5555 = vst [vmem:[#allocation71_spill] sm:$0xff] %v4446_v7 }
 0x3f1   : > { %v4460_v31 = vpop.permute.xlu2 %1537 }
 0x3f9   : > { %v4450_v36 = vpop.permute.xlu0 %1527  ;;  %v4452_v9 = vpop.permute.xlu1 %1529 }
 0x3fa   : > { %5557 = vst [vmem:[#allocation73_spill] sm:$0xff] %v4450_v36  ;;  %v1562_v36 = vpop.permute.xlu2 %1561 }
 0x3fb   : > { %5558 = vst [vmem:[#allocation74_spill] sm:$0xff] %v4452_v9  ;;  %v1572_v9 = vmul.f32 %v1562_v36, %v4046_v23 }
 0x401   : > { %v4456_v49 = vpop.permute.xlu0 %1533 }
 0x402   : > { %5560 = vst [vmem:[#allocation76_spill] sm:$0xff] %v4456_v49  ;;  %v4458_v55 = vpop.permute.xlu1 %1535  ;;  %v1573_v49 = vmul.f32 %v1562_v36, %v4062_v33  ;;  %v3608_v36 = vmov 15  }
 0x409   : > { %v1554_v24 = vpop.permute.xlu0 %1553 }
 0x40a   : > { %v1568_v7 = vmul.f32 %v1554_v24, %v3964_v30  ;;  %v1569_v27 = vmul.f32 %v1554_v24, %v3952_v18  ;;  %v1558_v47 = vpop.permute.xlu1 %1557 }
 0x40b   : > { %v1570_v15 = vmul.f32 %v1558_v47, %v3998_v51  ;;  %v1571_v26 = vmul.f32 %v1558_v47, %v3985_v44 }
 0x40c   : > { %1586 = vrot.lane.b32.xlu0 %v1569_v27, %s3607_s30  ;;  %1584 = vrot.lane.b32.xlu2 %v1568_v7, %s3607_s30 }
 0x40d   : > { %1588 = vrot.lane.b32.xlu1 %v1570_v15, %s3607_s30 }
 0x412   : > { %v1566_v0 = vpop.permute.xlu1 %1565 }
 0x413   : > { %v1574_v24 = vmul.f32 %v1566_v0, %v4132_v5  ;;  %v1575_v2 = vmul.f32 %v1566_v0, %v4116_v12 }
 0x414   : > { %1590 = vrot.lane.b32.xlu2 %v1571_v26, %s3607_s30  ;;  %1592 = vrot.lane.b32.xlu0 %v1572_v9, %s3607_s30 }
 0x415   : > { %1594 = vrot.lane.b32.xlu1 %v1573_v49, %s3607_s30 }
 0x41c   : > { %1596 = vrot.lane.b32.xlu2 %v1574_v24, %s3607_s30  ;;  %1598 = vrot.lane.b32.xlu0 %v1575_v2, %s3607_s30  ;;  %s3646_s30 = smov 57  }
 0x41d   : > { %1614 = vperm.xlu1 %3499, %v3860_v40  }
 0x424   : > { %1618 = vperm.xlu2 %3500, %v3877_v52   ;;  %1622 = vperm.xlu0 %3501, %v3897_v59  }
 0x425   : > { %1626 = vperm.xlu1 %3499, %v3929_v8  }
 0x42c   : > { %3503 = vset.pattern.permute.xlu0 %v3608_v36  ;;  %3502 = vset.pattern.permute.xlu2 %v3608_v36 }
 0x42d   : > { %3504 = vset.pattern.permute.xlu1 %v3608_v36 }
 0x466   : > { %v4474_v47 = vpop.permute.xlu2 %1584 }
 0x467   : > { %5561 = vst [vmem:[#allocation77_spill] sm:$0xff] %v4474_v47 }
 0x46e   : > { %v4476_v7 = vpop.permute.xlu2 %1590 }
 0x46f   : > { %5562 = vst [vmem:[#allocation78_spill] sm:$0xff] %v4476_v7 }
 0x476   : > { %v4478_v27 = vpop.permute.xlu2 %1596 }
 0x47e   : > { %v4480_v0 = vpop.permute.xlu0 %1586  ;;  %v1619_v2 = vpop.permute.xlu2 %1618 }
 0x47f   : > { %5563 = vst [vmem:[#allocation79_spill] sm:$0xff] %v4480_v0  ;;  %v4482_v9 = vpop.permute.xlu1 %1588  ;;  %v1632_v26 = vmul.f32 %v1619_v2, %v3985_v44 }
 0x480   : > { %5564 = vst [vmem:[#allocation80_spill] sm:$0xff] %v4482_v9 }
 0x481   : > { %1651 = vrot.lane.b32.xlu0 %v1632_v26, %s3609_s11  ;;  %v1631_v26 = vmul.f32 %v1619_v2, %v3998_v51  ;;  %v3610_v2 = vmov 16  }
 0x486   : > { %v4485_v49 = vpop.permute.xlu0 %1592 }
 0x487   : > { %5565 = vst [vmem:[#allocation81_spill] sm:$0xff] %v4485_v49  ;;  %v4487_v15 = vpop.permute.xlu1 %1594 }
 0x488   : > { %5566 = vst [vmem:[#allocation82_spill] sm:$0xff] %v4487_v15 }
 0x48e   : > { %v4489_v24 = vpop.permute.xlu0 %1598 }
 0x48f   : > { %v1615_v7 = vpop.permute.xlu1 %1614 }
 0x490   : > { %v1629_v47 = vmul.f32 %v1615_v7, %v3964_v30  ;;  %v1630_v36 = vmul.f32 %v1615_v7, %v3952_v18 }
 0x492   : > { %1647 = vrot.lane.b32.xlu1 %v1630_v36, %s3609_s11  ;;  %1645 = vrot.lane.b32.xlu2 %v1629_v47, %s3609_s11 }
 0x496   : > { %v1623_v0 = vpop.permute.xlu0 %1622 }
 0x497   : > { %v1627_v1 = vpop.permute.xlu1 %1626  ;;  %v1633_v9 = vmul.f32 %v1623_v0, %v4046_v23  ;;  %v1634_v15 = vmul.f32 %v1623_v0, %v4062_v33 }
 0x498   : > { %v1635_v25 = vmul.f32 %v1627_v1, %v4132_v5  ;;  %v1636_v49 = vmul.f32 %v1627_v1, %v4116_v12 }
 0x49a   : > { %1653 = vrot.lane.b32.xlu1 %v1633_v9, %s3609_s11  ;;  %1657 = vrot.lane.b32.xlu0 %v1635_v25, %s3609_s11 }
 0x49b   : > { %1649 = vrot.lane.b32.xlu2 %v1631_v26, %s3609_s11 }
 0x4a2   : > { %1659 = vrot.lane.b32.xlu1 %v1636_v49, %s3609_s11  ;;  %1679 = vperm.xlu0 %3503, %v3877_v52  }
 0x4a3   : > { %1655 = vrot.lane.b32.xlu2 %v1634_v15, %s3609_s11  ;;  %s3647_s11 = smov 56  }
 0x4aa   : > { %1683 = vperm.xlu1 %3504, %v3897_v59   ;;  %3505 = vset.pattern.permute.xlu0 %v3610_v2 }
 0x4ab   : > { %1675 = vperm.xlu2 %3502, %v3860_v40  }
 0x4b2   : > { %3506 = vset.pattern.permute.xlu1 %v3610_v2 }
 0x4b3   : > { %1687 = vperm.xlu2 %3502, %v3929_v8  }
 0x4bb   : > { %3507 = vset.pattern.permute.xlu2 %v3610_v2 }
 0x4ec   : > { %v4502_v47 = vpop.permute.xlu2 %1645 }
 0x4ed   : > { %5567 = vst [vmem:[#allocation83_spill] sm:$0xff] %v4502_v47 }
 0x4f3   : > { %v4508_v1 = vpop.permute.xlu0 %1651 }
 0x4f4   : > { %5570 = vst [vmem:[#allocation86_spill] sm:$0xff] %v4508_v1 }
 0x4f5   : > { %v4504_v7 = vpop.permute.xlu2 %1649 }
 0x4f6   : > { %5568 = vst [vmem:[#allocation84_spill] sm:$0xff] %v4504_v7 }
 0x4fd   : > { %v4506_v25 = vpop.permute.xlu2 %1655 }
 0x4fe   : > { %5569 = vst [vmem:[#allocation85_spill] sm:$0xff] %v4506_v25 }
 0x504   : > { %v4510_v0 = vpop.permute.xlu1 %1647 }
 0x505   : > { %5571 = vst [vmem:[#allocation87_spill] sm:$0xff] %v4510_v0  ;;  %v1676_v9 = vpop.permute.xlu2 %1675 }
 0x506   : > { %v1690_v49 = vmul.f32 %v1676_v9, %v3964_v30  ;;  %v1691_v15 = vmul.f32 %v1676_v9, %v3952_v18 }
 0x508   : > { %1708 = vrot.lane.b32.xlu2 %v1691_v15, %s3611_s15  ;;  %1706 = vrot.lane.b32.xlu1 %v1690_v49, %s3611_s15 }
 0x50c   : > { %v4514_v36 = vpop.permute.xlu1 %1653  ;;  %v4516_v26 = vpop.permute.xlu0 %1657 }
 0x50d   : > { %5572 = vst [vmem:[#allocation88_spill] sm:$0xff] %v4514_v36  ;;  %v1688_v0 = vpop.permute.xlu2 %1687 }
 0x50e   : > { %v1696_v49 = vmul.f32 %v1688_v0, %v4132_v5  ;;  %v1697_v36 = vmul.f32 %v1688_v0, %v4116_v12 }
 0x514   : > { %v4518_v7 = vpop.permute.xlu1 %1659  ;;  %v1680_v47 = vpop.permute.xlu0 %1679 }
 0x515   : > { %v1692_v2 = vmul.f32 %v1680_v47, %v3998_v51  ;;  %v1693_v1 = vmul.f32 %v1680_v47, %v3985_v44 }
 0x517   : > { %1710 = vrot.lane.b32.xlu0 %v1692_v2, %s3611_s15  ;;  %1712 = vrot.lane.b32.xlu1 %v1693_v1, %s3611_s15 }
 0x51c   : > { %v1684_v25 = vpop.permute.xlu1 %1683 }
 0x51d   : > { %v1694_v9 = vmul.f32 %v1684_v25, %v4046_v23  ;;  %v1695_v15 = vmul.f32 %v1684_v25, %v4062_v33  ;;  %v3612_v25 = vmov 17  }
 0x51f   : > { %1716 = vrot.lane.b32.xlu0 %v1695_v15, %s3611_s15  ;;  %1714 = vrot.lane.b32.xlu2 %v1694_v9, %s3611_s15 }
 0x520   : > { %1718 = vrot.lane.b32.xlu1 %v1696_v49, %s3611_s15 }
 0x527   : > { %1736 = vperm.xlu0 %3505, %v3860_v40   ;;  %1720 = vrot.lane.b32.xlu2 %v1697_v36, %s3611_s15  ;;  %s3648_s15 = smov 55  }
 0x528   : > { %1740 = vperm.xlu1 %3506, %v3877_v52  }
 0x52f   : > { %1744 = vperm.xlu2 %3507, %v3897_v59   ;;  %3510 = vset.pattern.permute.xlu0 %v3612_v25 }
 0x530   : > { %1748 = vperm.xlu1 %3506, %v3929_v8  }
 0x537   : > { %3509 = vset.pattern.permute.xlu2 %v3612_v25 }
 0x538   : > { %3508 = vset.pattern.permute.xlu1 %v3612_v25 }
 0x562   : > { %v4532_v1 = vpop.permute.xlu2 %1708 }
 0x563   : > { %5574 = vst [vmem:[#allocation90_spill] sm:$0xff] %v4532_v1 }
 0x579   : > { %v4538_v9 = vpop.permute.xlu2 %1714 }
 0x57a   : > { %v4530_v47 = vpop.permute.xlu1 %1706  ;;  %5577 = vst [vmem:[#allocation93_spill] sm:$0xff] %v4538_v9 }
 0x57b   : > { %5573 = vst [vmem:[#allocation89_spill] sm:$0xff] %v4530_v47 }
 0x581   : > { %v4544_v49 = vpop.permute.xlu2 %1720 }
 0x589   : > { %v4534_v2 = vpop.permute.xlu0 %1710  ;;  %v4536_v0 = vpop.permute.xlu1 %1712 }
 0x58a   : > { %5575 = vst [vmem:[#allocation91_spill] sm:$0xff] %v4534_v2  ;;  %v1745_v2 = vpop.permute.xlu2 %1744 }
 0x58b   : > { %5576 = vst [vmem:[#allocation92_spill] sm:$0xff] %v4536_v0  ;;  %v1755_v0 = vmul.f32 %v1745_v2, %v4046_v23 }
 0x591   : > { %v4540_v36 = vpop.permute.xlu0 %1716 }
 0x592   : > { %5578 = vst [vmem:[#allocation94_spill] sm:$0xff] %v4540_v36  ;;  %v4542_v15 = vpop.permute.xlu1 %1718  ;;  %v1756_v36 = vmul.f32 %v1745_v2, %v4062_v33  ;;  %v3614_v2 = vmov 18  }
 0x599   : > { %v1737_v46 = vpop.permute.xlu0 %1736 }
 0x59a   : > { %v1751_v47 = vmul.f32 %v1737_v46, %v3964_v30  ;;  %v1752_v1 = vmul.f32 %v1737_v46, %v3952_v18  ;;  %v1741_v50 = vpop.permute.xlu1 %1740 }
 0x59b   : > { %v1753_v25 = vmul.f32 %v1741_v50, %v3998_v51  ;;  %v1754_v9 = vmul.f32 %v1741_v50, %v3985_v44 }
 0x59c   : > { %1769 = vrot.lane.b32.xlu0 %v1752_v1, %s3613_s16  ;;  %1767 = vrot.lane.b32.xlu2 %v1751_v47, %s3613_s16 }
 0x59d   : > { %1771 = vrot.lane.b32.xlu1 %v1753_v25, %s3613_s16 }
 0x5a2   : > { %v1749_v39 = vpop.permute.xlu1 %1748 }
 0x5a3   : > { %v1757_v46 = vmul.f32 %v1749_v39, %v4132_v5  ;;  %v1758_v6 = vmul.f32 %v1749_v39, %v4116_v12 }
 0x5a4   : > { %1773 = vrot.lane.b32.xlu2 %v1754_v9, %s3613_s16  ;;  %1775 = vrot.lane.b32.xlu0 %v1755_v0, %s3613_s16 }
 0x5a5   : > { %1777 = vrot.lane.b32.xlu1 %v1756_v36, %s3613_s16 }
 0x5ac   : > { %1779 = vrot.lane.b32.xlu2 %v1757_v46, %s3613_s16  ;;  %1781 = vrot.lane.b32.xlu0 %v1758_v6, %s3613_s16  ;;  %s3649_s16 = smov 54  }
 0x5ad   : > { %1797 = vperm.xlu1 %3508, %v3860_v40  }
 0x5b4   : > { %1801 = vperm.xlu2 %3509, %v3877_v52   ;;  %1805 = vperm.xlu0 %3510, %v3897_v59  }
 0x5b5   : > { %1809 = vperm.xlu1 %3508, %v3929_v8  }
 0x5bc   : > { %3512 = vset.pattern.permute.xlu0 %v3614_v2  ;;  %3511 = vset.pattern.permute.xlu2 %v3614_v2 }
 0x5bd   : > { %3513 = vset.pattern.permute.xlu1 %v3614_v2 }
 0x5f6   : > { %v4558_v50 = vpop.permute.xlu2 %1767 }
 0x5f7   : > { %5579 = vst [vmem:[#allocation95_spill] sm:$0xff] %v4558_v50 }
 0x5fe   : > { %v4560_v47 = vpop.permute.xlu2 %1773 }
 0x5ff   : > { %5580 = vst [vmem:[#allocation96_spill] sm:$0xff] %v4560_v47 }
 0x606   : > { %v4562_v1 = vpop.permute.xlu2 %1779 }
 0x60e   : > { %v4564_v39 = vpop.permute.xlu0 %1769  ;;  %v1802_v6 = vpop.permute.xlu2 %1801 }
 0x60f   : > { %5581 = vst [vmem:[#allocation97_spill] sm:$0xff] %v4564_v39  ;;  %v4566_v0 = vpop.permute.xlu1 %1771  ;;  %v1815_v9 = vmul.f32 %v1802_v6, %v3985_v44 }
 0x610   : > { %5582 = vst [vmem:[#allocation98_spill] sm:$0xff] %v4566_v0 }
 0x611   : > { %1834 = vrot.lane.b32.xlu0 %v1815_v9, %s3615_s17  ;;  %v1814_v9 = vmul.f32 %v1802_v6, %v3998_v51  ;;  %v3616_v6 = vmov 19  }
 0x616   : > { %v4569_v36 = vpop.permute.xlu0 %1775 }
 0x617   : > { %5583 = vst [vmem:[#allocation99_spill] sm:$0xff] %v4569_v36  ;;  %v4571_v25 = vpop.permute.xlu1 %1777 }
 0x618   : > { %5584 = vst [vmem:[#allocation100_spill] sm:$0xff] %v4571_v25 }
 0x61e   : > { %v4573_v46 = vpop.permute.xlu0 %1781 }
 0x61f   : > { %v1798_v47 = vpop.permute.xlu1 %1797 }
 0x620   : > { %v1812_v50 = vmul.f32 %v1798_v47, %v3964_v30  ;;  %v1813_v2 = vmul.f32 %v1798_v47, %v3952_v18 }
 0x622   : > { %1830 = vrot.lane.b32.xlu1 %v1813_v2, %s3615_s17  ;;  %1828 = vrot.lane.b32.xlu2 %v1812_v50, %s3615_s17 }
 0x626   : > { %v1806_v39 = vpop.permute.xlu0 %1805 }
 0x627   : > { %v1810_v63 = vpop.permute.xlu1 %1809  ;;  %v1816_v0 = vmul.f32 %v1806_v39, %v4046_v23  ;;  %v1817_v25 = vmul.f32 %v1806_v39, %v4062_v33 }
 0x628   : > { %v1818_v48 = vmul.f32 %v1810_v63, %v4132_v5  ;;  %v1819_v36 = vmul.f32 %v1810_v63, %v4116_v12 }
 0x62a   : > { %1836 = vrot.lane.b32.xlu1 %v1816_v0, %s3615_s17  ;;  %1840 = vrot.lane.b32.xlu0 %v1818_v48, %s3615_s17 }
 0x62b   : > { %1832 = vrot.lane.b32.xlu2 %v1814_v9, %s3615_s17 }
 0x632   : > { %1842 = vrot.lane.b32.xlu1 %v1819_v36, %s3615_s17  ;;  %1862 = vperm.xlu0 %3512, %v3877_v52  }
 0x633   : > { %1838 = vrot.lane.b32.xlu2 %v1817_v25, %s3615_s17  ;;  %s3650_s17 = smov 53  }
 0x63a   : > { %1866 = vperm.xlu1 %3513, %v3897_v59   ;;  %3514 = vset.pattern.permute.xlu0 %v3616_v6 }
 0x63b   : > { %1858 = vperm.xlu2 %3511, %v3860_v40  }
 0x642   : > { %3515 = vset.pattern.permute.xlu1 %v3616_v6 }
 0x643   : > { %1870 = vperm.xlu2 %3511, %v3929_v8  }
 0x64b   : > { %3516 = vset.pattern.permute.xlu2 %v3616_v6 }
 0x67c   : > { %v4586_v50 = vpop.permute.xlu2 %1828 }
 0x67d   : > { %5585 = vst [vmem:[#allocation101_spill] sm:$0xff] %v4586_v50 }
 0x683   : > { %v4592_v63 = vpop.permute.xlu0 %1834 }
 0x684   : > { %5588 = vst [vmem:[#allocation104_spill] sm:$0xff] %v4592_v63 }
 0x685   : > { %v4588_v47 = vpop.permute.xlu2 %1832 }
 0x686   : > { %5586 = vst [vmem:[#allocation102_spill] sm:$0xff] %v4588_v47 }
 0x68d   : > { %v4590_v48 = vpop.permute.xlu2 %1838 }
 0x68e   : > { %5587 = vst [vmem:[#allocation103_spill] sm:$0xff] %v4590_v48 }
 0x694   : > { %v4594_v39 = vpop.permute.xlu1 %1830 }
 0x695   : > { %5589 = vst [vmem:[#allocation105_spill] sm:$0xff] %v4594_v39  ;;  %v1859_v0 = vpop.permute.xlu2 %1858 }
 0x696   : > { %v1873_v36 = vmul.f32 %v1859_v0, %v3964_v30  ;;  %v1874_v25 = vmul.f32 %v1859_v0, %v3952_v18 }
 0x698   : > { %1891 = vrot.lane.b32.xlu2 %v1874_v25, %s3617_s18  ;;  %1889 = vrot.lane.b32.xlu1 %v1873_v36, %s3617_s18 }
 0x69c   : > { %v4598_v2 = vpop.permute.xlu1 %1836  ;;  %v4600_v9 = vpop.permute.xlu0 %1840 }
 0x69d   : > { %5590 = vst [vmem:[#allocation106_spill] sm:$0xff] %v4598_v2  ;;  %v1871_v39 = vpop.permute.xlu2 %1870 }
 0x69e   : > { %v1879_v36 = vmul.f32 %v1871_v39, %v4132_v5  ;;  %v1880_v2 = vmul.f32 %v1871_v39, %v4116_v12 }
 0x6a4   : > { %v4602_v47 = vpop.permute.xlu1 %1842  ;;  %v1863_v50 = vpop.permute.xlu0 %1862 }
 0x6a5   : > { %v1875_v6 = vmul.f32 %v1863_v50, %v3998_v51  ;;  %v1876_v63 = vmul.f32 %v1863_v50, %v3985_v44 }
 0x6a7   : > { %1893 = vrot.lane.b32.xlu0 %v1875_v6, %s3617_s18  ;;  %1895 = vrot.lane.b32.xlu1 %v1876_v63, %s3617_s18 }
 0x6ac   : > { %v1867_v48 = vpop.permute.xlu1 %1866 }
 0x6ad   : > { %v1877_v0 = vmul.f32 %v1867_v48, %v4046_v23  ;;  %v1878_v25 = vmul.f32 %v1867_v48, %v4062_v33  ;;  %v3618_v48 = vmov 20  }
 0x6af   : > { %1899 = vrot.lane.b32.xlu0 %v1878_v25, %s3617_s18  ;;  %1897 = vrot.lane.b32.xlu2 %v1877_v0, %s3617_s18 }
 0x6b0   : > { %1901 = vrot.lane.b32.xlu1 %v1879_v36, %s3617_s18 }
 0x6b7   : > { %1919 = vperm.xlu0 %3514, %v3860_v40   ;;  %1903 = vrot.lane.b32.xlu2 %v1880_v2, %s3617_s18 }
 0x6b8   : > { %1923 = vperm.xlu1 %3515, %v3877_v52  }
 0x6bf   : > { %1927 = vperm.xlu2 %3516, %v3897_v59   ;;  %3519 = vset.pattern.permute.xlu0 %v3618_v48 }
 0x6c0   : > { %1931 = vperm.xlu1 %3515, %v3929_v8  }
 0x6c7   : > { %3518 = vset.pattern.permute.xlu2 %v3618_v48 }
 0x6c8   : > { %3517 = vset.pattern.permute.xlu1 %v3618_v48 }
 0x6f2   : > { %v4616_v63 = vpop.permute.xlu2 %1891 }
 0x6f3   : > { %5592 = vst [vmem:[#allocation108_spill] sm:$0xff] %v4616_v63 }
 0x709   : > { %v4622_v0 = vpop.permute.xlu2 %1897 }
 0x70a   : > { %v4614_v50 = vpop.permute.xlu1 %1889  ;;  %5595 = vst [vmem:[#allocation111_spill] sm:$0xff] %v4622_v0 }
 0x70b   : > { %5591 = vst [vmem:[#allocation107_spill] sm:$0xff] %v4614_v50 }
 0x711   : > { %v4628_v36 = vpop.permute.xlu2 %1903 }
 0x719   : > { %v4618_v6 = vpop.permute.xlu0 %1893  ;;  %v4620_v39 = vpop.permute.xlu1 %1895 }
 0x71a   : > { %5593 = vst [vmem:[#allocation109_spill] sm:$0xff] %v4618_v6  ;;  %v1928_v6 = vpop.permute.xlu2 %1927 }
 0x71b   : > { %5594 = vst [vmem:[#allocation110_spill] sm:$0xff] %v4620_v39  ;;  %v1938_v39 = vmul.f32 %v1928_v6, %v4046_v23 }
 0x721   : > { %v4624_v2 = vpop.permute.xlu0 %1899 }
 0x722   : > { %5596 = vst [vmem:[#allocation112_spill] sm:$0xff] %v4624_v2  ;;  %v4626_v25 = vpop.permute.xlu1 %1901  ;;  %v1939_v2 = vmul.f32 %v1928_v6, %v4062_v33  ;;  %v3620_v6 = vmov 21  }
 0x729   : > { %v1920_v20 = vpop.permute.xlu0 %1919 }
 0x72a   : > { %v1934_v50 = vmul.f32 %v1920_v20, %v3964_v30  ;;  %v1935_v63 = vmul.f32 %v1920_v20, %v3952_v18  ;;  %v1924_v42 = vpop.permute.xlu1 %1923 }
 0x72b   : > { %v1936_v48 = vmul.f32 %v1924_v42, %v3998_v51  ;;  %v1937_v0 = vmul.f32 %v1924_v42, %v3985_v44 }
 0x72c   : > { %1952 = vrot.lane.b32.xlu0 %v1935_v63, %s3619_s19  ;;  %1950 = vrot.lane.b32.xlu2 %v1934_v50, %s3619_s19 }
 0x72d   : > { %1954 = vrot.lane.b32.xlu1 %v1936_v48, %s3619_s19 }
 0x732   : > { %v1932_v14 = vpop.permute.xlu1 %1931 }
 0x733   : > { %v1940_v20 = vmul.f32 %v1932_v14, %v4132_v5  ;;  %v1941_v16 = vmul.f32 %v1932_v14, %v4116_v12 }
 0x734   : > { %1956 = vrot.lane.b32.xlu2 %v1937_v0, %s3619_s19  ;;  %1958 = vrot.lane.b32.xlu0 %v1938_v39, %s3619_s19 }
 0x735   : > { %1960 = vrot.lane.b32.xlu1 %v1939_v2, %s3619_s19 }
 0x73c   : > { %1962 = vrot.lane.b32.xlu2 %v1940_v20, %s3619_s19  ;;  %1964 = vrot.lane.b32.xlu0 %v1941_v16, %s3619_s19 }
 0x73d   : > { %1980 = vperm.xlu1 %3517, %v3860_v40  }
 0x744   : > { %1984 = vperm.xlu2 %3518, %v3877_v52   ;;  %1988 = vperm.xlu0 %3519, %v3897_v59  }
 0x745   : > { %1992 = vperm.xlu1 %3517, %v3929_v8  }
 0x74c   : > { %3521 = vset.pattern.permute.xlu0 %v3620_v6  ;;  %3520 = vset.pattern.permute.xlu2 %v3620_v6 }
 0x74d   : > { %3522 = vset.pattern.permute.xlu1 %v3620_v6 }
 0x786   : > { %v4642_v42 = vpop.permute.xlu2 %1950 }
 0x787   : > { %5597 = vst [vmem:[#allocation113_spill] sm:$0xff] %v4642_v42 }
 0x78e   : > { %v4644_v50 = vpop.permute.xlu2 %1956 }
 0x78f   : > { %5598 = vst [vmem:[#allocation114_spill] sm:$0xff] %v4644_v50 }
 0x796   : > { %v4646_v63 = vpop.permute.xlu2 %1962 }
 0x79e   : > { %v4648_v14 = vpop.permute.xlu0 %1952  ;;  %v1985_v16 = vpop.permute.xlu2 %1984 }
 0x79f   : > { %5599 = vst [vmem:[#allocation115_spill] sm:$0xff] %v4648_v14  ;;  %v4650_v39 = vpop.permute.xlu1 %1954  ;;  %v1998_v0 = vmul.f32 %v1985_v16, %v3985_v44 }
 0x7a0   : > { %5600 = vst [vmem:[#allocation116_spill] sm:$0xff] %v4650_v39 }
 0x7a1   : > { %2017 = vrot.lane.b32.xlu0 %v1998_v0, %s3621_s20  ;;  %v1997_v0 = vmul.f32 %v1985_v16, %v3998_v51  ;;  %v3622_v16 = vmov 22  }
 0x7a6   : > { %v4653_v2 = vpop.permute.xlu0 %1958 }
 0x7a7   : > { %5601 = vst [vmem:[#allocation117_spill] sm:$0xff] %v4653_v2  ;;  %v4655_v48 = vpop.permute.xlu1 %1960 }
 0x7a8   : > { %5602 = vst [vmem:[#allocation118_spill] sm:$0xff] %v4655_v48 }
 0x7ae   : > { %v4657_v20 = vpop.permute.xlu0 %1964 }
 0x7af   : > { %v1981_v50 = vpop.permute.xlu1 %1980 }
 0x7b0   : > { %v1995_v42 = vmul.f32 %v1981_v50, %v3964_v30  ;;  %v1996_v6 = vmul.f32 %v1981_v50, %v3952_v18 }
 0x7b2   : > { %2013 = vrot.lane.b32.xlu1 %v1996_v6, %s3621_s20  ;;  %2011 = vrot.lane.b32.xlu2 %v1995_v42, %s3621_s20 }
 0x7b6   : > { %v1989_v14 = vpop.permute.xlu0 %1988 }
 0x7b7   : > { %v1993_v37 = vpop.permute.xlu1 %1992  ;;  %v1999_v39 = vmul.f32 %v1989_v14, %v4046_v23  ;;  %v2000_v48 = vmul.f32 %v1989_v14, %v4062_v33 }
 0x7b8   : > { %v2001_v11 = vmul.f32 %v1993_v37, %v4132_v5  ;;  %v2002_v2 = vmul.f32 %v1993_v37, %v4116_v12 }
 0x7ba   : > { %2019 = vrot.lane.b32.xlu1 %v1999_v39, %s3621_s20  ;;  %2023 = vrot.lane.b32.xlu0 %v2001_v11, %s3621_s20 }
 0x7bb   : > { %2015 = vrot.lane.b32.xlu2 %v1997_v0, %s3621_s20 }
 0x7c2   : > { %2025 = vrot.lane.b32.xlu1 %v2002_v2, %s3621_s20  ;;  %2045 = vperm.xlu0 %3521, %v3877_v52  }
 0x7c3   : > { %2021 = vrot.lane.b32.xlu2 %v2000_v48, %s3621_s20 }
 0x7ca   : > { %2049 = vperm.xlu1 %3522, %v3897_v59   ;;  %3523 = vset.pattern.permute.xlu0 %v3622_v16 }
 0x7cb   : > { %2041 = vperm.xlu2 %3520, %v3860_v40  }
 0x7d2   : > { %3524 = vset.pattern.permute.xlu1 %v3622_v16 }
 0x7d3   : > { %2053 = vperm.xlu2 %3520, %v3929_v8  }
 0x7db   : > { %3525 = vset.pattern.permute.xlu2 %v3622_v16 }
 0x80c   : > { %v4670_v42 = vpop.permute.xlu2 %2011 }
 0x80d   : > { %5603 = vst [vmem:[#allocation119_spill] sm:$0xff] %v4670_v42 }
 0x813   : > { %v4676_v37 = vpop.permute.xlu0 %2017 }
 0x814   : > { %5606 = vst [vmem:[#allocation122_spill] sm:$0xff] %v4676_v37 }
 0x815   : > { %v4672_v50 = vpop.permute.xlu2 %2015 }
 0x816   : > { %5604 = vst [vmem:[#allocation120_spill] sm:$0xff] %v4672_v50 }
 0x81d   : > { %v4674_v11 = vpop.permute.xlu2 %2021 }
 0x81e   : > { %5605 = vst [vmem:[#allocation121_spill] sm:$0xff] %v4674_v11 }
 0x824   : > { %v4678_v14 = vpop.permute.xlu1 %2013 }
 0x825   : > { %5607 = vst [vmem:[#allocation123_spill] sm:$0xff] %v4678_v14  ;;  %v2042_v39 = vpop.permute.xlu2 %2041 }
 0x826   : > { %v2056_v2 = vmul.f32 %v2042_v39, %v3964_v30  ;;  %v2057_v48 = vmul.f32 %v2042_v39, %v3952_v18 }
 0x828   : > { %2074 = vrot.lane.b32.xlu2 %v2057_v48, %s3623_s25  ;;  %2072 = vrot.lane.b32.xlu1 %v2056_v2, %s3623_s25 }
 0x82c   : > { %v4682_v6 = vpop.permute.xlu1 %2019  ;;  %v4684_v0 = vpop.permute.xlu0 %2023 }
 0x82d   : > { %5608 = vst [vmem:[#allocation124_spill] sm:$0xff] %v4682_v6  ;;  %v2054_v14 = vpop.permute.xlu2 %2053 }
 0x82e   : > { %v2062_v2 = vmul.f32 %v2054_v14, %v4132_v5  ;;  %v2063_v6 = vmul.f32 %v2054_v14, %v4116_v12 }
 0x834   : > { %v4686_v50 = vpop.permute.xlu1 %2025  ;;  %v2046_v42 = vpop.permute.xlu0 %2045 }
 0x835   : > { %v2058_v16 = vmul.f32 %v2046_v42, %v3998_v51  ;;  %v2059_v37 = vmul.f32 %v2046_v42, %v3985_v44 }
 0x837   : > { %2076 = vrot.lane.b32.xlu0 %v2058_v16, %s3623_s25  ;;  %2078 = vrot.lane.b32.xlu1 %v2059_v37, %s3623_s25 }
 0x83c   : > { %v2050_v11 = vpop.permute.xlu1 %2049 }
 0x83d   : > { %v2060_v39 = vmul.f32 %v2050_v11, %v4046_v23  ;;  %v2061_v48 = vmul.f32 %v2050_v11, %v4062_v33  ;;  %v3624_v11 = vmov 23  }
 0x83f   : > { %2082 = vrot.lane.b32.xlu0 %v2061_v48, %s3623_s25  ;;  %2080 = vrot.lane.b32.xlu2 %v2060_v39, %s3623_s25 }
 0x840   : > { %2084 = vrot.lane.b32.xlu1 %v2062_v2, %s3623_s25 }
 0x847   : > { %2102 = vperm.xlu0 %3523, %v3860_v40   ;;  %2086 = vrot.lane.b32.xlu2 %v2063_v6, %s3623_s25 }
 0x848   : > { %2106 = vperm.xlu1 %3524, %v3877_v52  }
 0x84f   : > { %2110 = vperm.xlu2 %3525, %v3897_v59   ;;  %3528 = vset.pattern.permute.xlu0 %v3624_v11 }
 0x850   : > { %2114 = vperm.xlu1 %3524, %v3929_v8  }
 0x857   : > { %3527 = vset.pattern.permute.xlu2 %v3624_v11 }
 0x858   : > { %3526 = vset.pattern.permute.xlu1 %v3624_v11 }
 0x882   : > { %v4700_v37 = vpop.permute.xlu2 %2074 }
 0x883   : > { %5610 = vst [vmem:[#allocation126_spill] sm:$0xff] %v4700_v37 }
 0x899   : > { %v4706_v39 = vpop.permute.xlu2 %2080 }
 0x89a   : > { %v4698_v42 = vpop.permute.xlu1 %2072  ;;  %5613 = vst [vmem:[#allocation129_spill] sm:$0xff] %v4706_v39 }
 0x89b   : > { %5609 = vst [vmem:[#allocation125_spill] sm:$0xff] %v4698_v42 }
 0x8a1   : > { %v4712_v2 = vpop.permute.xlu2 %2086 }
 0x8a2   : > { %5616 = vst [vmem:[#allocation132_spill] sm:$0xff] %v4712_v2 }
 0x8a9   : > { %v4702_v16 = vpop.permute.xlu0 %2076  ;;  %v4704_v14 = vpop.permute.xlu1 %2078 }
 0x8aa   : > { %5611 = vst [vmem:[#allocation127_spill] sm:$0xff] %v4702_v16  ;;  %v2111_v16 = vpop.permute.xlu2 %2110 }
 0x8ab   : > { %5612 = vst [vmem:[#allocation128_spill] sm:$0xff] %v4704_v14  ;;  %v2121_v14 = vmul.f32 %v2111_v16, %v4046_v23 }
 0x8b1   : > { %v4708_v6 = vpop.permute.xlu0 %2082 }
 0x8b2   : > { %5614 = vst [vmem:[#allocation130_spill] sm:$0xff] %v4708_v6  ;;  %v4710_v48 = vpop.permute.xlu1 %2084  ;;  %v2122_v6 = vmul.f32 %v2111_v16, %v4062_v33  ;;  %v3626_v16 = vmov 24  }
 0x8b3   : > { %5615 = vst [vmem:[#allocation131_spill] sm:$0xff] %v4710_v48 }
 0x8b9   : > { %v2103_v54 = vpop.permute.xlu0 %2102 }
 0x8ba   : > { %v2117_v42 = vmul.f32 %v2103_v54, %v3964_v30  ;;  %v2118_v37 = vmul.f32 %v2103_v54, %v3952_v18  ;;  %v2107_v41 = vpop.permute.xlu1 %2106 }
 0x8bb   : > { %v2119_v11 = vmul.f32 %v2107_v41, %v3998_v51  ;;  %v2120_v39 = vmul.f32 %v2107_v41, %v3985_v44 }
 0x8bc   : > { %2135 = vrot.lane.b32.xlu0 %v2118_v37, %s3625_s21  ;;  %2133 = vrot.lane.b32.xlu2 %v2117_v42, %s3625_s21 }
 0x8bd   : > { %2137 = vrot.lane.b32.xlu1 %v2119_v11, %s3625_s21 }
 0x8c2   : > { %v2115_v48 = vpop.permute.xlu1 %2114 }
 0x8c3   : > { %v2123_v54 = vmul.f32 %v2115_v48, %v4132_v5  ;;  %v2124_v2 = vmul.f32 %v2115_v48, %v4116_v12 }
 0x8c4   : > { %2139 = vrot.lane.b32.xlu2 %v2120_v39, %s3625_s21  ;;  %2141 = vrot.lane.b32.xlu0 %v2121_v14, %s3625_s21 }
 0x8c5   : > { %2143 = vrot.lane.b32.xlu1 %v2122_v6, %s3625_s21 }
 0x8cc   : > { %2145 = vrot.lane.b32.xlu2 %v2123_v54, %s3625_s21  ;;  %2147 = vrot.lane.b32.xlu0 %v2124_v2, %s3625_s21  ;;  %s3366_s21 = smul.u32 24, %s5795_s14 }
 0x8cd   : > { %2163 = vperm.xlu1 %3526, %v3860_v40  }
 0x8d4   : > { %2167 = vperm.xlu2 %3527, %v3877_v52   ;;  %2171 = vperm.xlu0 %3528, %v3897_v59  }
 0x8d5   : > { %2175 = vperm.xlu1 %3526, %v3929_v8  }
 0x8dc   : > { %3530 = vset.pattern.permute.xlu0 %v3626_v16  ;;  %3529 = vset.pattern.permute.xlu2 %v3626_v16 }
 0x8dd   : > { %3531 = vset.pattern.permute.xlu1 %v3626_v16 }
 0x916   : > { %v4726_v41 = vpop.permute.xlu2 %2133 }
 0x917   : > { %5617 = vst [vmem:[#allocation133_spill] sm:$0xff] %v4726_v41 }
 0x91e   : > { %v4728_v42 = vpop.permute.xlu2 %2139 }
 0x91f   : > { %5618 = vst [vmem:[#allocation134_spill] sm:$0xff] %v4728_v42 }
 0x926   : > { %v4730_v37 = vpop.permute.xlu2 %2145 }
 0x927   : > { %5619 = vst [vmem:[#allocation135_spill] sm:$0xff] %v4730_v37 }
 0x92e   : > { %v4732_v14 = vpop.permute.xlu0 %2135  ;;  %v2168_v39 = vpop.permute.xlu2 %2167 }
 0x92f   : > { %5620 = vst [vmem:[#allocation136_spill] sm:$0xff] %v4732_v14  ;;  %v4734_v6 = vpop.permute.xlu1 %2137  ;;  %v2181_v48 = vmul.f32 %v2168_v39, %v3985_v44 }
 0x930   : > { %5621 = vst [vmem:[#allocation137_spill] sm:$0xff] %v4734_v6 }
 0x931   : > { %2200 = vrot.lane.b32.xlu0 %v2181_v48, %s3627_s12  ;;  %v2180_v48 = vmul.f32 %v2168_v39, %v3998_v51 }
 0x936   : > { %v4737_v2 = vpop.permute.xlu0 %2141 }
 0x937   : > { %5622 = vst [vmem:[#allocation138_spill] sm:$0xff] %v4737_v2  ;;  %v4739_v11 = vpop.permute.xlu1 %2143 }
 0x938   : > { %5623 = vst [vmem:[#allocation139_spill] sm:$0xff] %v4739_v11 }
 0x93e   : > { %v4741_v54 = vpop.permute.xlu0 %2147 }
 0x93f   : > { %v2164_v42 = vpop.permute.xlu1 %2163 }
 0x940   : > { %v2178_v41 = vmul.f32 %v2164_v42, %v3964_v30  ;;  %v2179_v16 = vmul.f32 %v2164_v42, %v3952_v18  ;;  %v933_v42 = vsel %vm929_vm2, %v4315_v19, %v4350_v28  ;;  %v1116_v28 = vsel %vm1112_vm5, %v4328_v60, %v4362_v3 }
 0x941   : > { %v1238_v19 = vsel %vm1234_vm7, %v4360_v22, %v4334_v43  ;;  %v1421_v60 = vsel %vm5482_vm10, %v4394_v10, %v4405_v34  ;;  %v1482_v22 = vsel %vm5483_vm11, %v4432_v29, %v4434_v62  ;;  %v1665_v10 = vsel %vm5473_vm14, %v4516_v26, %v4518_v7 }
 0x942   : > { %2196 = vrot.lane.b32.xlu1 %v2179_v16, %s3627_s12  ;;  %2194 = vrot.lane.b32.xlu2 %v2178_v41, %s3627_s12  ;;  %v815_v41 = vmul.f32 %v4058_v32, %v4132_v5  ;;  %v1055_v32 = vsel %vm1051_vm4, %v4348_v35, %v4322_v57  ;;  %v1299_v35 = vsel %vm5480_vm8, %v4340_v58, %v4370_v13  ;;  %v3628_v62 = vmov 25  }
 0x943   : > { %v1543_v13 = vsel %vm5485_vm12, %v4458_v55, %v4460_v31  ;;  %v1726_v55 = vsel %vm5474_vm15, %v4542_v15, %v4544_v49  ;;  %vm5477_vm14 = vcmask 777216   ;;  %vm5478_vm15 = vcmask 703488  }
 0x944   : > { %v1848_v15 = vsel %vm5477_vm14, %v4600_v9, %v4602_v47  ;;  %vm2088_vm14 = vcmask 678912  }
 0x946   : > { %v2172_v14 = vpop.permute.xlu0 %2171 }
 0x947   : > { %v2176_v37 = vpop.permute.xlu1 %2175  ;;  %v2182_v6 = vmul.f32 %v2172_v14, %v4046_v23  ;;  %v2183_v11 = vmul.f32 %v2172_v14, %v4062_v33  ;;  %v994_v14 = vsel %vm990_vm3, %v4356_v45, %v4342_v53  ;;  %v1177_v45 = vsel %vm5484_vm6, %v4366_v4, %v4354_v21 }
 0x948   : > { %v2184_v44 = vmul.f32 %v2176_v37, %v4132_v5  ;;  %v2185_v2 = vmul.f32 %v2176_v37, %v4116_v12  ;;  %v1360_v4 = vsel %vm5481_vm9, %v4379_v17, %v4372_v56  ;;  %v1604_v17 = vsel %vm5476_vm13, %v4478_v27, %v4489_v24 }
 0x949   : > { %v1787_v24 = vsel %vm5475_vm0, %v4562_v1, %v4573_v46  ;;  %v1909_v1 = vsel %vm5478_vm15, %v4626_v25, %v4628_v36  ;;  %vm5479_vm0 = vcmask 695296   ;;  %vm2027_vm13 = vcmask 687104  }
 0x94a   : > { %2202 = vrot.lane.b32.xlu1 %v2182_v6, %s3627_s12  ;;  %2206 = vrot.lane.b32.xlu0 %v2184_v44, %s3627_s12  ;;  %v872_v44 = vsel %vm868_vm1, %v4336_v38, %v4307_v61  ;;  %vm2149_vm15 = vcmask 670720  }
 0x94b   : > { %2198 = vrot.lane.b32.xlu2 %v2180_v48, %s3627_s12  ;;  %v880_v37 = vadd.f32 %v872_v44, %v815_v41  ;;  %v1970_v41 = vsel %vm5479_vm0, %v4646_v63, %v4657_v20  ;;  %vm2210_vm0 = vcmask 662528  }
 0x94d   : > { %v941_v39 = vadd.f32 %v933_v42, %v880_v37  ;;  %v2031_v37 = vsel %vm2027_vm13, %v4684_v0, %v4686_v50  ;;  %v5627_v0 = vld [vmem:[#allocation3_spill] sm:$0xff] }
 0x94f   : > { %v1002_v6 = vadd.f32 %v994_v14, %v941_v39  ;;  %v5624_v39 = vld [vmem:[#allocation132_spill] sm:$0xff] }
 0x951   : > { %v1063_v38 = vadd.f32 %v1055_v32, %v1002_v6  ;;  %v5625_v6 = vld [vmem:[#allocation131_spill] sm:$0xff] }
 0x952   : > { %2208 = vrot.lane.b32.xlu1 %v2185_v2, %s3627_s12  ;;  %2228 = vperm.xlu0 %3530, %v3877_v52   ;;  %v2092_v25 = vsel %vm2088_vm14, %v5625_v6, %v5624_v39  ;;  %v5626_v32 = vld [vmem:[#allocation135_spill] sm:$0xff]  ;;  %v5642_v39 = vld [vmem:[#allocation40_spill] sm:$0xff] }
 0x953   : > { %2204 = vrot.lane.b32.xlu2 %v2183_v11, %s3627_s12  ;;  %v1124_v53 = vadd.f32 %v1116_v28, %v1063_v38  ;;  %v2153_v63 = vsel %vm2149_vm15, %v5626_v32, %v4741_v54  ;;  %v5644_v32 = vld [vmem:[#allocation52_spill] sm:$0xff] }
 0x955   : > { %v1185_v61 = vadd.f32 %v1177_v45, %v1124_v53 }
 0x957   : > { %v1246_v3 = vadd.f32 %v1238_v19, %v1185_v61 }
 0x959   : > { %v1307_v21 = vadd.f32 %v1299_v35, %v1246_v3 }
 0x95a   : > { %2232 = vperm.xlu1 %3531, %v3897_v59   ;;  %3532 = vset.pattern.permute.xlu0 %v3628_v62 }
 0x95b   : > { %2224 = vperm.xlu2 %3529, %v3860_v40   ;;  %v1368_v11 = vadd.f32 %v1360_v4, %v1307_v21 }
 0x95d   : > { %v1429_v58 = vadd.f32 %v1421_v60, %v1368_v11  ;;  %v5628_v11 = vld [vmem:[#allocation44_spill] sm:$0xff] }
 0x95f   : > { %v1490_v56 = vadd.f32 %v1482_v22, %v1429_v58  ;;  %v5629_v22 = vld [vmem:[#allocation28_spill] sm:$0xff] }
 0x960   : > { %v871_v58 = vsel %vm868_vm1, %v5629_v22, %v5628_v11  ;;  %v5651_v11 = vld [vmem:[#allocation76_spill] sm:$0xff]  ;;  %v5652_v22 = vld [vmem:[#allocation75_spill] sm:$0xff] }
 0x961   : > { %v1551_v34 = vadd.f32 %v1543_v13, %v1490_v56  ;;  %v5630_v13 = vld [vmem:[#allocation4_spill] sm:$0xff] }
 0x962   : > { %3533 = vset.pattern.permute.xlu1 %v3628_v62  ;;  %v814_v56 = vmul.f32 %v5630_v13, %v4046_v23 }
 0x963   : > { %2236 = vperm.xlu2 %3529, %v3929_v8   ;;  %v1612_v29 = vadd.f32 %v1604_v17, %v1551_v34  ;;  %v5631_v17 = vld [vmem:[#allocation41_spill] sm:$0xff]  ;;  %v5632_v34 = vld [vmem:[#allocation46_spill] sm:$0xff] }
 0x965   : > { %v1673_v31 = vadd.f32 %v1665_v10, %v1612_v29  ;;  %v932_v10 = vsel %vm929_vm2, %v5632_v34, %v5631_v17  ;;  %v5654_v17 = vld [vmem:[#allocation81_spill] sm:$0xff] }
 0x967   : > { %v1734_v26 = vadd.f32 %v1726_v55, %v1673_v31  ;;  %v5633_v55 = vld [vmem:[#allocation31_spill] sm:$0xff] }
 0x968   : > { %v5634_v31 = vld [vmem:[#allocation43_spill] sm:$0xff] }
 0x969   : > { %v1795_v49 = vadd.f32 %v1787_v24, %v1734_v26  ;;  %v993_v24 = vsel %vm990_vm3, %v5634_v31, %v5633_v55  ;;  %v5636_v26 = vld [vmem:[#allocation34_spill] sm:$0xff] }
 0x96b   : > { %3534 = vset.pattern.permute.xlu2 %v3628_v62  ;;  %v1856_v46 = vadd.f32 %v1848_v15, %v1795_v49  ;;  %v879_v62 = vadd.f32 %v871_v58, %v814_v56  ;;  %v5637_v15 = vld [vmem:[#allocation45_spill] sm:$0xff]  ;;  %v5638_v49 = vld [vmem:[#allocation50_spill] sm:$0xff]  ;;  %v1542_v58 = vsel %vm5485_vm12, %v5652_v22, %v5651_v11  ;;  %v5678_v22 = vld [vmem:[#allocation139_spill] sm:$0xff] }
 0x96c   : > { %v5653_v56 = vld [vmem:[#allocation82_spill] sm:$0xff] }
 0x96d   : > { %v1917_v42 = vadd.f32 %v1909_v1, %v1856_v46  ;;  %v940_v29 = vadd.f32 %v932_v10, %v879_v62  ;;  %v1115_v1 = vsel %vm1112_vm5, %v5638_v49, %v5637_v15  ;;  %v5656_v62 = vld [vmem:[#allocation85_spill] sm:$0xff]  ;;  %v5663_v15 = vld [vmem:[#allocation99_spill] sm:$0xff] }
 0x96f   : > { %v1978_v14 = vadd.f32 %v1970_v41, %v1917_v42  ;;  %v5639_v42 = vld [vmem:[#allocation37_spill] sm:$0xff] }
 0x971   : > { %v2039_v36 = vadd.f32 %v2031_v37, %v1978_v14  ;;  %v5641_v14 = vld [vmem:[#allocation51_spill] sm:$0xff] }
 0x972   : > { %v1237_v6 = vsel %vm1234_vm7, %v5642_v39, %v5641_v14  ;;  %v5668_v39 = vld [vmem:[#allocation112_spill] sm:$0xff] }
 0x973   : > { %v2100_v20 = vadd.f32 %v2092_v25, %v2039_v36  ;;  %v5643_v36 = vld [vmem:[#allocation49_spill] sm:$0xff] }
 0x975   : > { %v2161_v28 = vadd.f32 %v2153_v63, %v2100_v20  ;;  %v1298_v63 = vsel %vm5480_vm8, %v5644_v32, %v5643_v36  ;;  %vm5655_vm8 = vcmask 809984   ;;  %v5671_v32 = vld [vmem:[#allocation118_spill] sm:$0xff] }
 0x976   : > { %v1603_v34 = vsel %vm5655_vm8, %v5654_v17, %v5653_v56  ;;  %vm5667_vm8 = vcmask 777216  }
 0x99c   : > { %v4765_v2 = vpop.permute.xlu2 %2194 }
 0x9a3   : > { %v4807_v16 = vpop.permute.xlu0 %2200 }
 0x9a5   : > { %v4782_v57 = vpop.permute.xlu2 %2198 }
 0x9ad   : > { %v4796_v43 = vpop.permute.xlu2 %2204 }
 0x9b4   : > { %v4809_v27 = vpop.permute.xlu1 %2196 }
 0x9b5   : > { %v2225_v7 = vpop.permute.xlu2 %2224 }
 0x9b6   : > { %v2239_v48 = vmul.f32 %v2225_v7, %v3964_v30  ;;  %v2240_v44 = vmul.f32 %v2225_v7, %v3952_v18  ;;  %v5635_v7 = vld [vmem:[#allocation48_spill] sm:$0xff] }
 0x9b8   : > { %2257 = vrot.lane.b32.xlu2 %v2240_v44, %s3629_s22  ;;  %2255 = vrot.lane.b32.xlu1 %v2239_v48, %s3629_s22  ;;  %v1054_v48 = vsel %vm1051_vm4, %v5636_v26, %v5635_v7  ;;  %v1001_v44 = vadd.f32 %v993_v24, %v940_v29  ;;  %v5657_v29 = vld [vmem:[#allocation88_spill] sm:$0xff]  ;;  %v5659_v24 = vld [vmem:[#allocation94_spill] sm:$0xff]  ;;  %v5660_v7 = vld [vmem:[#allocation93_spill] sm:$0xff] }
 0x9ba   : > { %v1062_v46 = vadd.f32 %v1054_v48, %v1001_v44  ;;  %v5662_v44 = vld [vmem:[#allocation100_spill] sm:$0xff] }
 0x9bc   : > { %v4827_v47 = vpop.permute.xlu1 %2202  ;;  %v2207_v9 = vpop.permute.xlu0 %2206  ;;  %v1123_v41 = vadd.f32 %v1115_v1, %v1062_v46 }
 0x9bd   : > { %v2237_v35 = vpop.permute.xlu2 %2236  ;;  %v2213_v17 = vsel %vm2210_vm0, %v4827_v47, %v4796_v43 }
 0x9be   : > { %v2245_v21 = vmul.f32 %v2237_v35, %v4132_v5  ;;  %v2246_v60 = vmul.f32 %v2237_v35, %v4116_v12 }
 0x9c4   : > { %v2209_v38 = vpop.permute.xlu1 %2208  ;;  %v2229_v45 = vpop.permute.xlu0 %2228 }
 0x9c5   : > { %v2214_v53 = vsel %vm2210_vm0, %v2207_v9, %v2209_v38  ;;  %v2241_v50 = vmul.f32 %v2229_v45, %v3998_v51  ;;  %v2242_v61 = vmul.f32 %v2229_v45, %v5627_v0  ;;  %v5640_v9 = vld [vmem:[#allocation47_spill] sm:$0xff]  ;;  %v5646_v38 = vld [vmem:[#allocation56_spill] sm:$0xff] }
 0x9c6   : > { %v4841_v19 = vadd.f32 %v2214_v53, %v2161_v28  ;;  %v1176_v37 = vsel %vm5484_vm6, %v5640_v9, %v5639_v42  ;;  %v5645_v28 = vld [vmem:[#allocation54_spill] sm:$0xff] }
 0x9c7   : > { %2259 = vrot.lane.b32.xlu0 %v2241_v50, %s3629_s22  ;;  %2261 = vrot.lane.b32.xlu1 %v2242_v61, %s3629_s22  ;;  %v1184_v25 = vadd.f32 %v1176_v37, %v1123_v41  ;;  %v1359_v45 = vsel %vm5481_vm9, %v5646_v38, %v5645_v28  ;;  %v5647_v50 = vld [vmem:[#allocation64_spill] sm:$0xff]  ;;  %v5648_v61 = vld [vmem:[#allocation63_spill] sm:$0xff]  ;;  %vm5658_vm9 = vcmask 801792   ;;  %v5666_v42 = vld [vmem:[#allocation106_spill] sm:$0xff]  ;;  %v3630_v28 = vmov 26  }
 0x9c8   : > { %v1420_v35 = vsel %vm5482_vm10, %v5648_v61, %v5647_v50  ;;  %v1664_v55 = vsel %vm5658_vm9, %v5657_v29, %v5656_v62  ;;  %vm5661_vm10 = vcmask 793600   ;;  %v5665_v41 = vld [vmem:[#allocation103_spill] sm:$0xff]  ;;  %vm5670_vm9 = vcmask 703488  }
 0x9c9   : > { %v1245_v20 = vadd.f32 %v1237_v6, %v1184_v25  ;;  %v1725_v26 = vsel %vm5661_vm10, %v5660_v7, %v5659_v24  ;;  %v1847_v9 = vsel %vm5667_vm8, %v5666_v42, %v5665_v41  ;;  %v5669_v6 = vld [vmem:[#allocation111_spill] sm:$0xff]  ;;  %vm5673_vm10 = vcmask 695296  }
 0x9ca   : > { %v1908_v25 = vsel %vm5670_vm9, %v5669_v6, %v5668_v39  ;;  %vm2332_vm8 = vcmask 580608   ;;  %vm5697_vm9 = vcmask 916480  }
 0x9cb   : > { %v1306_v53 = vadd.f32 %v1298_v63, %v1245_v20  ;;  %v5672_v63 = vld [vmem:[#allocation117_spill] sm:$0xff] }
 0x9cc   : > { %v2233_v3 = vpop.permute.xlu1 %2232  ;;  %v1969_v20 = vsel %vm5673_vm10, %v5672_v63, %v5671_v32  ;;  %vm5700_vm10 = vcmask 908288  }
 0x9cd   : > { %v2243_v54 = vmul.f32 %v2233_v3, %v4046_v23  ;;  %v2244_v4 = vmul.f32 %v2233_v3, %v4062_v33  ;;  %v1367_v3 = vadd.f32 %v1359_v45, %v1306_v53  ;;  %v5674_v45 = vld [vmem:[#allocation121_spill] sm:$0xff]  ;;  %v5675_v53 = vld [vmem:[#allocation124_spill] sm:$0xff] }
 0x9ce   : > { %v2030_v50 = vsel %vm2027_vm13, %v5675_v53, %v5674_v45 }
 0x9cf   : > { %2265 = vrot.lane.b32.xlu0 %v2244_v4, %s3629_s22  ;;  %2263 = vrot.lane.b32.xlu2 %v2243_v54, %s3629_s22  ;;  %v5649_v54 = vld [vmem:[#allocation67_spill] sm:$0xff]  ;;  %v5650_v4 = vld [vmem:[#allocation70_spill] sm:$0xff] }
 0x9d0   : > { %2267 = vrot.lane.b32.xlu1 %v2245_v21, %s3629_s22  ;;  %v1481_v21 = vsel %vm5483_vm11, %v5650_v4, %v5649_v54  ;;  %vm5664_vm11 = vcmask 785408   ;;  %v5676_v54 = vld [vmem:[#allocation130_spill] sm:$0xff]  ;;  %v5677_v4 = vld [vmem:[#allocation129_spill] sm:$0xff] }
 0x9d1   : > { %v1786_v49 = vsel %vm5664_vm11, %v5663_v15, %v5662_v44  ;;  %vm2271_vm11 = vcmask 588800  }
 0x9d7   : > { %2285 = vperm.xlu0 %3532, %v3860_v40   ;;  %2269 = vrot.lane.b32.xlu2 %v2246_v60, %s3629_s22  ;;  %v1428_v60 = vadd.f32 %v1420_v35, %v1367_v3 }
 0x9d8   : > { %2289 = vperm.xlu1 %3533, %v3877_v52  }
 0x9d9   : > { %v1489_v13 = vadd.f32 %v1481_v21, %v1428_v60  ;;  %v2091_v21 = vsel %vm2088_vm14, %v5677_v4, %v5676_v54 }
 0x9db   : > { %v1550_v10 = vadd.f32 %v1542_v58, %v1489_v13  ;;  %v5679_v58 = vld [vmem:[#allocation138_spill] sm:$0xff] }
 0x9dc   : > { %v2152_v13 = vsel %vm2149_vm15, %v5679_v58, %v5678_v22 }
 0x9dd   : > { %v1611_v31 = vadd.f32 %v1603_v34, %v1550_v10 }
 0x9df   : > { %2293 = vperm.xlu2 %3534, %v3897_v59   ;;  %v1672_v48 = vadd.f32 %v1664_v55, %v1611_v31  ;;  %3537 = vset.pattern.permute.xlu0 %v3630_v28 }
 0x9e0   : > { %2297 = vperm.xlu1 %3533, %v3929_v8  }
 0x9e1   : > { %v1733_v1 = vadd.f32 %v1725_v26, %v1672_v48 }
 0x9e3   : > { %v1794_v37 = vadd.f32 %v1786_v49, %v1733_v1 }
 0x9e5   : > { %v1855_v36 = vadd.f32 %v1847_v9, %v1794_v37 }
 0x9e7   : > { %v1916_v38 = vadd.f32 %v1908_v25, %v1855_v36  ;;  %3536 = vset.pattern.permute.xlu2 %v3630_v28  ;;  %v3632_v25 = vmov 27  }
 0x9e8   : > { %3535 = vset.pattern.permute.xlu1 %v3630_v28 }
 0x9e9   : > { %v1977_v61 = vadd.f32 %v1969_v20, %v1916_v38 }
 0x9eb   : > { %v2038_v60 = vadd.f32 %v2030_v50, %v1977_v61 }
 0x9ed   : > { %v2099_v56 = vadd.f32 %v2091_v21, %v2038_v60 }
 0x9ef   : > { %v2160_v34 = vadd.f32 %v2152_v13, %v2099_v56 }
 0x9f1   : > { %v2221_v10 = vadd.f32 %v2213_v17, %v2160_v34 }
 0xa12   : > { %v4912_v14 = vpop.permute.xlu2 %2257 }
 0xa29   : > { %v2264_v11 = vpop.permute.xlu2 %2263 }
 0xa2a   : > { %v4907_v46 = vpop.permute.xlu1 %2255 }
 0xa31   : > { %v2270_v24 = vpop.permute.xlu2 %2269 }
 0xa39   : > { %v4923_v35 = vpop.permute.xlu0 %2259  ;;  %v4925_v3 = vpop.permute.xlu1 %2261 }
 0xa3a   : > { %v2294_v43 = vpop.permute.xlu2 %2293 }
 0xa3b   : > { %v2304_v47 = vmul.f32 %v2294_v43, %v4046_v23  ;;  %v2305_v1 = vmul.f32 %v2294_v43, %v4062_v33 }
 0xa41   : > { %v2266_v62 = vpop.permute.xlu0 %2265 }
 0xa42   : > { %v2274_v29 = vsel %vm2271_vm11, %v2264_v11, %v2266_v62  ;;  %v2268_v55 = vpop.permute.xlu1 %2267 }
 0xa43   : > { %v2282_v31 = vadd.f32 %v2274_v29, %v2221_v10  ;;  %v2275_v54 = vsel %vm2271_vm11, %v2268_v55, %v2270_v24  ;;  %v5680_v55 = vld [vmem:[#allocation7_spill] sm:$0xff] }
 0xa44   : > { %v2283_v4 = vadd.f32 %v2275_v54, %v4841_v19  ;;  %v5693_v54 = vld [vmem:[#allocation11_spill] sm:$0xff] }
 0xa49   : > { %v2286_v7 = vpop.permute.xlu0 %2285 }
 0xa4a   : > { %v2300_v26 = vmul.f32 %v2286_v7, %v3964_v30  ;;  %v2301_v48 = vmul.f32 %v2286_v7, %v3952_v18  ;;  %v2290_v44 = vpop.permute.xlu1 %2289  ;;  %v5682_v7 = vld [vmem:[#allocation2_spill] sm:$0xff] }
 0xa4b   : > { %v2302_v15 = vmul.f32 %v2290_v44, %v3998_v51  ;;  %v2303_v49 = vmul.f32 %v2290_v44, %v5627_v0  ;;  %v5684_v44 = vld [vmem:[#allocation6_spill] sm:$0xff] }
 0xa4c   : > { %2318 = vrot.lane.b32.xlu0 %v2301_v48, %s3631_s23  ;;  %2316 = vrot.lane.b32.xlu2 %v2300_v26, %s3631_s23  ;;  %v812_v26 = vmul.f32 %v5682_v7, %v3964_v30  ;;  %v5683_v48 = vld [vmem:[#allocation15_spill] sm:$0xff] }
 0xa4d   : > { %2320 = vrot.lane.b32.xlu1 %v2302_v15, %s3631_s23  ;;  %v930_v15 = vsel %vm929_vm2, %v5684_v44, %v5683_v48  ;;  %v5707_v48 = vld [vmem:[#allocation72_spill] sm:$0xff]  ;;  %v5708_v44 = vld [vmem:[#allocation71_spill] sm:$0xff] }
 0xa52   : > { %v2298_v41 = vpop.permute.xlu1 %2297 }
 0xa53   : > { %v2306_v42 = vmul.f32 %v2298_v41, %v4132_v5  ;;  %v2307_v9 = vmul.f32 %v2298_v41, %v4116_v12 }
 0xa54   : > { %2322 = vrot.lane.b32.xlu2 %v2303_v49, %s3631_s23  ;;  %2324 = vrot.lane.b32.xlu0 %v2304_v47, %s3631_s23  ;;  %v5685_v47 = vld [vmem:[#allocation8_spill] sm:$0xff]  ;;  %v5686_v49 = vld [vmem:[#allocation18_spill] sm:$0xff] }
 0xa55   : > { %2326 = vrot.lane.b32.xlu1 %v2305_v1, %s3631_s23  ;;  %v991_v1 = vsel %vm990_vm3, %v5686_v49, %v5685_v47  ;;  %v5709_v47 = vld [vmem:[#allocation79_spill] sm:$0xff]  ;;  %v5710_v49 = vld [vmem:[#allocation77_spill] sm:$0xff] }
 0xa5c   : > { %2328 = vrot.lane.b32.xlu2 %v2306_v42, %s3631_s23  ;;  %2330 = vrot.lane.b32.xlu0 %v2307_v9, %s3631_s23  ;;  %v5687_v9 = vld [vmem:[#allocation9_spill] sm:$0xff]  ;;  %s379_s23 = scalar_lea.vmem %s5468_s10, %s3366_s21 }
 0xa5d   : > { %2346 = vperm.xlu1 %3535, %v3860_v40  }
 0xa64   : > { %2350 = vperm.xlu2 %3536, %v3877_v52   ;;  %2354 = vperm.xlu0 %3537, %v3897_v59  }
 0xa65   : > { %2358 = vperm.xlu1 %3535, %v3929_v8  }
 0xa6c   : > { %3539 = vset.pattern.permute.xlu0 %v3632_v25  ;;  %3538 = vset.pattern.permute.xlu2 %v3632_v25 }
 0xa6d   : > { %3540 = vset.pattern.permute.xlu1 %v3632_v25  ;;  %v5690_v25 = vld [vmem:[#allocation12_spill] sm:$0xff] }
 0xaa6   : > { %v2317_v37 = vpop.permute.xlu2 %2316 }
 0xaae   : > { %v2323_v39 = vpop.permute.xlu2 %2322 }
 0xab6   : > { %v2329_v6 = vpop.permute.xlu2 %2328 }
 0xabe   : > { %v2319_v36 = vpop.permute.xlu0 %2318  ;;  %v2351_v32 = vpop.permute.xlu2 %2350 }
 0xabf   : > { %v4950_v63 = vsel %vm2332_vm8, %v2317_v37, %v2319_v36  ;;  %v2321_v20 = vpop.permute.xlu1 %2320  ;;  %v2364_v28 = vmul.f32 %v2351_v32, %v5627_v0  ;;  %v2363_v19 = vmul.f32 %v2351_v32, %v3998_v51  ;;  %v5688_v37 = vld [vmem:[#allocation10_spill] sm:$0xff] }
 0xac0   : > { %v4954_v38 = vsel %vm2332_vm8, %v2321_v20, %v2323_v39  ;;  %v1052_v39 = vsel %vm1051_vm4, %v5688_v37, %v5687_v9  ;;  %v5691_v20 = vld [vmem:[#allocation14_spill] sm:$0xff]  ;;  %v5713_v9 = vld [vmem:[#allocation83_spill] sm:$0xff] }
 0xac1   : > { %2383 = vrot.lane.b32.xlu0 %v2364_v28, %s3633_s24  ;;  %v5692_v28 = vld [vmem:[#allocation24_spill] sm:$0xff] }
 0xac6   : > { %v2325_v45 = vpop.permute.xlu0 %2324 }
 0xac7   : > { %v2327_v53 = vpop.permute.xlu1 %2326 }
 0xac8   : > { %v2335_v50 = vsel %vm2332_vm8, %v2325_v45, %v2327_v53  ;;  %v1174_v45 = vsel %vm5484_vm6, %v5692_v28, %v5691_v20  ;;  %vm5706_vm6 = vcmask 891904   ;;  %v5718_v28 = vld [vmem:[#allocation97_spill] sm:$0xff] }
 0xac9   : > { %v4957_v61 = vadd.f32 %v2335_v50, %v2282_v31  ;;  %v5681_v31 = vld [vmem:[#allocation5_spill] sm:$0xff] }
 0xaca   : > { %v869_v24 = vsel %vm868_vm1, %v5681_v31, %v5680_v55  ;;  %v5704_v31 = vld [vmem:[#allocation69_spill] sm:$0xff] }
 0xacb   : > { %v877_v43 = vadd.f32 %v869_v24, %v812_v26  ;;  %v5705_v24 = vld [vmem:[#allocation65_spill] sm:$0xff] }
 0xacc   : > { %v1479_v7 = vsel %vm5706_vm6, %v5705_v24, %v5704_v31  ;;  %vm5717_vm6 = vcmask 793600   ;;  %v5730_v31 = vld [vmem:[#allocation123_spill] sm:$0xff] }
 0xacd   : > { %v938_v41 = vadd.f32 %v930_v15, %v877_v43  ;;  %v1540_v15 = vsel %vm5485_vm12, %v5708_v44, %v5707_v48  ;;  %vm2393_vm12 = vcmask 572416   ;;  %v5731_v24 = vld [vmem:[#allocation119_spill] sm:$0xff]  ;;  %v5732_v48 = vld [vmem:[#allocation126_spill] sm:$0xff]  ;;  %v5733_v44 = vld [vmem:[#allocation125_spill] sm:$0xff] }
 0xace   : > { %v2331_v21 = vpop.permute.xlu0 %2330 }
 0xacf   : > { %v2347_v60 = vpop.permute.xlu1 %2346  ;;  %v2336_v11 = vsel %vm2332_vm8, %v2329_v6, %v2331_v21  ;;  %v999_v42 = vadd.f32 %v991_v1, %v938_v41  ;;  %v5689_v6 = vld [vmem:[#allocation21_spill] sm:$0xff]  ;;  %vm5703_vm8 = vcmask 900096  }
 0xad0   : > { %v2361_v22 = vmul.f32 %v2347_v60, %v3964_v30  ;;  %v2362_v58 = vmul.f32 %v2347_v60, %v3952_v18  ;;  %v4964_v13 = vadd.f32 %v2336_v11, %v2283_v4  ;;  %v1113_v36 = vsel %vm1112_vm5, %v5690_v25, %v5689_v6  ;;  %v5694_v4 = vld [vmem:[#allocation17_spill] sm:$0xff]  ;;  %v5695_v60 = vld [vmem:[#allocation27_spill] sm:$0xff]  ;;  %v5696_v11 = vld [vmem:[#allocation20_spill] sm:$0xff] }
 0xad1   : > { %v1060_v32 = vadd.f32 %v1052_v39, %v999_v42  ;;  %v1235_v21 = vsel %vm1234_vm7, %v5694_v4, %v5693_v54  ;;  %v5712_v42 = vld [vmem:[#allocation87_spill] sm:$0xff]  ;;  %v5715_v25 = vld [vmem:[#allocation90_spill] sm:$0xff]  ;;  %v5721_v54 = vld [vmem:[#allocation105_spill] sm:$0xff] }
 0xad2   : > { %2379 = vrot.lane.b32.xlu1 %v2362_v58, %s3633_s24  ;;  %2377 = vrot.lane.b32.xlu2 %v2361_v22, %s3633_s24  ;;  %v1296_v22 = vsel %vm5697_vm9, %v5696_v11, %v5695_v60  ;;  %vm5711_vm9 = vcmask 809984   ;;  %v5722_v4 = vld [vmem:[#allocation101_spill] sm:$0xff]  ;;  %v5724_v11 = vld [vmem:[#allocation108_spill] sm:$0xff] }
 0xad3   : > { %v1121_v53 = vadd.f32 %v1113_v36, %v1060_v32  ;;  %v1601_v1 = vsel %vm5711_vm9, %v5710_v49, %v5709_v47  ;;  %v5716_v36 = vld [vmem:[#allocation89_spill] sm:$0xff]  ;;  %vm5723_vm9 = vcmask 777216   ;;  %v5734_v47 = vld [vmem:[#allocation136_spill] sm:$0xff] }
 0xad4   : > { %v1723_v32 = vsel %vm5717_vm6, %v5716_v36, %v5715_v25  ;;  %vm5729_vm6 = vcmask 695296   ;;  %v5735_v49 = vld [vmem:[#allocation133_spill] sm:$0xff]  ;;  %v3634_v36 = vmov 28  }
 0xad5   : > { %v1182_v50 = vadd.f32 %v1174_v45, %v1121_v53  ;;  %v5719_v45 = vld [vmem:[#allocation95_spill] sm:$0xff] }
 0xad6   : > { %v2355_v56 = vpop.permute.xlu0 %2354 }
 0xad7   : > { %v2359_v17 = vpop.permute.xlu1 %2358  ;;  %v2365_v34 = vmul.f32 %v2355_v56, %v4046_v23  ;;  %v2366_v29 = vmul.f32 %v2355_v56, %v4062_v33  ;;  %v1243_v58 = vadd.f32 %v1235_v21, %v1182_v50  ;;  %v5698_v56 = vld [vmem:[#allocation55_spill] sm:$0xff]  ;;  %v1845_v21 = vsel %vm5723_vm9, %v5722_v4, %v5721_v54 }
 0xad8   : > { %v2367_v10 = vmul.f32 %v2359_v17, %v4132_v5  ;;  %v2368_v62 = vmul.f32 %v2359_v17, %v4116_v12  ;;  %v5699_v17 = vld [vmem:[#allocation57_spill] sm:$0xff]  ;;  %vm5769_vm9 = vcmask 809984  }
 0xada   : > { %2385 = vrot.lane.b32.xlu1 %v2365_v34, %s3633_s24  ;;  %2389 = vrot.lane.b32.xlu0 %v2367_v10, %s3633_s24  ;;  %v1357_v34 = vsel %vm5700_vm10, %v5699_v17, %v5698_v56  ;;  %v1304_v10 = vadd.f32 %v1296_v22, %v1243_v58  ;;  %vm5714_vm10 = vcmask 801792   ;;  %v5725_v22 = vld [vmem:[#allocation107_spill] sm:$0xff] }
 0xadb   : > { %2381 = vrot.lane.b32.xlu2 %v2363_v19, %s3633_s24  ;;  %v5701_v19 = vld [vmem:[#allocation61_spill] sm:$0xff]  ;;  %v1662_v37 = vsel %vm5714_vm10, %v5713_v9, %v5712_v42  ;;  %vm5726_vm10 = vcmask 703488   ;;  %v2211_v42 = vsel %vm2210_vm0, %v4765_v2, %v4809_v27 }
 0xadc   : > { %v1365_v55 = vadd.f32 %v1357_v34, %v1304_v10  ;;  %v1906_v58 = vsel %vm5726_vm10, %v5725_v22, %v5724_v11  ;;  %v5727_v34 = vld [vmem:[#allocation115_spill] sm:$0xff]  ;;  %v5728_v10 = vld [vmem:[#allocation113_spill] sm:$0xff]  ;;  %vm5772_vm10 = vcmask 801792  }
 0xae2   : > { %2391 = vrot.lane.b32.xlu1 %v2368_v62, %s3633_s24  ;;  %2411 = vperm.xlu0 %3539, %v3877_v52   ;;  %v5702_v62 = vld [vmem:[#allocation59_spill] sm:$0xff] }
 0xae3   : > { %2387 = vrot.lane.b32.xlu2 %v2366_v29, %s3633_s24  ;;  %v1418_v29 = vsel %vm5703_vm8, %v5702_v62, %v5701_v19  ;;  %vm5720_vm8 = vcmask 785408   ;;  %v1967_v19 = vsel %vm5729_vm6, %v5728_v10, %v5727_v34  ;;  %vm5775_vm6 = vcmask 793600  }
 0xae4   : > { %v1426_v26 = vadd.f32 %v1418_v29, %v1365_v55  ;;  %v1784_v53 = vsel %vm5720_vm8, %v5719_v45, %v5718_v28  ;;  %vm2515_vm8 = vcmask 556032  }
 0xae6   : > { %v1487_v43 = vadd.f32 %v1479_v7, %v1426_v26  ;;  %v2028_v7 = vsel %vm2027_vm13, %v5731_v24, %v5730_v31  ;;  %v3636_v31 = vmov 29   ;;  %v3637_v24 = vmov 30  }
 0xae8   : > { %v1548_v41 = vadd.f32 %v1540_v15, %v1487_v43  ;;  %v2089_v15 = vsel %vm2088_vm14, %v5733_v44, %v5732_v48 }
 0xaea   : > { %2415 = vperm.xlu1 %3540, %v3897_v59   ;;  %v1609_v39 = vadd.f32 %v1601_v1, %v1548_v41  ;;  %v2150_v1 = vsel %vm2149_vm15, %v5735_v49, %v5734_v47  ;;  %3541 = vset.pattern.permute.xlu0 %v3634_v36 }
 0xaeb   : > { %2407 = vperm.xlu2 %3538, %v3860_v40  }
 0xaec   : > { %v1670_v20 = vadd.f32 %v1662_v37, %v1609_v39  ;;  %v2272_v39 = vsel %vm2271_vm11, %v4907_v46, %v4912_v14 }
 0xaee   : > { %v1731_v50 = vadd.f32 %v1723_v32, %v1670_v20 }
 0xaf0   : > { %v1792_v60 = vadd.f32 %v1784_v53, %v1731_v50 }
 0xaf2   : > { %v1853_v17 = vadd.f32 %v1845_v21, %v1792_v60  ;;  %3542 = vset.pattern.permute.xlu1 %v3634_v36 }
 0xaf3   : > { %2419 = vperm.xlu2 %3538, %v3929_v8  }
 0xaf4   : > { %v1914_v29 = vadd.f32 %v1906_v58, %v1853_v17 }
 0xaf6   : > { %v1975_v26 = vadd.f32 %v1967_v19, %v1914_v29 }
 0xaf8   : > { %v2036_v43 = vadd.f32 %v2028_v7, %v1975_v26 }
 0xafa   : > { %v2097_v41 = vadd.f32 %v2089_v15, %v2036_v43 }
 0xafb   : > { %3543 = vset.pattern.permute.xlu2 %v3634_v36 }
 0xafc   : > { %v2158_v37 = vadd.f32 %v2150_v1, %v2097_v41 }
 0xafe   : > { %v2219_v25 = vadd.f32 %v2211_v42, %v2158_v37 }
 0xb00   : > { %v2280_v32 = vadd.f32 %v2272_v39, %v2219_v25 }
 0xb02   : > { %v2341_v20 = vadd.f32 %v4950_v63, %v2280_v32  ;;  %v3639_v32 = vmov 31  }
 0xb2c   : > { %v2378_v6 = vpop.permute.xlu2 %2377 }
 0xb33   : > { %v2384_v56 = vpop.permute.xlu0 %2383 }
 0xb35   : > { %v2382_v62 = vpop.permute.xlu2 %2381 }
 0xb36   : > { %v5035_v55 = vsel %vm2393_vm12, %v2382_v62, %v2384_v56 }
 0xb3d   : > { %v2388_v9 = vpop.permute.xlu2 %2387 }
 0xb44   : > { %v2380_v28 = vpop.permute.xlu1 %2379 }
 0xb45   : > { %v2394_v45 = vsel %vm2393_vm12, %v2378_v6, %v2380_v28  ;;  %v2408_v53 = vpop.permute.xlu2 %2407  ;;  %v3641_v28 = vmov 34  }
 0xb46   : > { %v2402_v50 = vadd.f32 %v2394_v45, %v2341_v20  ;;  %v2422_v2 = vmul.f32 %v2408_v53, %v3964_v30  ;;  %v2423_v27 = vmul.f32 %v2408_v53, %v3952_v18  ;;  %v3640_v20 = vmov 32  }
 0xb47   : > { %v3642_v45 = vmov 33   ;;  %v3643_v53 = vmov 35  }
 0xb48   : > { %2440 = vrot.lane.b32.xlu2 %v2423_v27, %s3635_s26  ;;  %2438 = vrot.lane.b32.xlu1 %v2422_v2, %s3635_s26 }
 0xb4c   : > { %v2386_v46 = vpop.permute.xlu1 %2385  ;;  %v2390_v14 = vpop.permute.xlu0 %2389 }
 0xb4d   : > { %v2396_v54 = vsel %vm2393_vm12, %v2386_v46, %v2388_v9  ;;  %v2420_v58 = vpop.permute.xlu2 %2419 }
 0xb4e   : > { %v2404_v4 = vadd.f32 %v2396_v54, %v4957_v61  ;;  %v2428_v61 = vmul.f32 %v2420_v58, %v4132_v5  ;;  %v2429_v10 = vmul.f32 %v2420_v58, %v4116_v12 }
 0xb54   : > { %v2392_v21 = vpop.permute.xlu1 %2391  ;;  %v2412_v63 = vpop.permute.xlu0 %2411 }
 0xb55   : > { %v2397_v60 = vsel %vm2393_vm12, %v2390_v14, %v2392_v21  ;;  %v2424_v6 = vmul.f32 %v2412_v63, %v3998_v51  ;;  %v2425_v11 = vmul.f32 %v2412_v63, %v5627_v0  ;;  %vm2454_vm12 = vcmask 564224  }
 0xb56   : > { %v2405_v22 = vadd.f32 %v2397_v60, %v4964_v13 }
 0xb57   : > { %2442 = vrot.lane.b32.xlu0 %v2424_v6, %s3635_s26  ;;  %2444 = vrot.lane.b32.xlu1 %v2425_v11, %s3635_s26 }
 0xb5c   : > { %v2416_v56 = vpop.permute.xlu1 %2415 }
 0xb5d   : > { %v2426_v17 = vmul.f32 %v2416_v56, %v4046_v23  ;;  %v2427_v34 = vmul.f32 %v2416_v56, %v4062_v33 }
 0xb5f   : > { %2448 = vrot.lane.b32.xlu0 %v2427_v34, %s3635_s26  ;;  %2446 = vrot.lane.b32.xlu2 %v2426_v17, %s3635_s26 }
 0xb60   : > { %2450 = vrot.lane.b32.xlu1 %v2428_v61, %s3635_s26 }
 0xb67   : > { %2468 = vperm.xlu0 %3541, %v3860_v40   ;;  %2452 = vrot.lane.b32.xlu2 %v2429_v10, %s3635_s26 }
 0xb68   : > { %2472 = vperm.xlu1 %3542, %v3877_v52  }
 0xb6f   : > { %2476 = vperm.xlu2 %3543, %v3897_v59   ;;  %3545 = vset.pattern.permute.xlu0 %v3636_v31 }
 0xb70   : > { %2480 = vperm.xlu1 %3542, %v3929_v8  }
 0xb77   : > { %3544 = vset.pattern.permute.xlu2 %v3636_v31 }
 0xb78   : > { %3546 = vset.pattern.permute.xlu1 %v3637_v24 }
 0xba2   : > { %v2441_v13 = vpop.permute.xlu2 %2440 }
 0xbb9   : > { %v2447_v7 = vpop.permute.xlu2 %2446 }
 0xbba   : > { %v2439_v19 = vpop.permute.xlu1 %2438 }
 0xbbb   : > { %v2455_v62 = vsel %vm2454_vm12, %v2439_v19, %v2441_v13 }
 0xbbc   : > { %v5071_v29 = vadd.f32 %v2455_v62, %v2402_v50  ;;  %v5736_v50 = vmov 0  }
 0xbc1   : > { %v2453_v43 = vpop.permute.xlu2 %2452 }
 0xbc9   : > { %v2443_v26 = vpop.permute.xlu0 %2442  ;;  %v2445_v48 = vpop.permute.xlu1 %2444 }
 0xbca   : > { %v5074_v44 = vsel %vm2454_vm12, %v2443_v26, %v2445_v48  ;;  %v2477_v2 = vpop.permute.xlu2 %2476 }
 0xbcb   : > { %v2487_v46 = vmul.f32 %v2477_v2, %v4046_v23 }
 0xbd1   : > { %v2449_v15 = vpop.permute.xlu0 %2448 }
 0xbd2   : > { %v2457_v47 = vsel %vm2454_vm12, %v2447_v7, %v2449_v15  ;;  %v2451_v49 = vpop.permute.xlu1 %2450 }
 0xbd3   : > { %v5077_v1 = vadd.f32 %v2457_v47, %v2404_v4  ;;  %v2458_v41 = vsel %vm2454_vm12, %v2451_v49, %v2453_v43  ;;  %vm5778_vm12 = vcmask 785408  }
 0xbd4   : > { %v5080_v42 = vadd.f32 %v2458_v41, %v2405_v22 }
 0xbd9   : > { %v2469_v9 = vpop.permute.xlu0 %2468 }
 0xbda   : > { %v2483_v37 = vmul.f32 %v2469_v9, %v3964_v30  ;;  %v2484_v39 = vmul.f32 %v2469_v9, %v3952_v18  ;;  %v5084_v25 = vpop.permute.xlu1 %2472 }
 0xbdb   : > { %v2485_v36 = vmul.f32 %v5084_v25, %v3998_v51  ;;  %v2486_v58 = vmul.f32 %v5084_v25, %v5627_v0 }
 0xbdc   : > { %2501 = vrot.lane.b32.xlu0 %v2484_v39, %s3638_s27  ;;  %2499 = vrot.lane.b32.xlu2 %v2483_v37, %s3638_s27 }
 0xbdd   : > { %2503 = vrot.lane.b32.xlu1 %v2485_v36, %s3638_s27 }
 0xbe4   : > { %2541 = vperm.xlu0 %3545, %v3929_v8   ;;  %2537 = vperm.xlu2 %3544, %v3897_v59  }
 0xbe5   : > { %2598 = vperm.xlu1 %3546, %v3897_v59  }
 0xbec   : > { %3550 = vset.pattern.permute.xlu0 %v3639_v32  ;;  %3547 = vset.pattern.permute.xlu2 %v3637_v24 }
 0xbed   : > { %3548 = vset.pattern.permute.xlu1 %v3636_v31  ;;  %2659 = vperm.xlu0 %3550, %v3897_v59  }
 0xbee   : > { %2602 = vperm.xlu2 %3547, %v3929_v8   ;;  %2529 = vperm.xlu1 %3548, %v3860_v40  }
 0xbf5   : > { %3555 = vset.pattern.permute.xlu0 %v3640_v20 }
 0xbf6   : > { %3549 = vset.pattern.permute.xlu2 %v3636_v31  ;;  %3551 = vset.pattern.permute.xlu1 %v3639_v32 }
 0xbf7   : > { %2724 = vperm.xlu0 %3555, %v3929_v8   ;;  %2533 = vperm.xlu2 %3549, %v3877_v52  }
 0xbf8   : > { %2663 = vperm.xlu1 %3551, %v3929_v8  }
 0xbff   : > { %2712 = vperm.xlu0 %3555, %v3860_v40   ;;  %3552 = vset.pattern.permute.xlu2 %v3637_v24 }
 0xc00   : > { %3553 = vset.pattern.permute.xlu1 %v3637_v24  ;;  %2590 = vperm.xlu2 %3552, %v3860_v40  }
 0xc01   : > { %2594 = vperm.xlu1 %3553, %v3877_v52  }
 0xc07   : > { %3562 = vset.pattern.permute.xlu0 %v3641_v28 }
 0xc08   : > { %2846 = vperm.xlu0 %3562, %v3929_v8   ;;  %3554 = vset.pattern.permute.xlu2 %v3640_v20 }
 0xc09   : > { %3556 = vset.pattern.permute.xlu1 %v3639_v32  ;;  %2720 = vperm.xlu2 %3554, %v3897_v59  }
 0xc0a   : > { %2651 = vperm.xlu1 %3556, %v3860_v40  }
 0xc10   : > { %2834 = vperm.xlu0 %3562, %v3860_v40  }
 0xc11   : > { %3557 = vset.pattern.permute.xlu2 %v3639_v32 }
 0xc12   : > { %3558 = vset.pattern.permute.xlu1 %v3642_v45  ;;  %2655 = vperm.xlu2 %3557, %v3877_v52  }
 0xc13   : > { %2781 = vperm.xlu1 %3558, %v3897_v59  }
 0xc18   : > { %3568 = vset.pattern.permute.xlu0 %v3643_v53 }
 0xc19   : > { %2899 = vperm.xlu0 %3568, %v3877_v52  }
 0xc1a   : > { %3559 = vset.pattern.permute.xlu2 %v3642_v45 }
 0xc1b   : > { %3560 = vset.pattern.permute.xlu1 %v3640_v20  ;;  %2785 = vperm.xlu2 %3559, %v3929_v8  }
 0xc1c   : > { %2716 = vperm.xlu1 %3560, %v3877_v52  }
 0xc21   : > { %3569 = vset.pattern.permute.xlu0 %v5736_v50 }
 0xc22   : > { %799 = vperm.xlu0 %3569, %v3877_v52  }
 0xc23   : > { %3561 = vset.pattern.permute.xlu2 %v3641_v28 }
 0xc24   : > { %3563 = vset.pattern.permute.xlu1 %v3642_v45  ;;  %2842 = vperm.xlu2 %3561, %v3897_v59  }
 0xc25   : > { %2773 = vperm.xlu1 %3563, %v3860_v40  }
 0xc2c   : > { %3564 = vset.pattern.permute.xlu2 %v3642_v45 }
 0xc2d   : > { %3565 = vset.pattern.permute.xlu1 %v3643_v53  ;;  %2777 = vperm.xlu2 %3564, %v3877_v52  }
 0xc2e   : > { %2903 = vperm.xlu1 %3565, %v3897_v59   ;;  %v2481_v59 = vpop.permute.xlu1 %2480 }
 0xc2f   : > { %v2489_v4 = vmul.f32 %v2481_v59, %v4132_v5 }
 0xc35   : > { %3566 = vset.pattern.permute.xlu2 %v3643_v53 }
 0xc36   : > { %3567 = vset.pattern.permute.xlu1 %v3641_v28  ;;  %2907 = vperm.xlu2 %3566, %v3929_v8   ;;  %v2500_v27 = vpop.permute.xlu2 %2499  ;;  %v2488_v8 = vmul.f32 %v2477_v2, %v4062_v33 }
 0xc37   : > { %2838 = vperm.xlu1 %3567, %v3877_v52   ;;  %v2490_v52 = vmul.f32 %v2481_v59, %v4116_v12 }
 0xc3e   : > { %2895 = vperm.xlu2 %3566, %v3860_v40   ;;  %v2538_v14 = vpop.permute.xlu2 %2537 }
 0xc3f   : > { %2507 = vrot.lane.b32.xlu1 %v2487_v46, %s3638_s27  ;;  %v2548_v54 = vmul.f32 %v2538_v14, %v4046_v23  ;;  %v2549_v21 = vmul.f32 %v2538_v14, %v4062_v33 }
 0xc40   : > { %3570 = vset.pattern.permute.xlu1 %v5736_v50 }
 0xc41   : > { %2568 = vrot.lane.b32.xlu0 %v2548_v54, %s3644_s28 }
 0xc46   : > { %2509 = vrot.lane.b32.xlu2 %v2488_v8, %s3638_s27 }
 0xc47   : > { %2511 = vrot.lane.b32.xlu1 %v2489_v4, %s3638_s27  ;;  %3571 = vset.pattern.permute.xlu2 %v5736_v50 }
 0xc48   : > { %v2603_v40 = vpop.permute.xlu2 %2602 }
 0xc49   : > { %v2611_v13 = vmul.f32 %v2603_v40, %v4132_v5  ;;  %v2612_v26 = vmul.f32 %v2603_v40, %v4116_v12 }
 0xc4e   : > { %2513 = vrot.lane.b32.xlu2 %v2490_v52, %s3638_s27  ;;  %v2502_v63 = vpop.permute.xlu0 %2501 }
 0xc4f   : > { %2570 = vrot.lane.b32.xlu1 %v2549_v21, %s3644_s28  ;;  %v2516_v60 = vsel %vm2515_vm8, %v2500_v27, %v2502_v63  ;;  %v5136_v6 = vpop.permute.xlu1 %2503 }
 0xc50   : > { %v5139_v11 = vadd.f32 %v2516_v60, %v5071_v29 }
 0xc51   : > { %v2534_v22 = vpop.permute.xlu2 %2533 }
 0xc52   : > { %v2546_v41 = vmul.f32 %v2534_v22, %v3998_v51  ;;  %v2547_v9 = vmul.f32 %v2534_v22, %v5627_v0 }
 0xc56   : > { %v2542_v56 = vpop.permute.xlu0 %2541 }
 0xc57   : > { %2505 = vrot.lane.b32.xlu1 %v2486_v58, %s3638_s27  ;;  %v2550_v17 = vmul.f32 %v2542_v56, %v4132_v5  ;;  %v2551_v34 = vmul.f32 %v2542_v56, %v4116_v12  ;;  %v2599_v61 = vpop.permute.xlu1 %2598 }
 0xc58   : > { %v2609_v19 = vmul.f32 %v2599_v61, %v4046_v23  ;;  %v2610_v62 = vmul.f32 %v2599_v61, %v4062_v33  ;;  %v5738_v61 = vld [vmem:[#allocation30_spill] sm:$0xff] }
 0xc59   : > { %2572 = vrot.lane.b32.xlu2 %v2550_v17, %s3644_s28  ;;  %2574 = vrot.lane.b32.xlu0 %v2551_v34, %s3644_s28  ;;  %v5737_v34 = vld [vmem:[#allocation23_spill] sm:$0xff] }
 0xc5a   : > { %v2591_v10 = vpop.permute.xlu2 %2590 }
 0xc5b   : > { %v2605_v2 = vmul.f32 %v2591_v10, %v3964_v30  ;;  %v2606_v27 = vmul.f32 %v2591_v10, %v3952_v18  ;;  %v870_v10 = vsel %vm868_vm1, %v5738_v61, %v5737_v34  ;;  %vm5749_vm1 = vcmask 932864   ;;  %v5752_v61 = vld [vmem:[#allocation25_spill] sm:$0xff] }
 0xc5f   : > { %2633 = vrot.lane.b32.xlu1 %v2611_v13, %s3645_s29  ;;  %v2660_v29 = vpop.permute.xlu0 %2659 }
 0xc60   : > { %v2530_v31 = vpop.permute.xlu1 %2529  ;;  %v2670_v49 = vmul.f32 %v2660_v29, %v4046_v23  ;;  %v2671_v32 = vmul.f32 %v2660_v29, %v4062_v33 }
 0xc61   : > { %2629 = vrot.lane.b32.xlu2 %v2609_v19, %s3645_s29  ;;  %2631 = vrot.lane.b32.xlu0 %v2610_v62, %s3645_s29  ;;  %v2545_v7 = vmul.f32 %v2530_v31, %v3952_v18  ;;  %v2544_v48 = vmul.f32 %v2530_v31, %v3964_v30  ;;  %v5739_v31 = vld [vmem:[#allocation13_spill] sm:$0xff] }
 0xc63   : > { %v2721_v24 = vpop.permute.xlu2 %2720 }
 0xc64   : > { %v2732_v14 = vmul.f32 %v2721_v24, %v4062_v33  ;;  %v2731_v59 = vmul.f32 %v2721_v24, %v4046_v23  ;;  %v5740_v24 = vld [vmem:[#allocation26_spill] sm:$0xff] }
 0xc67   : > { %2562 = vrot.lane.b32.xlu1 %v2545_v7, %s3644_s28  ;;  %v931_v7 = vsel %vm929_vm2, %v5740_v24, %v5739_v31  ;;  %vm5754_vm2 = vcmask 916480   ;;  %v5755_v31 = vld [vmem:[#allocation58_spill] sm:$0xff]  ;;  %v5756_v24 = vld [vmem:[#allocation53_spill] sm:$0xff] }
 0xc69   : > { %v2725_v15 = vpop.permute.xlu0 %2724  ;;  %2560 = vrot.lane.b32.xlu0 %v2544_v48, %s3644_s28  ;;  %2635 = vrot.lane.b32.xlu2 %v2612_v26, %s3645_s29 }
 0xc6a   : > { %v2664_v43 = vpop.permute.xlu1 %2663  ;;  %v2733_v63 = vmul.f32 %v2725_v15, %v4132_v5  ;;  %v2734_v60 = vmul.f32 %v2725_v15, %v4116_v12  ;;  %v5741_v15 = vld [vmem:[#allocation33_spill] sm:$0xff] }
 0xc6b   : > { %v2673_v25 = vmul.f32 %v2664_v43, %v4116_v12  ;;  %v2672_v20 = vmul.f32 %v2664_v43, %v4132_v5  ;;  %v5742_v43 = vld [vmem:[#allocation16_spill] sm:$0xff] }
 0xc6c   : > { %v2656_v47 = vpop.permute.xlu2 %2655 }
 0xc6d   : > { %v2669_v56 = vmul.f32 %v2656_v47, %v5627_v0  ;;  %v2668_v13 = vmul.f32 %v2656_v47, %v3998_v51  ;;  %v992_v47 = vsel %vm990_vm3, %v5742_v43, %v5741_v15  ;;  %vm5757_vm3 = vcmask 908288  }
 0xc6f   : > { %2690 = vrot.lane.b32.xlu1 %v2670_v49, %s3646_s30 }
 0xc71   : > { %v5164_v37 = vpop.permute.xlu0 %2712  ;;  %2566 = vrot.lane.b32.xlu0 %v2547_v9, %s3644_s28  ;;  %2564 = vrot.lane.b32.xlu2 %v2546_v41, %s3644_s28  ;;  %v5743_v41 = vld [vmem:[#allocation29_spill] sm:$0xff]  ;;  %v5744_v9 = vld [vmem:[#allocation36_spill] sm:$0xff] }
 0xc73   : > { %v2595_v39 = vpop.permute.xlu1 %2594 }
 0xc74   : > { %v2607_v53 = vmul.f32 %v2595_v39, %v3998_v51  ;;  %v2608_v8 = vmul.f32 %v2595_v39, %v5627_v0  ;;  %v1053_v39 = vsel %vm1051_vm4, %v5744_v9, %v5743_v41  ;;  %vm5760_vm4 = vcmask 900096  }
 0xc75   : > { %v5169_v36 = vpop.permute.xlu2 %2785 }
 0xc76   : > { %v2795_v15 = vmul.f32 %v5169_v36, %v4116_v12 }
 0xc77   : > { %2696 = vrot.lane.b32.xlu1 %v2673_v25, %s3646_s30  ;;  %v2794_v25 = vmul.f32 %v5169_v36, %v4132_v5 }
 0xc79   : > { %2694 = vrot.lane.b32.xlu0 %v2672_v20, %s3646_s30  ;;  %2692 = vrot.lane.b32.xlu2 %v2671_v32, %s3646_s30  ;;  %v5745_v20 = vld [vmem:[#allocation19_spill] sm:$0xff] }
 0xc7a   : > { %v5176_v28 = vpop.permute.xlu0 %2846 }
 0xc7c   : > { %v2652_v45 = vpop.permute.xlu1 %2651 }
 0xc7d   : > { %v2666_v52 = vmul.f32 %v2652_v45, %v3964_v30  ;;  %v2667_v19 = vmul.f32 %v2652_v45, %v3952_v18  ;;  %v5746_v45 = vld [vmem:[#allocation32_spill] sm:$0xff] }
 0xc7e   : > { %v5179_v50 = vpop.permute.xlu2 %2842 }
 0xc7f   : > { %2625 = vrot.lane.b32.xlu1 %v2607_v53, %s3645_s29  ;;  %v1114_v53 = vsel %vm1112_vm5, %v5746_v45, %v5745_v20  ;;  %vm5763_vm5 = vcmask 891904   ;;  %v5764_v45 = vld [vmem:[#allocation74_spill] sm:$0xff] }
 0xc81   : > { %2623 = vrot.lane.b32.xlu0 %v2606_v27, %s3645_s29  ;;  %2621 = vrot.lane.b32.xlu2 %v2605_v2, %s3645_s29 }
 0xc82   : > { %v5186_v46 = vpop.permute.xlu0 %2834 }
 0xc85   : > { %v2782_v54 = vpop.permute.xlu1 %2781 }
 0xc86   : > { %v2792_v2 = vmul.f32 %v2782_v54, %v4046_v23  ;;  %v2793_v27 = vmul.f32 %v2782_v54, %v4062_v33 }
 0xc87   : > { %2753 = vrot.lane.b32.xlu1 %v2732_v14, %s3647_s11  ;;  %v5192_v4 = vpop.permute.xlu2 %2777 }
 0xc89   : > { %2627 = vrot.lane.b32.xlu2 %v2608_v8, %s3645_s29  ;;  %2751 = vrot.lane.b32.xlu0 %v2731_v59, %s3647_s11  ;;  %v5747_v59 = vld [vmem:[#allocation39_spill] sm:$0xff]  ;;  %v5748_v8 = vld [vmem:[#allocation22_spill] sm:$0xff] }
 0xc8b   : > { %v5196_v40 = vpop.permute.xlu0 %2899 }
 0xc8e   : > { %v2717_v21 = vpop.permute.xlu1 %2716 }
 0xc8f   : > { %2682 = vrot.lane.b32.xlu1 %v2666_v52, %s3646_s30  ;;  %v1175_v52 = vsel %vm5749_vm1, %v5748_v8, %v5747_v59  ;;  %v5767_v59 = vld [vmem:[#allocation78_spill] sm:$0xff]  ;;  %v5768_v8 = vld [vmem:[#allocation80_spill] sm:$0xff]  ;;  %vm5781_vm1 = vcmask 777216  }
 0xc90   : > { %v5202_v22 = vpop.permute.xlu2 %2907 }
 0xc91   : > { %2755 = vrot.lane.b32.xlu2 %v2733_v63, %s3647_s11  ;;  %2757 = vrot.lane.b32.xlu0 %v2734_v60, %s3647_s11 }
 0xc94   : > { %v800_v58 = vpop.permute.xlu0 %799 }
 0xc95   : > { %v813_v17 = vmul.f32 %v800_v58, %v3998_v51 }
 0xc97   : > { %v878_v62 = vadd.f32 %v870_v10, %v813_v17  ;;  %v5213_v29 = vpop.permute.xlu1 %2773  ;;  %2688 = vrot.lane.b32.xlu1 %v2669_v56, %s3646_s30  ;;  %v5750_v56 = vld [vmem:[#allocation35_spill] sm:$0xff]  ;;  %v5751_v17 = vld [vmem:[#allocation42_spill] sm:$0xff] }
 0xc98   : > { %v5219_v26 = vpop.permute.xlu2 %2895  ;;  %v1236_v54 = vsel %vm1234_vm7, %v5751_v17, %v5750_v56  ;;  %v5753_v10 = vld [vmem:[#allocation38_spill] sm:$0xff]  ;;  %vm5766_vm7 = vcmask 818176   ;;  %v2730_v56 = vmul.f32 %v2717_v21, %v5627_v0 }
 0xc99   : > { %v939_v48 = vadd.f32 %v931_v7, %v878_v62  ;;  %2684 = vrot.lane.b32.xlu2 %v2667_v19, %s3646_s30  ;;  %2686 = vrot.lane.b32.xlu0 %v2668_v13, %s3646_s30  ;;  %v1297_v13 = vsel %vm5754_vm2, %v5753_v10, %v5752_v61  ;;  %v2728_v19 = vmul.f32 %v5164_v37, %v3952_v18  ;;  %vm5784_vm2 = vcmask 703488  }
 0xc9a   : > { %v1358_v7 = vsel %vm5757_vm3, %v5756_v24, %v5755_v31  ;;  %vm5787_vm3 = vcmask 695296  }
 0xc9b   : > { %v1000_v49 = vadd.f32 %v992_v47, %v939_v48  ;;  %v2727_v48 = vmul.f32 %v5164_v37, %v3964_v30  ;;  %v5758_v47 = vld [vmem:[#allocation60_spill] sm:$0xff] }
 0xc9d   : > { %v1061_v32 = vadd.f32 %v1053_v39, %v1000_v49  ;;  %v5759_v49 = vld [vmem:[#allocation62_spill] sm:$0xff] }
 0xc9e   : > { %v1419_v41 = vsel %vm5760_vm4, %v5759_v49, %v5758_v47  ;;  %v2856_v49 = vmul.f32 %v5176_v28, %v4116_v12  ;;  %vm2576_vm4 = vcmask 547840  }
 0xc9f   : > { %v1122_v14 = vadd.f32 %v1114_v53, %v1061_v32  ;;  %2816 = vrot.lane.b32.xlu1 %v2794_v25, %s3648_s15  ;;  %v5761_v25 = vld [vmem:[#allocation68_spill] sm:$0xff]  ;;  %v5762_v32 = vld [vmem:[#allocation66_spill] sm:$0xff]  ;;  %v5765_v53 = vld [vmem:[#allocation73_spill] sm:$0xff] }
 0xca0   : > { %v5240_v63 = vpop.permute.xlu1 %2903  ;;  %v2510_v58 = vpop.permute.xlu2 %2509  ;;  %v1480_v37 = vsel %vm5763_vm5, %v5762_v32, %v5761_v25  ;;  %v5780_v25 = vld [vmem:[#allocation102_spill] sm:$0xff]  ;;  %vm2995_vm5 = vcmask 261120  }
 0xca1   : > { %v1183_v60 = vadd.f32 %v1175_v52, %v1122_v14  ;;  %2812 = vrot.lane.b32.xlu2 %v2792_v2, %s3648_s15  ;;  %2814 = vrot.lane.b32.xlu0 %v2793_v27, %s3648_s15  ;;  %v1541_v2 = vsel %vm5766_vm7, %v5765_v53, %v5764_v45  ;;  %v2853_v27 = vmul.f32 %v5179_v50, %v4046_v23  ;;  %v5783_v45 = vld [vmem:[#allocation109_spill] sm:$0xff] }
 0xca2   : > { %v1602_v52 = vsel %vm5769_vm9, %v5768_v8, %v5767_v59  ;;  %v5786_v59 = vld [vmem:[#allocation116_spill] sm:$0xff] }
 0xca3   : > { %v1244_v34 = vadd.f32 %v1236_v54, %v1183_v60  ;;  %v2729_v60 = vmul.f32 %v2717_v21, %v3998_v51  ;;  %v5770_v54 = vld [vmem:[#allocation86_spill] sm:$0xff] }
 0xca5   : > { %v1305_v62 = vadd.f32 %v1297_v13, %v1244_v34  ;;  %v5771_v34 = vld [vmem:[#allocation84_spill] sm:$0xff] }
 0xca6   : > { %v1663_v61 = vsel %vm5772_vm10, %v5771_v34, %v5770_v54  ;;  %v2790_v34 = vmul.f32 %v5192_v4, %v3998_v51 }
 0xca7   : > { %v1366_v43 = vadd.f32 %v1358_v7, %v1305_v62  ;;  %2745 = vrot.lane.b32.xlu1 %v2728_v19, %s3647_s11  ;;  %v5773_v19 = vld [vmem:[#allocation92_spill] sm:$0xff]  ;;  %v5774_v62 = vld [vmem:[#allocation91_spill] sm:$0xff] }
 0xca8   : > { %v2514_v36 = vpop.permute.xlu2 %2513  ;;  %v1724_v31 = vsel %vm5775_vm6, %v5774_v62, %v5773_v19  ;;  %v2788_v62 = vmul.f32 %v5213_v29, %v3964_v30 }
 0xca9   : > { %v1427_v9 = vadd.f32 %v1419_v41, %v1366_v43  ;;  %v5263_v39 = vpop.permute.xlu1 %2838  ;;  %2743 = vrot.lane.b32.xlu0 %v2727_v48, %s3647_s11  ;;  %2818 = vrot.lane.b32.xlu2 %v2795_v15, %s3648_s15  ;;  %v5776_v15 = vld [vmem:[#allocation96_spill] sm:$0xff]  ;;  %v5777_v43 = vld [vmem:[#allocation98_spill] sm:$0xff] }
 0xcaa   : > { %v1785_v47 = vsel %vm5778_vm12, %v5777_v43, %v5776_v15 }
 0xcab   : > { %v1488_v20 = vadd.f32 %v1480_v37, %v1427_v9  ;;  %v5779_v9 = vld [vmem:[#allocation104_spill] sm:$0xff]  ;;  %v2855_v37 = vmul.f32 %v5176_v28, %v4132_v5 }
 0xcac   : > { %v1846_v32 = vsel %vm5781_vm1, %v5780_v25, %v5779_v9 }
 0xcad   : > { %v1549_v14 = vadd.f32 %v1541_v2, %v1488_v20  ;;  %v5782_v20 = vld [vmem:[#allocation110_spill] sm:$0xff] }
 0xcae   : > { %v1907_v53 = vsel %vm5784_vm2, %v5783_v45, %v5782_v20  ;;  %v2914_v20 = vmul.f32 %v5240_v63, %v4046_v23 }
 0xcaf   : > { %v1610_v17 = vadd.f32 %v1602_v52, %v1549_v14  ;;  %2873 = vrot.lane.b32.xlu1 %v2853_v27, %s3649_s16  ;;  %v5785_v14 = vld [vmem:[#allocation114_spill] sm:$0xff] }
 0xcb0   : > { %v1968_v28 = vsel %vm5787_vm3, %v5786_v59, %v5785_v14 }
 0xcb1   : > { %v1671_v10 = vadd.f32 %v1663_v61, %v1610_v17  ;;  %v2508_v13 = vpop.permute.xlu1 %2507  ;;  %2749 = vrot.lane.b32.xlu0 %v2730_v56, %s3647_s11  ;;  %2747 = vrot.lane.b32.xlu2 %v2729_v60, %s3647_s11  ;;  %v5788_v56 = vld [vmem:[#allocation122_spill] sm:$0xff]  ;;  %v5789_v17 = vld [vmem:[#allocation120_spill] sm:$0xff] }
 0xcb2   : > { %v2518_v21 = vsel %vm2515_vm8, %v2508_v13, %v2510_v58  ;;  %v2029_v54 = vsel %vm2027_vm13, %v5789_v17, %v5788_v56  ;;  %v5791_v13 = vld [vmem:[#allocation127_spill] sm:$0xff]  ;;  %vm2637_vm13 = vcmask 474112  }
 0xcb3   : > { %v2526_v24 = vadd.f32 %v2518_v21, %v5077_v1  ;;  %v2573_v7 = vpop.permute.xlu2 %2572  ;;  %v1732_v48 = vadd.f32 %v1724_v31, %v1671_v10  ;;  %v2854_v1 = vmul.f32 %v5179_v50, %v4062_v33  ;;  %v5790_v10 = vld [vmem:[#allocation128_spill] sm:$0xff]  ;;  %v5792_v31 = vld [vmem:[#allocation134_spill] sm:$0xff]  ;;  %v5793_v21 = vld [vmem:[#allocation137_spill] sm:$0xff]  ;;  %v2569_v15 = vpop.permute.xlu0 %2568 }
 0xcb4   : > { %v2090_v19 = vsel %vm2088_vm14, %v5791_v13, %v5790_v10  ;;  %vm2698_vm14 = vcmask 465920  }
 0xcb5   : > { %v1793_v41 = vadd.f32 %v1785_v47, %v1732_v48  ;;  %v2151_v48 = vsel %vm2149_vm15, %v5793_v21, %v5792_v31  ;;  %vm2759_vm15 = vcmask 457728  }
 0xcb7   : > { %2879 = vrot.lane.b32.xlu1 %v2856_v49, %s3649_s16  ;;  %v1854_v58 = vadd.f32 %v1846_v32, %v1793_v41  ;;  %v2212_v49 = vsel %vm2210_vm0, %v4782_v57, %v4807_v16  ;;  %v2273_v32 = vsel %vm2271_vm11, %v4923_v35, %v4925_v3  ;;  %vm2820_vm0 = vcmask 449536  }
 0xcb8   : > { %vm2881_vm11 = vcmask 441344  }
 0xcb9   : > { %v2512_v2 = vpop.permute.xlu1 %2511  ;;  %2877 = vrot.lane.b32.xlu0 %v2855_v37, %s3649_s16  ;;  %2875 = vrot.lane.b32.xlu2 %v2854_v1, %s3649_s16  ;;  %v1915_v27 = vadd.f32 %v1907_v53, %v1854_v58  ;;  %v2915_v37 = vmul.f32 %v5240_v63, %v4062_v33  ;;  %v2791_v58 = vmul.f32 %v5192_v4, %v5627_v0 }
 0xcba   : > { %v2519_v8 = vsel %vm2515_vm8, %v2512_v2, %v2514_v36  ;;  %v2849_v63 = vmul.f32 %v5186_v46, %v3964_v30  ;;  %v2917_v53 = vmul.f32 %v5202_v22, %v4116_v12  ;;  %v2850_v12 = vmul.f32 %v5186_v46, %v3952_v18 }
 0xcbb   : > { %v2527_v50 = vadd.f32 %v2519_v8, %v5080_v42  ;;  %v2630_v52 = vpop.permute.xlu2 %2629  ;;  %v1976_v60 = vadd.f32 %v1968_v28, %v1915_v27  ;;  %v2789_v42 = vmul.f32 %v5213_v29, %v3952_v18  ;;  %v2910_v46 = vmul.f32 %v5219_v26, %v3964_v30 }
 0xcbc   : > { %v2913_v30 = vmul.f32 %v5196_v40, %v5627_v0 }
 0xcbd   : > { %v2037_v61 = vadd.f32 %v2029_v54, %v1976_v60  ;;  %v2912_v60 = vmul.f32 %v5196_v40, %v3998_v51 }
 0xcbf   : > { %2808 = vrot.lane.b32.xlu1 %v2790_v34, %s3648_s15  ;;  %v2098_v36 = vadd.f32 %v2090_v19, %v2037_v61 }
 0xcc1   : > { %v2571_v43 = vpop.permute.xlu1 %2570  ;;  %2806 = vrot.lane.b32.xlu0 %v2789_v42, %s3648_s15  ;;  %2804 = vrot.lane.b32.xlu2 %v2788_v62, %s3648_s15  ;;  %v2159_v47 = vadd.f32 %v2151_v48, %v2098_v36  ;;  %v3031_v36 = vld [vmem:[%s5467_s9 + $0x8] sm:$0xff] }
 0xcc2   : > { %v2579_v29 = vsel %vm2576_vm4, %v2569_v15, %v2571_v43 }
 0xcc3   : > { %v2587_v41 = vadd.f32 %v2579_v29, %v2526_v24  ;;  %v2636_v9 = vpop.permute.xlu2 %2635  ;;  %v2220_v25 = vadd.f32 %v2212_v49, %v2159_v47 }
 0xcc5   : > { %v2281_v1 = vadd.f32 %v2273_v32, %v2220_v25 }
 0xcc7   : > { %2936 = vrot.lane.b32.xlu1 %v2915_v37, %s3650_s17  ;;  %v2342_v57 = vadd.f32 %v4954_v38, %v2281_v1 }
 0xcc9   : > { %v2403_v16 = vadd.f32 %v5035_v55, %v2342_v57  ;;  %v2506_v24 = vpop.permute.xlu1 %2505  ;;  %2934 = vrot.lane.b32.xlu0 %v2914_v20, %s3650_s17  ;;  %2810 = vrot.lane.b32.xlu2 %v2791_v58, %s3648_s15  ;;  %v2916_v55 = vmul.f32 %v5202_v22, %v4132_v5  ;;  %v2852_v5 = vmul.f32 %v5263_v39, %v5627_v0 }
 0xcca   : > { %v2517_v4 = vsel %vm2515_vm8, %v5136_v6, %v2506_v24  ;;  %v2851_v22 = vmul.f32 %v5263_v39, %v3998_v51  ;;  %v2911_v39 = vmul.f32 %v5219_v26, %v3952_v18  ;;  %v2963_v18 = vld [vmem:[%s5465_s7 + $0x10] sm:$0xff]  ;;  %vm2942_vm8 = vcmask 433152  }
 0xccb   : > { %v2464_v33 = vadd.f32 %v5074_v44, %v2403_v16  ;;  %v2575_v35 = vpop.permute.xlu0 %2574  ;;  %v2565_v3 = vpop.permute.xlu2 %2564 }
 0xccc   : > { %v2580_v23 = vsel %vm2576_vm4, %v2573_v7, %v2575_v35 }
 0xccd   : > { %v2525_v38 = vadd.f32 %v2517_v4, %v2464_v33  ;;  %v2588_v45 = vadd.f32 %v2580_v23, %v2527_v50 }
 0xccf   : > { %2865 = vrot.lane.b32.xlu1 %v2849_v63, %s3649_s16 }
 0xcd1   : > { %v2634_v44 = vpop.permute.xlu1 %2633  ;;  %2940 = vrot.lane.b32.xlu0 %v2917_v53, %s3650_s17  ;;  %2938 = vrot.lane.b32.xlu2 %v2916_v55, %s3650_s17 }
 0xcd2   : > { %v2641_v6 = vsel %vm2637_vm13, %v2634_v44, %v2636_v9 }
 0xcd3   : > { %v2649_v7 = vadd.f32 %v2641_v6, %v2588_v45  ;;  %v2632_v2 = vpop.permute.xlu0 %2631  ;;  %v2693_v27 = vpop.permute.xlu2 %2692 }
 0xcd4   : > { %v2640_v14 = vsel %vm2637_vm13, %v2630_v52, %v2632_v2 }
 0xcd5   : > { %v2648_v59 = vadd.f32 %v2640_v14, %v2587_v41 }
 0xcd7   : > { %2871 = vrot.lane.b32.xlu1 %v2852_v5, %s3649_s16 }
 0xcd9   : > { %v2563_v28 = vpop.permute.xlu1 %2562  ;;  %2869 = vrot.lane.b32.xlu0 %v2851_v22, %s3649_s16  ;;  %2867 = vrot.lane.b32.xlu2 %v2850_v12, %s3649_s16  ;;  %v2964_v22 = vld [vmem:[%s5465_s7 + $0x18] sm:$0xff] }
 0xcdb   : > { %v2561_v8 = vpop.permute.xlu0 %2560  ;;  %v2622_v50 = vpop.permute.xlu2 %2621 }
 0xcdc   : > { %v2577_v52 = vsel %vm2576_vm4, %v2561_v8, %v2563_v28 }
 0xcdd   : > { %v2585_v56 = vadd.f32 %v2577_v52, %v5139_v11 }
 0xcdf   : > { %2930 = vrot.lane.b32.xlu1 %v2912_v60, %s3650_s17 }
 0xce1   : > { %v2691_v17 = vpop.permute.xlu1 %2690  ;;  %2928 = vrot.lane.b32.xlu0 %v2911_v39, %s3650_s17  ;;  %2926 = vrot.lane.b32.xlu2 %v2910_v46, %s3650_s17 }
 0xce2   : > { %v2701_v54 = vsel %vm2698_vm14, %v2691_v17, %v2693_v27 }
 0xce3   : > { %v2709_v34 = vadd.f32 %v2701_v54, %v2648_v59  ;;  %v2567_v51 = vpop.permute.xlu0 %2566  ;;  %v2628_v61 = vpop.permute.xlu2 %2627 }
 0xce4   : > { %v2578_v11 = vsel %vm2576_vm4, %v2565_v3, %v2567_v51 }
 0xce5   : > { %v2586_v10 = vadd.f32 %v2578_v11, %v2525_v38  ;;  %v2961_v11 = vld [vmem:[%s5465_s7] sm:$0xff] }
 0xce7   : > { %2982 = vperm.xlu1 %3570, %v2964_v22  }
 0xce9   : > { %v2697_v26 = vpop.permute.xlu1 %2696  ;;  %2977 = vperm.xlu0 %3569, %v2963_v18   ;;  %2932 = vrot.lane.b32.xlu2 %v2913_v30, %s3650_s17 }
 0xceb   : > { %v2695_v13 = vpop.permute.xlu0 %2694  ;;  %v2756_v19 = vpop.permute.xlu2 %2755 }
 0xcec   : > { %v2702_v62 = vsel %vm2698_vm14, %v2695_v13, %v2697_v26 }
 0xced   : > { %v2710_v42 = vadd.f32 %v2702_v62, %v2649_v7  ;;  %v3030_v62 = vld [vmem:[%s5467_s9] sm:$0xff] }
 0xcf1   : > { %v2626_v31 = vpop.permute.xlu1 %2625  ;;  %3040 = vperm.xlu0 %3569, %v3031_v36   ;;  %2967 = vperm.xlu2 %3571, %v2961_v11  }
 0xcf2   : > { %v2639_v21 = vsel %vm2637_vm13, %v2626_v31, %v2628_v61  ;;  %v2962_v61 = vld [vmem:[%s5465_s7 + $0x8] sm:$0xff] }
 0xcf3   : > { %v2647_v48 = vadd.f32 %v2639_v21, %v2586_v10  ;;  %v2624_v15 = vpop.permute.xlu0 %2623  ;;  %v2685_v0 = vpop.permute.xlu2 %2684  ;;  %2972 = vperm.xlu1 %3570, %v2962_v61  }
 0xcf4   : > { %v2638_v40 = vsel %vm2637_vm13, %v2622_v50, %v2624_v15 }
 0xcf5   : > { %v2646_v43 = vadd.f32 %v2638_v40, %v2585_v56 }
 0xcf9   : > { %v2754_v47 = vpop.permute.xlu1 %2753  ;;  %3035 = vperm.xlu2 %3571, %v3030_v62  }
 0xcfb   : > { %v2752_v49 = vpop.permute.xlu0 %2751  ;;  %v2813_v29 = vpop.permute.xlu2 %2812 }
 0xcfc   : > { %v2762_v41 = vsel %vm2759_vm15, %v2752_v49, %v2754_v47 }
 0xcfd   : > { %v2770_v9 = vadd.f32 %v2762_v41, %v2709_v34 }
 0xd01   : > { %v2683_v25 = vpop.permute.xlu1 %2682 }
 0xd02   : > { %v2699_v32 = vsel %vm2698_vm14, %v2683_v25, %v2685_v0 }
 0xd03   : > { %v5401_v37 = vadd.f32 %v2699_v32, %v2646_v43  ;;  %v2758_v1 = vpop.permute.xlu0 %2757  ;;  %v2819_v58 = vpop.permute.xlu2 %2818 }
 0xd04   : > { %v2763_v20 = vsel %vm2759_vm15, %v2756_v19, %v2758_v1 }
 0xd05   : > { %v2771_v57 = vadd.f32 %v2763_v20, %v2710_v42  ;;  %v3032_v42 = vld [vmem:[%s5467_s9 + $0x10] sm:$0xf] }
 0xd06   : > { %3045 = vperm.xlu1 %3570, %v3032_v42  }
 0xd09   : > { %v2689_v16 = vpop.permute.xlu1 %2688 }
 0xd0b   : > { %v2687_v24 = vpop.permute.xlu0 %2686  ;;  %v2748_v33 = vpop.permute.xlu2 %2747 }
 0xd0c   : > { %v2700_v35 = vsel %vm2698_vm14, %v2687_v24, %v2689_v16 }
 0xd0d   : > { %v2708_v3 = vadd.f32 %v2700_v35, %v2647_v48 }
 0xd11   : > { %v2817_v4 = vpop.permute.xlu1 %2816 }
 0xd12   : > { %v2824_v8 = vsel %vm2820_vm0, %v2817_v4, %v2819_v58 }
 0xd13   : > { %v2815_v23 = vpop.permute.xlu0 %2814  ;;  %v2876_v63 = vpop.permute.xlu2 %2875  ;;  %v2832_v56 = vadd.f32 %v2824_v8, %v2771_v57  ;;  %v3359_v8 = vld [vmem:[%s5466_s8] sm:$0xff] }
 0xd14   : > { %v2823_v50 = vsel %vm2820_vm0, %v2813_v29, %v2815_v23 }
 0xd15   : > { %v2831_v46 = vadd.f32 %v2823_v50, %v2770_v9 }
 0xd19   : > { %v2746_v38 = vpop.permute.xlu1 %2745 }
 0xd1b   : > { %v2744_v45 = vpop.permute.xlu0 %2743  ;;  %v2805_v55 = vpop.permute.xlu2 %2804 }
 0xd1c   : > { %v2760_v31 = vsel %vm2759_vm15, %v2744_v45, %v2746_v38 }
 0xd1d   : > { %v2768_v0 = vadd.f32 %v2760_v31, %v5401_v37  ;;  %v3357_v37 = vld [vmem:[%s5464_s6] sm:$0xff] }
 0xd21   : > { %v2874_v53 = vpop.permute.xlu1 %2873 }
 0xd22   : > { %v2884_v52 = vsel %vm2881_vm11, %v2874_v53, %v2876_v63 }
 0xd23   : > { %v2750_v44 = vpop.permute.xlu0 %2749  ;;  %v2811_v6 = vpop.permute.xlu2 %2810  ;;  %v2892_v54 = vadd.f32 %v2884_v52, %v2831_v46 }
 0xd24   : > { %v2761_v21 = vsel %vm2759_vm15, %v2748_v33, %v2750_v44  ;;  %v3358_v33 = vld [vmem:[%s5464_s6 + $0x8] sm:$0xff] }
 0xd25   : > { %v2769_v40 = vadd.f32 %v2761_v21, %v2708_v3 }
 0xd29   : > { %v2880_v7 = vpop.permute.xlu1 %2879 }
 0xd2b   : > { %v2878_v2 = vpop.permute.xlu0 %2877  ;;  %v2939_v14 = vpop.permute.xlu2 %2938 }
 0xd2c   : > { %v2885_v60 = vsel %vm2881_vm11, %v2878_v2, %v2880_v7 }
 0xd2d   : > { %v2893_v34 = vadd.f32 %v2885_v60, %v2832_v56 }
 0xd31   : > { %v2809_v27 = vpop.permute.xlu1 %2808 }
 0xd32   : > { %v2822_v48 = vsel %vm2820_vm0, %v2809_v27, %v2811_v6 }
 0xd33   : > { %v2807_v5 = vpop.permute.xlu0 %2806  ;;  %v2868_v28 = vpop.permute.xlu2 %2867  ;;  %v2830_v49 = vadd.f32 %v2822_v48, %v2769_v40 }
 0xd34   : > { %v2821_v15 = vsel %vm2820_vm0, %v2805_v55, %v2807_v5 }
 0xd35   : > { %v2829_v29 = vadd.f32 %v2821_v15, %v2768_v0 }
 0xd39   : > { %v2937_v59 = vpop.permute.xlu1 %2936 }
 0xd3b   : > { %v2935_v12 = vpop.permute.xlu0 %2934  ;;  %v2927_v26 = vpop.permute.xlu2 %2926 }
 0xd3c   : > { %v2945_v17 = vsel %vm2942_vm8, %v2935_v12, %v2937_v59 }
 0xd3d   : > { %v2953_v18 = vadd.f32 %v2945_v17, %v2892_v54 }
 0xd41   : > { %v2866_v39 = vpop.permute.xlu1 %2865 }
 0xd42   : > { %v2882_v43 = vsel %vm2881_vm11, %v2866_v39, %v2868_v28 }
 0xd43   : > { %v2941_v51 = vpop.permute.xlu0 %2940  ;;  %v2933_v41 = vpop.permute.xlu2 %2932  ;;  %v2890_v32 = vadd.f32 %v2882_v43, %v2829_v29 }
 0xd44   : > { %v2946_v10 = vsel %vm2942_vm8, %v2939_v14, %v2941_v51  ;;  %v3027_v14 = vld [vmem:[%s5466_s8 + $0x8] sm:$0x3] }
 0xd45   : > { %v2954_v30 = vadd.f32 %v2946_v10, %v2893_v34  ;;  %v3053_v12 = vunpack.c.l.b16 %v3027_v14 }
 0xd47   : > { %v2960_v13 = vpack.c.bf16 %v2954_v30, %v2953_v18  ;;  %v3055_v50 = vpack.c.b16 %v3053_v12, %v3053_v12 }
 0xd49   : > { %v2872_v19 = vpop.permute.xlu1 %2871  ;;  %3008 = vmatpush.bf16.msrb.mxu0 %v2960_v13  ;;  %3360 = vmatpush.bf16.msra.mxu1 %v2960_v13 }
 0xd4b   : > { %v2870_v36 = vpop.permute.xlu0 %2869  ;;  %v2968_v45 = vpop.permute.xlu2 %2967 }
 0xd4c   : > { %v2883_v47 = vsel %vm2881_vm11, %v2870_v36, %v2872_v19 }
 0xd4d   : > { %v2891_v1 = vadd.f32 %v2883_v47, %v2830_v49 }
 0xd51   : > { %v2931_v9 = vpop.permute.xlu1 %2930 }
 0xd52   : > { %v2944_v25 = vsel %vm2942_vm8, %v2931_v9, %v2933_v41 }
 0xd53   : > { %v2929_v58 = vpop.permute.xlu0 %2928  ;;  %v2952_v57 = vadd.f32 %v2944_v25, %v2891_v1  ;;  %v3036_v60 = vpop.permute.xlu2 %3035 }
 0xd54   : > { %v2943_v20 = vsel %vm2942_vm8, %v2927_v26, %v2929_v58 }
 0xd55   : > { %v2951_v16 = vadd.f32 %v2943_v20, %v2890_v32 }
 0xd57   : > { %v2959_v24 = vpack.c.bf16 %v2952_v57, %v2951_v16 }
 0xd59   : > { %3009 = vmatpush.bf16.msrb.mxu0 %v2959_v24  ;;  %3361 = vmatpush.bf16.msra.mxu1 %v2959_v24  ;;  %v2983_v35 = vpop.permute.xlu1 %2982 }
 0xd5b   : > { %v2978_v23 = vpop.permute.xlu0 %2977 }
 0xd5c   : > { %3312 = vmatmul.msk.bf16.vlgmr.msrb.gmra.mxu0 %vm2995_vm5, %v3357_v37  ;;  %3313 = vmatmul.msk.bf16.vlgmr.msra.gmra.mxu1 %vm2995_vm5, %v3358_v33 }
 0xd63   : > { %v3041_v54 = vpop.permute.xlu0 %3040 }
 0xd65   : > { %v2973_v63 = vpop.permute.xlu1 %2972 }
 0xd78   : > { %v3046_v52 = vpop.permute.xlu1 %3045 }
 0xdd9   : > { %v3011_v3 = vpop.f32.mrf.mxu0  ;;  %v3016_v4 = vpop.f32.mrf.mxu1 }
 0xdda   : > { %v3017_v38 = vadd.f32 %v3016_v4, %v2978_v23  ;;  %v3012_v27 = vadd.f32 %v3011_v3, %v2968_v45 }
 0xddc   : > { %v3023_v7 = vmax.f32 %v3017_v38, 0.0  ;;  %v3021_v22 = vmax.f32 %v3012_v27, 0.0 }
 0xde1   : > { %v3013_v55 = vpop.f32.mrf.mxu0  ;;  %v3018_v53 = vpop.f32.mrf.mxu1 }
 0xde2   : > { %v3014_v44 = vadd.f32 %v3013_v55, %v2973_v63  ;;  %v3019_v6 = vadd.f32 %v3018_v53, %v2983_v35 }
 0xde4   : > { %v3024_v2 = vmax.f32 %v3019_v6, 0.0  ;;  %v3022_v5 = vmax.f32 %v3014_v44, 0.0 }
 0xde6   : > { %v3029_v59 = vpack.c.bf16 %v3024_v2, %v3023_v7  ;;  %v3028_v28 = vpack.c.bf16 %v3022_v5, %v3021_v22 }
 0xde8   : > { %3068 = vmatpush.bf16.msrb.mxu2 %v3029_v59  ;;  %3362 = vmatpush.bf16.msra.mxu3 %v3029_v59 }
 0xdec   : > { %3069 = vmatpush.bf16.msrb.mxu2 %v3028_v28  ;;  %3363 = vmatpush.bf16.msra.mxu3 %v3028_v28 }
 0xdef   : > { %3318 = vmatmul.msk.bf16.vlgmr.msrb.gmra.mxu2 %vm2995_vm5, %v3359_v8  ;;  %3319 = vmatmul.msk.bf16.vlgmr.msra.gmra.mxu3 %vm2995_vm5, %v3055_v50 }
 0xe72   : > { %v3071_v56 = vpop.f32.mrf.mxu2  ;;  %v3076_v46 = vpop.f32.mrf.mxu3 }
 0xe73   : > { %v3072_v39 = vadd.f32 %v3071_v56, %v3036_v60  ;;  %v3077_v17 = vadd.f32 %v3076_v46, %v3046_v52 }
 0xe75   : > { %3080 = vst [vmem:[%s379_s23] sm:$0xff] %v3072_v39 }
 0xe76   : > { %3082 = vst [vmem:[%s379_s23 + $0x10] sm:$0xf] %v3077_v17 }
 0xe7a   : > { %v3073_v34 = vpop.f32.mrf.mxu2  ;;  %v3078_v51 = vpop.f32.mrf.mxu3 }
 0xe7b   : > { %v3074_v61 = vadd.f32 %v3073_v34, %v3041_v54 }
 0xe7d   : > { %3081 = vst [vmem:[%s379_s23 + $0x8] sm:$0xff] %v3074_v61 }
 0xe7e PF: > { %s20_s13 = sadd.s32 1, %s3578_s13  }
 0xe7f   : > { %p17_p4 = scmp.ge.s32.totalorder %s20_s13, 4  }
 0xe81   :  { %19 = sbr.rel (!%p17_p4) target bundleno = 1 (0x1), region = 93 }

</bundles_post_ra>
